<compile_context>
chip_gen: v5e
topology: v5e:2x2
jax: 0.10.0
libtpu: 0.0.40
codegen_flags: <defaults>
</compile_context>

<pallas_src>
import functools

import numpy as np
import jax
import jax.numpy as jnp
from jax.experimental import pallas as pl
from jax.experimental.pallas import tpu as pltpu

# ---------------- module config (consistent with KPDetector.__init__) ----------------
BLOCK_EXPANSION = 8
NUM_KP = 8
NUM_CHANNELS = 4
MAX_FEATURES = 32
NUM_BLOCKS = 2
TEMPERATURE = 0.1
SCALE_FACTOR = 1      # TODO(synk): AntiAliasInterpolation2d (scale_factor != 1) not implemented
PAD = 3
BN_EPS = 1e-5
SPATIAL = 16          # input H == W this fused kernel is specialised for


# ================================ fused Pallas kernel =================================
def _kp_detector_kernel(
    x_ref,
    we0_ref, be0_ref, ph0_ref, pw0_ref,
    we1_ref, be1_ref, ph1_ref, pw1_ref,
    uh1_ref, uw1_ref, wd1_ref, bd1_ref,
    uh0_ref, uw0_ref, wd0_ref, bd0_ref,
    wkp_ref, bkp_ref,
    gx_ref, gy_ref,
    out_ref,
    *, inv_temp, num_kp,
):
    f32 = jnp.float32
    bf16 = jnp.bfloat16

    def conv_band(a, w_ref):
        # Conv2d(stride=1, padding=k//2) as kh banded-Toeplitz GEMMs.  The lane (width)
        # zero padding is baked into w_ref, so only rows are padded here, and the f32->
        # bf16 cast + pad happen exactly once per conv (outside the kh loop).
        # a: (H, W*Cin) f32; w_ref: (kh, W*Cin, W*Cout) bf16 -> (H, W*Cout) f32.
        h = a.shape[0]
        kh = w_ref.shape[0]
        p = (kh - 1) // 2
        zr = jnp.zeros((p, a.shape[1]), bf16)
        ap = jnp.concatenate([zr, a.astype(bf16), zr], axis=0)      # single pad + cast
        acc = jnp.zeros((h, w_ref.shape[2]), f32)
        for di in range(kh):
            acc = acc + jnp.dot(ap[di:di + h, :], w_ref[di],
                                preferred_element_type=f32)
        return acc

    def sandwich(a, l_ref, r_ref):
        # out = L @ a @ R  (2x avg-pool / 2x nearest-upsample as constant matmuls).
        t = jnp.dot(l_ref[...], a.astype(bf16), preferred_element_type=f32)
        return jnp.dot(t.astype(bf16), r_ref[...], preferred_element_type=f32)

    x = x_ref[0]                                                    # (16, 16*4)

    # ---- Hourglass encoder: DownBlock2d = conv3x3 + folded-BN + relu + avgpool2 ----
    e0 = jnp.maximum(conv_band(x, we0_ref) + be0_ref[...], 0.0)     # (16, 16*16)
    e0p = sandwich(e0, ph0_ref, pw0_ref)                            # (8, 8*16)
    e1 = jnp.maximum(conv_band(e0p, we1_ref) + be1_ref[...], 0.0)   # (8, 8*32)
    e1p = sandwich(e1, ph1_ref, pw1_ref)                            # (4, 4*32)

    # ---- Hourglass decoder: UpBlock2d = upsample2x + conv3x3 + folded-BN + relu;
    #      torch skip-concats become 128-aligned lane concats + K-stacked weights
    #      (one GEMM per kernel row instead of two). ----
    u1 = sandwich(e1p, uh1_ref, uw1_ref)                            # (8, 8*32)
    d1 = jnp.maximum(conv_band(u1, wd1_ref) + bd1_ref[...], 0.0)    # (8, 8*16)

    ua = sandwich(d1, uh0_ref, uw0_ref)                             # (16, 16*16)
    ub = sandwich(e0p, uh0_ref, uw0_ref)                            # (16, 16*16)
    cat0 = jnp.concatenate([ua, ub], axis=1)                        # (16, 512), 128-aligned
    d0 = jnp.maximum(conv_band(cat0, wd0_ref) + bd0_ref[...], 0.0)  # (16, 16*8)

    # ---- kp 7x7 conv on feature_map = concat(d0, x), fused K=192 GEMMs ----
    feat = jnp.concatenate([d0, x], axis=1)                         # (16, 192)
    pred = conv_band(feat, wkp_ref) + bkp_ref[...]                  # (16, 16*K)

    # ---- softmax(/T) + gaussian2kp + kp2gaussian, per keypoint k = lane % K ----
    width = pred.shape[1]                                           # 128 (= W * K)
    # per-keypoint reduction via a log2 rotate tree; the result is ALREADY broadcast
    # across all W lane-groups, so no re-tiling is needed downstream.
    shifts = []
    s = num_kp
    while s < width:                                                # 8, 16, 32, 64
        shifts.append(s)
        s *= 2

    def ksum(a):                      # (H, W*K) f32 -> (1, W*K) per-k sum (bcast over w)
        r = jnp.sum(a, axis=0, keepdims=True)
        for sh in shifts:
            r = r + pltpu.roll(r, sh, 1)
        return r

    def kmax(a):
        r = jnp.max(a, axis=0, keepdims=True)
        for sh in shifts:
            r = jnp.maximum(r, pltpu.roll(r, sh, 1))
        return r

    p_sc = pred * inv_temp
    e = jnp.exp(p_sc - kmax(p_sc))
    hm = e * pl.reciprocal(ksum(e), approx=False)                   # heatmap (16, 16*K)

    gx = gx_ref[...]                                                # (16, 16*K) grid x
    gy = gy_ref[...]                                                # (16, 16*K) grid y
    mx = ksum(hm * gx)                                              # (1, 16*K) mean x (bcast)
    my = ksum(hm * gy)
    dx = gx - mx
    dy = gy - my
    hdx = hm * dx
    hdy = hm * dy
    cxx = ksum(hdx * dx)
    cxy = ksum(hdx * dy)
    cyy = ksum(hdy * dy)

    # kp2gaussian: exp(-0.5 * d^T covar^{-1} d) with analytic 2x2 inverse.
    # TODO(synk): the 1e-8 det guard differs from torch.inverse for singular covar.
    det = cxx * cyy - cxy * cxy + 1e-8
    inv_det = pl.reciprocal(det, approx=False)
    ia = cyy * inv_det
    ib = -cxy * inv_det
    idd = cxx * inv_det
    under = ia * dx * dx + 2.0 * ib * dx * dy + idd * dy * dy
    gauss = jnp.exp(-0.5 * under)                                   # (16, 16*K)

    # Single lane-dense output slab: rows 0..15 gauss heatmap, rows 16..20 stats
    # (mx, my, cxx, cxy, cyy — per-k values broadcast over lanes), rows 21..23 zero.
    out_ref[0] = jnp.concatenate(
        [gauss, mx, my, cxx, cxy, cyy, jnp.zeros((3, width), f32)], axis=0)


# ============================ host-side operand preparation ===========================
def _band_matrices(w_oihw, spatial_w):
    """Conv weight (O, Cin, kh, kw) -> (kh, W*Cin, W*O) banded-Toeplitz GEMM weights for
    the (H, W*C) activation layout, with the lane (width) zero padding folded in
    (out-of-range taps dropped)."""
    w = np.asarray(w_oihw, np.float32)
    o, cin, kh, kw = w.shape
    p = (kw - 1) // 2
    wt = np.transpose(w, (2, 3, 1, 0))                    # (kh, kw, Cin, O)
    m = np.zeros((kh, spatial_w * cin, spatial_w * o), np.float32)
    for di in range(kh):
        for wo in range(spatial_w):
            for dj in range(kw):
                wi = wo + dj - p
                if 0 <= wi < spatial_w:
                    m[di, wi * cin:(wi + 1) * cin, wo * o:(wo + 1) * o] = wt[di, dj]
    return m


def _pool_matrices(h, w, c):
    """2x2 average pool as out = Ph @ a @ Pw in the (H, W*C) layout."""
    ph = np.zeros((h // 2, h), np.float32)
    for i in range(h // 2):
        ph[i, 2 * i] = ph[i, 2 * i + 1] = 0.5
    pw = np.zeros((w * c, (w // 2) * c), np.float32)
    for ww in range(w):
        for cc in range(c):
            pw[ww * c + cc, (ww // 2) * c + cc] = 0.5
    return ph, pw


def _up_matrices(h, w, c):
    """2x nearest upsample as out = Uh @ a @ Uw in the (H, W*C) layout."""
    uh = np.zeros((2 * h, h), np.float32)
    for i in range(2 * h):
        uh[i, i // 2] = 1.0
    uw = np.zeros((w * c, 2 * w * c), np.float32)
    for ww in range(2 * w):
        for cc in range(c):
            uw[(ww // 2) * c + cc, ww * c + cc] = 1.0
    return uh, uw


def _conv_init(key, out_c, in_c, k):
    k1, k2 = jax.random.split(key)
    fan_in = in_c * k * k
    w = jax.random.normal(k1, (out_c, in_c, k, k), jnp.float32) / jnp.sqrt(float(fan_in))
    b = 0.01 * jax.random.normal(k2, (out_c,), jnp.float32)
    return w, b


def init_params(key):
    # eval-mode BatchNorm (fresh stats) folded into conv: scale = 1/sqrt(1+eps).
    bn_scale = 1.0 / jnp.sqrt(1.0 + BN_EPS)
    params = {"enc": [], "dec": []}
    for i in range(NUM_BLOCKS):
        cin = NUM_CHANNELS if i == 0 else min(MAX_FEATURES, BLOCK_EXPANSION * (2 ** i))
        cout = min(MAX_FEATURES, BLOCK_EXPANSION * (2 ** (i + 1)))
        key, sk = jax.random.split(key)
        w, b = _conv_init(sk, cout, cin, 3)
        params["enc"].append((w * bn_scale, b * bn_scale))
    for i in reversed(range(NUM_BLOCKS)):
        in_f = (1 if i == NUM_BLOCKS - 1 else 2) * min(MAX_FEATURES, BLOCK_EXPANSION * (2 ** (i + 1)))
        out_f = min(MAX_FEATURES, BLOCK_EXPANSION * (2 ** i))
        key, sk = jax.random.split(key)
        w, b = _conv_init(sk, out_f, in_f, 3)
        params["dec"].append((w * bn_scale, b * bn_scale))
    out_filters = BLOCK_EXPANSION + NUM_CHANNELS
    key, sk = jax.random.split(key)
    params["kp"] = _conv_init(sk, NUM_KP, out_filters, 7)
    return params


def prepare_operands(params, h0=SPATIAL):
    """Build the kernel operand set (bf16 GEMM weights, f32 biases/grids)."""
    (w_e0, b_e0), (w_e1, b_e1) = params["enc"]
    (w_d1, b_d1), (w_d0, b_d0) = params["dec"]
    w_kp, b_kp = params["kp"]
    bf = jnp.bfloat16
    s0, s1, s2 = h0, h0 // 2, h0 // 4
    c_e0, c_e1 = int(w_e0.shape[0]), int(w_e1.shape[0])          # 16, 32
    c_d1, c_d0 = int(w_d1.shape[0]), int(w_d0.shape[0])          # 16, 8
    assert (h0 & (h0 - 1)) == 0, "roll-tree reduction assumes power-of-two W"

    def tiled_bias(b, w):
        return jnp.asarray(np.tile(np.asarray(b, np.float32), w)[None, :])

    ops = {}
    # encoder block 0 (conv @16x16, 4->16) + pool 16->8
    ops["we0"] = jnp.asarray(_band_matrices(w_e0, s0), bf)               # (3, 64, 256)
    ops["be0"] = tiled_bias(b_e0, s0)
    ph, pw = _pool_matrices(s0, s0, c_e0)
    ops["ph0"], ops["pw0"] = jnp.asarray(ph, bf), jnp.asarray(pw, bf)
    # encoder block 1 (conv @8x8, 16->32) + pool 8->4
    ops["we1"] = jnp.asarray(_band_matrices(w_e1, s1), bf)               # (3, 128, 256)
    ops["be1"] = tiled_bias(b_e1, s1)
    ph, pw = _pool_matrices(s1, s1, c_e1)
    ops["ph1"], ops["pw1"] = jnp.asarray(ph, bf), jnp.asarray(pw, bf)
    # decoder block (i=1): upsample 4->8 (32 ch), conv @8x8 32->16
    uh, uw = _up_matrices(s2, s2, c_e1)
    ops["uh1"], ops["uw1"] = jnp.asarray(uh, bf), jnp.asarray(uw, bf)
    ops["wd1"] = jnp.asarray(_band_matrices(w_d1, s1), bf)               # (3, 256, 128)
    ops["bd1"] = tiled_bias(b_d1, s1)
    # decoder block (i=0): upsample 8->16 of concat(d1, e0p), conv @16x16 32->8.
    # The input-channel split (d1 part / e0p skip part) is stacked along GEMM K so the
    # kernel lane-concats the two upsampled inputs and issues ONE GEMM per kernel row.
    uh, uw = _up_matrices(s1, s1, c_d1)
    ops["uh0"], ops["uw0"] = jnp.asarray(uh, bf), jnp.asarray(uw, bf)
    w_d0 = np.asarray(w_d0)
    wd0a = _band_matrices(w_d0[:, :c_d1], s0)                            # d1 part
    wd0b = _band_matrices(w_d0[:, c_d1:], s0)                            # e0p skip part
    ops["wd0"] = jnp.asarray(np.concatenate([wd0a, wd0b], axis=1), bf)   # (3, 512, 128)
    ops["bd0"] = tiled_bias(b_d0, s0)
    # kp 7x7 conv on concat(d0, x), same K-stacking
    w_kp = np.asarray(w_kp)
    wkpa = _band_matrices(w_kp[:, :c_d0], s0)                            # d0 part
    wkpb = _band_matrices(w_kp[:, c_d0:], s0)                            # x skip part
    ops["wkp"] = jnp.asarray(np.concatenate([wkpa, wkpb], axis=1), bf)   # (7, 192, 128)
    ops["bkp"] = tiled_bias(b_kp, s0)
    # coordinate grids in the (H, W*K) layout (grid[...,0]=x varies along w, [...,1]=y)
    xs = 2.0 * (np.arange(h0, dtype=np.float32) / (h0 - 1)) - 1.0
    gx = np.repeat(xs, NUM_KP)[None, :].repeat(h0, axis=0)
    gy = np.repeat(xs[:, None], h0 * NUM_KP, axis=1)
    ops["gx"], ops["gy"] = jnp.asarray(gx), jnp.asarray(gy)
    return ops


_CONST_NAMES = ["we0", "be0", "ph0", "pw0", "we1", "be1", "ph1", "pw1",
                "uh1", "uw1", "wd1", "bd1", "uh0", "uw0", "wd0", "bd0",
                "wkp", "bkp", "gx", "gy"]


def _const_index_map(nd):
    def imap(i):
        return (0,) * nd
    return imap


# ================================ KPDetector forward ===================================
def kp_detector_forward(x, ops):
    """x: (N, C, H, W) NCHW (module boundary).  Returns dict(value, covar, gauss_heatmap_point)."""
    n, c, h, w = x.shape
    k = NUM_KP
    assert h == w == SPATIAL and c == NUM_CHANNELS
    # single boundary layout change: NCHW -> (N, H, W*C)
    x2d = jnp.transpose(x, (0, 2, 3, 1)).reshape(n, h, w * c)
    consts = [ops[name] for name in _CONST_NAMES]

    out = pl.pallas_call(
        functools.partial(_kp_detector_kernel, inv_temp=1.0 / TEMPERATURE, num_kp=k),
        # one lane-dense (H+8, W*K)=(24,128) slab per image: gauss rows + stat rows
        out_shape=jax.ShapeDtypeStruct((n, h + 8, w * k), jnp.float32),
        grid=(n,),
        in_specs=[pl.BlockSpec((1, h, w * c), lambda i: (i, 0, 0))]
                 + [pl.BlockSpec(a.shape, _const_index_map(a.ndim)) for a in consts],
        out_specs=pl.BlockSpec((1, h + 8, w * k), lambda i: (i, 0, 0)),
        compiler_params=pltpu.CompilerParams(dimension_semantics=("parallel",)),
    )(x2d, *consts)

    gauss2d = out[:, :h, :]
    mx, my = out[:, h, :k], out[:, h + 1, :k]
    cxx, cxy, cyy = out[:, h + 2, :k], out[:, h + 3, :k], out[:, h + 4, :k]
    value = jnp.stack([mx, my], axis=-1)                                         # (N, K, 2)
    covar = jnp.stack([cxx, cxy, cxy, cyy], axis=-1).reshape(n, k, 2, 2)         # (N, K, 2, 2)
    gauss = gauss2d.reshape(n, h, w, k).transpose(0, 3, 1, 2)                    # (N, K, H, W)
    return {"value": value, "covar": covar, "gauss_heatmap_point": gauss}


# ================================ main =================================================
if __name__ == "__main__":
    key = jax.random.PRNGKey(0)
    key_p, key_x = jax.random.split(key)
    params = init_params(key_p)
    ops = prepare_operands(params)

    x = jax.random.normal(key_x, (2, NUM_CHANNELS, SPATIAL, SPATIAL), jnp.float32)  # NCHW

    fwd = jax.jit(kp_detector_forward)
    out = fwd(x, ops)
    out = jax.tree_util.tree_map(jax.block_until_ready, out)

    assert out["value"].shape == (2, NUM_KP, 2)
    assert out["covar"].shape == (2, NUM_KP, 2, 2)
    assert out["gauss_heatmap_point"].shape == (2, NUM_KP, SPATIAL, SPATIAL)
    for v in jax.tree_util.tree_leaves(out):
        assert bool(jnp.all(jnp.isfinite(v)))

    print("KERNEL_OK")
</pallas_src>

<mosaic_0001>
module attributes {stable_mosaic.version = 11 : i64} {
  func.func @_kp_detector_kernel(%arg0: i32, %arg1: memref<1x16x64xf32, #tpu.memory_space<vmem>>, %arg2: memref<3x64x256xbf16, #tpu.memory_space<vmem>>, %arg3: memref<1x256xf32, #tpu.memory_space<vmem>>, %arg4: memref<8x16xbf16, #tpu.memory_space<vmem>>, %arg5: memref<256x128xbf16, #tpu.memory_space<vmem>>, %arg6: memref<3x128x256xbf16, #tpu.memory_space<vmem>>, %arg7: memref<1x256xf32, #tpu.memory_space<vmem>>, %arg8: memref<4x8xbf16, #tpu.memory_space<vmem>>, %arg9: memref<256x128xbf16, #tpu.memory_space<vmem>>, %arg10: memref<8x4xbf16, #tpu.memory_space<vmem>>, %arg11: memref<128x256xbf16, #tpu.memory_space<vmem>>, %arg12: memref<3x256x128xbf16, #tpu.memory_space<vmem>>, %arg13: memref<1x128xf32, #tpu.memory_space<vmem>>, %arg14: memref<16x8xbf16, #tpu.memory_space<vmem>>, %arg15: memref<128x256xbf16, #tpu.memory_space<vmem>>, %arg16: memref<3x512x128xbf16, #tpu.memory_space<vmem>>, %arg17: memref<1x128xf32, #tpu.memory_space<vmem>>, %arg18: memref<7x192x128xbf16, #tpu.memory_space<vmem>>, %arg19: memref<1x128xf32, #tpu.memory_space<vmem>>, %arg20: memref<16x128xf32, #tpu.memory_space<vmem>>, %arg21: memref<16x128xf32, #tpu.memory_space<vmem>>, %arg22: memref<1x24x128xf32, #tpu.memory_space<vmem>>) attributes {dimension_semantics = [#tpu.dimension_semantics<parallel>], iteration_bounds = array<i64: 2>, scalar_prefetch = 0 : i64, scratch_operands = 0 : i64, tpu.core_type = #tpu.core_type<tc>, window_params = [{transform_indices = @transform_0, window_bounds = array<i64: 1, 16, 64>}, {pipeline_mode = #tpu.pipeline_mode<synchronous>, transform_indices = @transform_1, window_bounds = array<i64: 3, 64, 256>}, {pipeline_mode = #tpu.pipeline_mode<synchronous>, transform_indices = @transform_2, window_bounds = array<i64: 1, 256>}, {pipeline_mode = #tpu.pipeline_mode<synchronous>, transform_indices = @transform_3, window_bounds = array<i64: 8, 16>}, {pipeline_mode = #tpu.pipeline_mode<synchronous>, transform_indices = @transform_4, window_bounds = array<i64: 256, 128>}, {pipeline_mode = #tpu.pipeline_mode<synchronous>, transform_indices = @transform_5, window_bounds = array<i64: 3, 128, 256>}, {pipeline_mode = #tpu.pipeline_mode<synchronous>, transform_indices = @transform_6, window_bounds = array<i64: 1, 256>}, {pipeline_mode = #tpu.pipeline_mode<synchronous>, transform_indices = @transform_7, window_bounds = array<i64: 4, 8>}, {pipeline_mode = #tpu.pipeline_mode<synchronous>, transform_indices = @transform_8, window_bounds = array<i64: 256, 128>}, {pipeline_mode = #tpu.pipeline_mode<synchronous>, transform_indices = @transform_9, window_bounds = array<i64: 8, 4>}, {pipeline_mode = #tpu.pipeline_mode<synchronous>, transform_indices = @transform_10, window_bounds = array<i64: 128, 256>}, {pipeline_mode = #tpu.pipeline_mode<synchronous>, transform_indices = @transform_11, window_bounds = array<i64: 3, 256, 128>}, {pipeline_mode = #tpu.pipeline_mode<synchronous>, transform_indices = @transform_12, window_bounds = array<i64: 1, 128>}, {pipeline_mode = #tpu.pipeline_mode<synchronous>, transform_indices = @transform_13, window_bounds = array<i64: 16, 8>}, {pipeline_mode = #tpu.pipeline_mode<synchronous>, transform_indices = @transform_14, window_bounds = array<i64: 128, 256>}, {pipeline_mode = #tpu.pipeline_mode<synchronous>, transform_indices = @transform_15, window_bounds = array<i64: 3, 512, 128>}, {pipeline_mode = #tpu.pipeline_mode<synchronous>, transform_indices = @transform_16, window_bounds = array<i64: 1, 128>}, {pipeline_mode = #tpu.pipeline_mode<synchronous>, transform_indices = @transform_17, window_bounds = array<i64: 7, 192, 128>}, {pipeline_mode = #tpu.pipeline_mode<synchronous>, transform_indices = @transform_18, window_bounds = array<i64: 1, 128>}, {pipeline_mode = #tpu.pipeline_mode<synchronous>, transform_indices = @transform_19, window_bounds = array<i64: 16, 128>}, {pipeline_mode = #tpu.pipeline_mode<synchronous>, transform_indices = @transform_20, window_bounds = array<i64: 16, 128>}, {transform_indices = @transform_21, window_bounds = array<i64: 1, 24, 128>}]} {
    %c0 = arith.constant 0 : index
    %c0_0 = arith.constant 0 : index
    %c0_1 = arith.constant 0 : index
    %0 = vector.load %arg1[%c0, %c0_0, %c0_1] : memref<1x16x64xf32, #tpu.memory_space<vmem>>, vector<1x16x64xf32>
    %1 = vector.shape_cast %0 : vector<1x16x64xf32> to vector<16x64xf32>
    %cst = arith.constant 0.000000e+00 : bf16
    %2 = vector.broadcast %cst : bf16 to vector<1x64xbf16>
    %3 = arith.truncf %1 : vector<16x64xf32> to vector<16x64xbf16>
    %4 = tpu.concatenate %2, %3, %2 in 0 : vector<1x64xbf16>, vector<16x64xbf16>, vector<1x64xbf16> -> vector<18x64xbf16>
    %cst_2 = arith.constant 0.000000e+00 : f32
    %5 = vector.broadcast %cst_2 : f32 to vector<16x256xf32>
    %6 = vector.extract_strided_slice %4 {offsets = [0, 0], sizes = [16, 64], strides = [1, 1]} : vector<18x64xbf16> to vector<16x64xbf16>
    %c0_3 = arith.constant 0 : index
    %c0_4 = arith.constant 0 : index
    %c0_5 = arith.constant 0 : index
    %7 = vector.load %arg2[%c0_3, %c0_4, %c0_5] : memref<3x64x256xbf16, #tpu.memory_space<vmem>>, vector<1x64x256xbf16>
    %8 = vector.shape_cast %7 : vector<1x64x256xbf16> to vector<64x256xbf16>
    %cst_6 = arith.constant dense<0.000000e+00> : vector<16x256xf32>
    %9 = tpu.matmul %6, %8, %cst_6 {dimension_numbers = #tpu.dot_dimension_numbers<[1], [0], [0], [1], [0, 0, 1, 1], [], []>} : vector<16x64xbf16>, vector<64x256xbf16>, vector<16x256xf32> -> vector<16x256xf32>
    %10 = arith.addf %5, %9 : vector<16x256xf32>
    %11 = vector.extract_strided_slice %4 {offsets = [1, 0], sizes = [16, 64], strides = [1, 1]} : vector<18x64xbf16> to vector<16x64xbf16>
    %c1 = arith.constant 1 : index
    %c0_7 = arith.constant 0 : index
    %c0_8 = arith.constant 0 : index
    %12 = vector.load %arg2[%c1, %c0_7, %c0_8] : memref<3x64x256xbf16, #tpu.memory_space<vmem>>, vector<1x64x256xbf16>
    %13 = vector.shape_cast %12 : vector<1x64x256xbf16> to vector<64x256xbf16>
    %cst_9 = arith.constant dense<0.000000e+00> : vector<16x256xf32>
    %14 = tpu.matmul %11, %13, %cst_9 {dimension_numbers = #tpu.dot_dimension_numbers<[1], [0], [0], [1], [0, 0, 1, 1], [], []>} : vector<16x64xbf16>, vector<64x256xbf16>, vector<16x256xf32> -> vector<16x256xf32>
    %15 = arith.addf %10, %14 : vector<16x256xf32>
    %16 = vector.extract_strided_slice %4 {offsets = [2, 0], sizes = [16, 64], strides = [1, 1]} : vector<18x64xbf16> to vector<16x64xbf16>
    %c2 = arith.constant 2 : index
    %c0_10 = arith.constant 0 : index
    %c0_11 = arith.constant 0 : index
    %17 = vector.load %arg2[%c2, %c0_10, %c0_11] : memref<3x64x256xbf16, #tpu.memory_space<vmem>>, vector<1x64x256xbf16>
    %18 = vector.shape_cast %17 : vector<1x64x256xbf16> to vector<64x256xbf16>
    %cst_12 = arith.constant dense<0.000000e+00> : vector<16x256xf32>
    %19 = tpu.matmul %16, %18, %cst_12 {dimension_numbers = #tpu.dot_dimension_numbers<[1], [0], [0], [1], [0, 0, 1, 1], [], []>} : vector<16x64xbf16>, vector<64x256xbf16>, vector<16x256xf32> -> vector<16x256xf32>
    %20 = arith.addf %15, %19 : vector<16x256xf32>
    %c0_13 = arith.constant 0 : index
    %c0_14 = arith.constant 0 : index
    %21 = vector.load %arg3[%c0_13, %c0_14] : memref<1x256xf32, #tpu.memory_space<vmem>>, vector<1x256xf32>
    %22 = vector.broadcast %21 : vector<1x256xf32> to vector<16x256xf32>
    %23 = arith.addf %20, %22 : vector<16x256xf32>
    %cst_15 = arith.constant 0.000000e+00 : f32
    %24 = vector.broadcast %cst_15 : f32 to vector<16x256xf32>
    %25 = arith.maximumf %23, %24 : vector<16x256xf32>
    %c0_16 = arith.constant 0 : index
    %c0_17 = arith.constant 0 : index
    %26 = vector.load %arg4[%c0_16, %c0_17] : memref<8x16xbf16, #tpu.memory_space<vmem>>, vector<8x16xbf16>
    %27 = arith.truncf %25 : vector<16x256xf32> to vector<16x256xbf16>
    %cst_18 = arith.constant dense<0.000000e+00> : vector<8x256xf32>
    %28 = tpu.matmul %26, %27, %cst_18 {dimension_numbers = #tpu.dot_dimension_numbers<[1], [0], [0], [1], [0, 0, 1, 1], [], []>} : vector<8x16xbf16>, vector<16x256xbf16>, vector<8x256xf32> -> vector<8x256xf32>
    %29 = arith.truncf %28 : vector<8x256xf32> to vector<8x256xbf16>
    %c0_19 = arith.constant 0 : index
    %c0_20 = arith.constant 0 : index
    %30 = vector.load %arg5[%c0_19, %c0_20] : memref<256x128xbf16, #tpu.memory_space<vmem>>, vector<256x128xbf16>
    %cst_21 = arith.constant dense<0.000000e+00> : vector<8x128xf32>
    %31 = tpu.matmul %29, %30, %cst_21 {dimension_numbers = #tpu.dot_dimension_numbers<[1], [0], [0], [1], [0, 0, 1, 1], [], []>} : vector<8x256xbf16>, vector<256x128xbf16>, vector<8x128xf32> -> vector<8x128xf32>
    %cst_22 = arith.constant 0.000000e+00 : bf16
    %32 = vector.broadcast %cst_22 : bf16 to vector<1x128xbf16>
    %33 = arith.truncf %31 : vector<8x128xf32> to vector<8x128xbf16>
    %34 = tpu.concatenate %32, %33, %32 in 0 : vector<1x128xbf16>, vector<8x128xbf16>, vector<1x128xbf16> -> vector<10x128xbf16>
    %cst_23 = arith.constant 0.000000e+00 : f32
    %35 = vector.broadcast %cst_23 : f32 to vector<8x256xf32>
    %36 = vector.extract_strided_slice %34 {offsets = [0, 0], sizes = [8, 128], strides = [1, 1]} : vector<10x128xbf16> to vector<8x128xbf16>
    %c0_24 = arith.constant 0 : index
    %c0_25 = arith.constant 0 : index
    %c0_26 = arith.constant 0 : index
    %37 = vector.load %arg6[%c0_24, %c0_25, %c0_26] : memref<3x128x256xbf16, #tpu.memory_space<vmem>>, vector<1x128x256xbf16>
    %38 = vector.shape_cast %37 : vector<1x128x256xbf16> to vector<128x256xbf16>
    %cst_27 = arith.constant dense<0.000000e+00> : vector<8x256xf32>
    %39 = tpu.matmul %36, %38, %cst_27 {dimension_numbers = #tpu.dot_dimension_numbers<[1], [0], [0], [1], [0, 0, 1, 1], [], []>} : vector<8x128xbf16>, vector<128x256xbf16>, vector<8x256xf32> -> vector<8x256xf32>
    %40 = arith.addf %35, %39 : vector<8x256xf32>
    %41 = vector.extract_strided_slice %34 {offsets = [1, 0], sizes = [8, 128], strides = [1, 1]} : vector<10x128xbf16> to vector<8x128xbf16>
    %c1_28 = arith.constant 1 : index
    %c0_29 = arith.constant 0 : index
    %c0_30 = arith.constant 0 : index
    %42 = vector.load %arg6[%c1_28, %c0_29, %c0_30] : memref<3x128x256xbf16, #tpu.memory_space<vmem>>, vector<1x128x256xbf16>
    %43 = vector.shape_cast %42 : vector<1x128x256xbf16> to vector<128x256xbf16>
    %cst_31 = arith.constant dense<0.000000e+00> : vector<8x256xf32>
    %44 = tpu.matmul %41, %43, %cst_31 {dimension_numbers = #tpu.dot_dimension_numbers<[1], [0], [0], [1], [0, 0, 1, 1], [], []>} : vector<8x128xbf16>, vector<128x256xbf16>, vector<8x256xf32> -> vector<8x256xf32>
    %45 = arith.addf %40, %44 : vector<8x256xf32>
    %46 = vector.extract_strided_slice %34 {offsets = [2, 0], sizes = [8, 128], strides = [1, 1]} : vector<10x128xbf16> to vector<8x128xbf16>
    %c2_32 = arith.constant 2 : index
    %c0_33 = arith.constant 0 : index
    %c0_34 = arith.constant 0 : index
    %47 = vector.load %arg6[%c2_32, %c0_33, %c0_34] : memref<3x128x256xbf16, #tpu.memory_space<vmem>>, vector<1x128x256xbf16>
    %48 = vector.shape_cast %47 : vector<1x128x256xbf16> to vector<128x256xbf16>
    %cst_35 = arith.constant dense<0.000000e+00> : vector<8x256xf32>
    %49 = tpu.matmul %46, %48, %cst_35 {dimension_numbers = #tpu.dot_dimension_numbers<[1], [0], [0], [1], [0, 0, 1, 1], [], []>} : vector<8x128xbf16>, vector<128x256xbf16>, vector<8x256xf32> -> vector<8x256xf32>
    %50 = arith.addf %45, %49 : vector<8x256xf32>
    %c0_36 = arith.constant 0 : index
    %c0_37 = arith.constant 0 : index
    %51 = vector.load %arg7[%c0_36, %c0_37] : memref<1x256xf32, #tpu.memory_space<vmem>>, vector<1x256xf32>
    %52 = vector.broadcast %51 : vector<1x256xf32> to vector<8x256xf32>
    %53 = arith.addf %50, %52 : vector<8x256xf32>
    %cst_38 = arith.constant 0.000000e+00 : f32
    %54 = vector.broadcast %cst_38 : f32 to vector<8x256xf32>
    %55 = arith.maximumf %53, %54 : vector<8x256xf32>
    %c0_39 = arith.constant 0 : index
    %c0_40 = arith.constant 0 : index
    %56 = vector.load %arg8[%c0_39, %c0_40] : memref<4x8xbf16, #tpu.memory_space<vmem>>, vector<4x8xbf16>
    %57 = arith.truncf %55 : vector<8x256xf32> to vector<8x256xbf16>
    %cst_41 = arith.constant dense<0.000000e+00> : vector<4x256xf32>
    %58 = tpu.matmul %56, %57, %cst_41 {dimension_numbers = #tpu.dot_dimension_numbers<[1], [0], [0], [1], [0, 0, 1, 1], [], []>} : vector<4x8xbf16>, vector<8x256xbf16>, vector<4x256xf32> -> vector<4x256xf32>
    %59 = arith.truncf %58 : vector<4x256xf32> to vector<4x256xbf16>
    %c0_42 = arith.constant 0 : index
    %c0_43 = arith.constant 0 : index
    %60 = vector.load %arg9[%c0_42, %c0_43] : memref<256x128xbf16, #tpu.memory_space<vmem>>, vector<256x128xbf16>
    %cst_44 = arith.constant dense<0.000000e+00> : vector<4x128xf32>
    %61 = tpu.matmul %59, %60, %cst_44 {dimension_numbers = #tpu.dot_dimension_numbers<[1], [0], [0], [1], [0, 0, 1, 1], [], []>} : vector<4x256xbf16>, vector<256x128xbf16>, vector<4x128xf32> -> vector<4x128xf32>
    %c0_45 = arith.constant 0 : index
    %c0_46 = arith.constant 0 : index
    %62 = vector.load %arg10[%c0_45, %c0_46] : memref<8x4xbf16, #tpu.memory_space<vmem>>, vector<8x4xbf16>
    %63 = arith.truncf %61 : vector<4x128xf32> to vector<4x128xbf16>
    %cst_47 = arith.constant dense<0.000000e+00> : vector<8x128xf32>
    %64 = tpu.matmul %62, %63, %cst_47 {dimension_numbers = #tpu.dot_dimension_numbers<[1], [0], [0], [1], [0, 0, 1, 1], [], []>} : vector<8x4xbf16>, vector<4x128xbf16>, vector<8x128xf32> -> vector<8x128xf32>
    %65 = arith.truncf %64 : vector<8x128xf32> to vector<8x128xbf16>
    %c0_48 = arith.constant 0 : index
    %c0_49 = arith.constant 0 : index
    %66 = vector.load %arg11[%c0_48, %c0_49] : memref<128x256xbf16, #tpu.memory_space<vmem>>, vector<128x256xbf16>
    %cst_50 = arith.constant dense<0.000000e+00> : vector<8x256xf32>
    %67 = tpu.matmul %65, %66, %cst_50 {dimension_numbers = #tpu.dot_dimension_numbers<[1], [0], [0], [1], [0, 0, 1, 1], [], []>} : vector<8x128xbf16>, vector<128x256xbf16>, vector<8x256xf32> -> vector<8x256xf32>
    %cst_51 = arith.constant 0.000000e+00 : bf16
    %68 = vector.broadcast %cst_51 : bf16 to vector<1x256xbf16>
    %69 = arith.truncf %67 : vector<8x256xf32> to vector<8x256xbf16>
    %70 = tpu.concatenate %68, %69, %68 in 0 : vector<1x256xbf16>, vector<8x256xbf16>, vector<1x256xbf16> -> vector<10x256xbf16>
    %cst_52 = arith.constant 0.000000e+00 : f32
    %71 = vector.broadcast %cst_52 : f32 to vector<8x128xf32>
    %72 = vector.extract_strided_slice %70 {offsets = [0, 0], sizes = [8, 256], strides = [1, 1]} : vector<10x256xbf16> to vector<8x256xbf16>
    %c0_53 = arith.constant 0 : index
    %c0_54 = arith.constant 0 : index
    %c0_55 = arith.constant 0 : index
    %73 = vector.load %arg12[%c0_53, %c0_54, %c0_55] : memref<3x256x128xbf16, #tpu.memory_space<vmem>>, vector<1x256x128xbf16>
    %74 = vector.shape_cast %73 : vector<1x256x128xbf16> to vector<256x128xbf16>
    %cst_56 = arith.constant dense<0.000000e+00> : vector<8x128xf32>
    %75 = tpu.matmul %72, %74, %cst_56 {dimension_numbers = #tpu.dot_dimension_numbers<[1], [0], [0], [1], [0, 0, 1, 1], [], []>} : vector<8x256xbf16>, vector<256x128xbf16>, vector<8x128xf32> -> vector<8x128xf32>
    %76 = arith.addf %71, %75 : vector<8x128xf32>
    %77 = vector.extract_strided_slice %70 {offsets = [1, 0], sizes = [8, 256], strides = [1, 1]} : vector<10x256xbf16> to vector<8x256xbf16>
    %c1_57 = arith.constant 1 : index
    %c0_58 = arith.constant 0 : index
    %c0_59 = arith.constant 0 : index
    %78 = vector.load %arg12[%c1_57, %c0_58, %c0_59] : memref<3x256x128xbf16, #tpu.memory_space<vmem>>, vector<1x256x128xbf16>
    %79 = vector.shape_cast %78 : vector<1x256x128xbf16> to vector<256x128xbf16>
    %cst_60 = arith.constant dense<0.000000e+00> : vector<8x128xf32>
    %80 = tpu.matmul %77, %79, %cst_60 {dimension_numbers = #tpu.dot_dimension_numbers<[1], [0], [0], [1], [0, 0, 1, 1], [], []>} : vector<8x256xbf16>, vector<256x128xbf16>, vector<8x128xf32> -> vector<8x128xf32>
    %81 = arith.addf %76, %80 : vector<8x128xf32>
    %82 = vector.extract_strided_slice %70 {offsets = [2, 0], sizes = [8, 256], strides = [1, 1]} : vector<10x256xbf16> to vector<8x256xbf16>
    %c2_61 = arith.constant 2 : index
    %c0_62 = arith.constant 0 : index
    %c0_63 = arith.constant 0 : index
    %83 = vector.load %arg12[%c2_61, %c0_62, %c0_63] : memref<3x256x128xbf16, #tpu.memory_space<vmem>>, vector<1x256x128xbf16>
    %84 = vector.shape_cast %83 : vector<1x256x128xbf16> to vector<256x128xbf16>
    %cst_64 = arith.constant dense<0.000000e+00> : vector<8x128xf32>
    %85 = tpu.matmul %82, %84, %cst_64 {dimension_numbers = #tpu.dot_dimension_numbers<[1], [0], [0], [1], [0, 0, 1, 1], [], []>} : vector<8x256xbf16>, vector<256x128xbf16>, vector<8x128xf32> -> vector<8x128xf32>
    %86 = arith.addf %81, %85 : vector<8x128xf32>
    %c0_65 = arith.constant 0 : index
    %c0_66 = arith.constant 0 : index
    %87 = vector.load %arg13[%c0_65, %c0_66] : memref<1x128xf32, #tpu.memory_space<vmem>>, vector<1x128xf32>
    %88 = vector.broadcast %87 : vector<1x128xf32> to vector<8x128xf32>
    %89 = arith.addf %86, %88 : vector<8x128xf32>
    %cst_67 = arith.constant 0.000000e+00 : f32
    %90 = vector.broadcast %cst_67 : f32 to vector<8x128xf32>
    %91 = arith.maximumf %89, %90 : vector<8x128xf32>
    %c0_68 = arith.constant 0 : index
    %c0_69 = arith.constant 0 : index
    %92 = vector.load %arg14[%c0_68, %c0_69] : memref<16x8xbf16, #tpu.memory_space<vmem>>, vector<16x8xbf16>
    %93 = arith.truncf %91 : vector<8x128xf32> to vector<8x128xbf16>
    %cst_70 = arith.constant dense<0.000000e+00> : vector<16x128xf32>
    %94 = tpu.matmul %92, %93, %cst_70 {dimension_numbers = #tpu.dot_dimension_numbers<[1], [0], [0], [1], [0, 0, 1, 1], [], []>} : vector<16x8xbf16>, vector<8x128xbf16>, vector<16x128xf32> -> vector<16x128xf32>
    %95 = arith.truncf %94 : vector<16x128xf32> to vector<16x128xbf16>
    %c0_71 = arith.constant 0 : index
    %c0_72 = arith.constant 0 : index
    %96 = vector.load %arg15[%c0_71, %c0_72] : memref<128x256xbf16, #tpu.memory_space<vmem>>, vector<128x256xbf16>
    %cst_73 = arith.constant dense<0.000000e+00> : vector<16x256xf32>
    %97 = tpu.matmul %95, %96, %cst_73 {dimension_numbers = #tpu.dot_dimension_numbers<[1], [0], [0], [1], [0, 0, 1, 1], [], []>} : vector<16x128xbf16>, vector<128x256xbf16>, vector<16x256xf32> -> vector<16x256xf32>
    %c0_74 = arith.constant 0 : index
    %c0_75 = arith.constant 0 : index
    %98 = vector.load %arg14[%c0_74, %c0_75] : memref<16x8xbf16, #tpu.memory_space<vmem>>, vector<16x8xbf16>
    %99 = arith.truncf %31 : vector<8x128xf32> to vector<8x128xbf16>
    %cst_76 = arith.constant dense<0.000000e+00> : vector<16x128xf32>
    %100 = tpu.matmul %98, %99, %cst_76 {dimension_numbers = #tpu.dot_dimension_numbers<[1], [0], [0], [1], [0, 0, 1, 1], [], []>} : vector<16x8xbf16>, vector<8x128xbf16>, vector<16x128xf32> -> vector<16x128xf32>
    %101 = arith.truncf %100 : vector<16x128xf32> to vector<16x128xbf16>
    %c0_77 = arith.constant 0 : index
    %c0_78 = arith.constant 0 : index
    %102 = vector.load %arg15[%c0_77, %c0_78] : memref<128x256xbf16, #tpu.memory_space<vmem>>, vector<128x256xbf16>
    %cst_79 = arith.constant dense<0.000000e+00> : vector<16x256xf32>
    %103 = tpu.matmul %101, %102, %cst_79 {dimension_numbers = #tpu.dot_dimension_numbers<[1], [0], [0], [1], [0, 0, 1, 1], [], []>} : vector<16x128xbf16>, vector<128x256xbf16>, vector<16x256xf32> -> vector<16x256xf32>
    %104 = tpu.concatenate %97, %103 in 1 : vector<16x256xf32>, vector<16x256xf32> -> vector<16x512xf32>
    %cst_80 = arith.constant 0.000000e+00 : bf16
    %105 = vector.broadcast %cst_80 : bf16 to vector<1x512xbf16>
    %106 = arith.truncf %104 : vector<16x512xf32> to vector<16x512xbf16>
    %107 = tpu.concatenate %105, %106, %105 in 0 : vector<1x512xbf16>, vector<16x512xbf16>, vector<1x512xbf16> -> vector<18x512xbf16>
    %cst_81 = arith.constant 0.000000e+00 : f32
    %108 = vector.broadcast %cst_81 : f32 to vector<16x128xf32>
    %109 = vector.extract_strided_slice %107 {offsets = [0, 0], sizes = [16, 512], strides = [1, 1]} : vector<18x512xbf16> to vector<16x512xbf16>
    %c0_82 = arith.constant 0 : index
    %c0_83 = arith.constant 0 : index
    %c0_84 = arith.constant 0 : index
    %110 = vector.load %arg16[%c0_82, %c0_83, %c0_84] : memref<3x512x128xbf16, #tpu.memory_space<vmem>>, vector<1x512x128xbf16>
    %111 = vector.shape_cast %110 : vector<1x512x128xbf16> to vector<512x128xbf16>
    %cst_85 = arith.constant dense<0.000000e+00> : vector<16x128xf32>
    %112 = tpu.matmul %109, %111, %cst_85 {dimension_numbers = #tpu.dot_dimension_numbers<[1], [0], [0], [1], [0, 0, 1, 1], [], []>} : vector<16x512xbf16>, vector<512x128xbf16>, vector<16x128xf32> -> vector<16x128xf32>
    %113 = arith.addf %108, %112 : vector<16x128xf32>
    %114 = vector.extract_strided_slice %107 {offsets = [1, 0], sizes = [16, 512], strides = [1, 1]} : vector<18x512xbf16> to vector<16x512xbf16>
    %c1_86 = arith.constant 1 : index
    %c0_87 = arith.constant 0 : index
    %c0_88 = arith.constant 0 : index
    %115 = vector.load %arg16[%c1_86, %c0_87, %c0_88] : memref<3x512x128xbf16, #tpu.memory_space<vmem>>, vector<1x512x128xbf16>
    %116 = vector.shape_cast %115 : vector<1x512x128xbf16> to vector<512x128xbf16>
    %cst_89 = arith.constant dense<0.000000e+00> : vector<16x128xf32>
    %117 = tpu.matmul %114, %116, %cst_89 {dimension_numbers = #tpu.dot_dimension_numbers<[1], [0], [0], [1], [0, 0, 1, 1], [], []>} : vector<16x512xbf16>, vector<512x128xbf16>, vector<16x128xf32> -> vector<16x128xf32>
    %118 = arith.addf %113, %117 : vector<16x128xf32>
    %119 = vector.extract_strided_slice %107 {offsets = [2, 0], sizes = [16, 512], strides = [1, 1]} : vector<18x512xbf16> to vector<16x512xbf16>
    %c2_90 = arith.constant 2 : index
    %c0_91 = arith.constant 0 : index
    %c0_92 = arith.constant 0 : index
    %120 = vector.load %arg16[%c2_90, %c0_91, %c0_92] : memref<3x512x128xbf16, #tpu.memory_space<vmem>>, vector<1x512x128xbf16>
    %121 = vector.shape_cast %120 : vector<1x512x128xbf16> to vector<512x128xbf16>
    %cst_93 = arith.constant dense<0.000000e+00> : vector<16x128xf32>
    %122 = tpu.matmul %119, %121, %cst_93 {dimension_numbers = #tpu.dot_dimension_numbers<[1], [0], [0], [1], [0, 0, 1, 1], [], []>} : vector<16x512xbf16>, vector<512x128xbf16>, vector<16x128xf32> -> vector<16x128xf32>
    %123 = arith.addf %118, %122 : vector<16x128xf32>
    %c0_94 = arith.constant 0 : index
    %c0_95 = arith.constant 0 : index
    %124 = vector.load %arg17[%c0_94, %c0_95] : memref<1x128xf32, #tpu.memory_space<vmem>>, vector<1x128xf32>
    %125 = vector.broadcast %124 : vector<1x128xf32> to vector<16x128xf32>
    %126 = arith.addf %123, %125 : vector<16x128xf32>
    %cst_96 = arith.constant 0.000000e+00 : f32
    %127 = vector.broadcast %cst_96 : f32 to vector<16x128xf32>
    %128 = arith.maximumf %126, %127 : vector<16x128xf32>
    %129 = tpu.concatenate %128, %1 in 1 : vector<16x128xf32>, vector<16x64xf32> -> vector<16x192xf32>
    %cst_97 = arith.constant 0.000000e+00 : bf16
    %130 = vector.broadcast %cst_97 : bf16 to vector<3x192xbf16>
    %131 = arith.truncf %129 : vector<16x192xf32> to vector<16x192xbf16>
    %132 = tpu.concatenate %130, %131, %130 in 0 : vector<3x192xbf16>, vector<16x192xbf16>, vector<3x192xbf16> -> vector<22x192xbf16>
    %cst_98 = arith.constant 0.000000e+00 : f32
    %133 = vector.broadcast %cst_98 : f32 to vector<16x128xf32>
    %134 = vector.extract_strided_slice %132 {offsets = [0, 0], sizes = [16, 192], strides = [1, 1]} : vector<22x192xbf16> to vector<16x192xbf16>
    %c0_99 = arith.constant 0 : index
    %c0_100 = arith.constant 0 : index
    %c0_101 = arith.constant 0 : index
    %135 = vector.load %arg18[%c0_99, %c0_100, %c0_101] : memref<7x192x128xbf16, #tpu.memory_space<vmem>>, vector<1x192x128xbf16>
    %136 = vector.shape_cast %135 : vector<1x192x128xbf16> to vector<192x128xbf16>
    %cst_102 = arith.constant dense<0.000000e+00> : vector<16x128xf32>
    %137 = tpu.matmul %134, %136, %cst_102 {dimension_numbers = #tpu.dot_dimension_numbers<[1], [0], [0], [1], [0, 0, 1, 1], [], []>} : vector<16x192xbf16>, vector<192x128xbf16>, vector<16x128xf32> -> vector<16x128xf32>
    %138 = arith.addf %133, %137 : vector<16x128xf32>
    %139 = vector.extract_strided_slice %132 {offsets = [1, 0], sizes = [16, 192], strides = [1, 1]} : vector<22x192xbf16> to vector<16x192xbf16>
    %c1_103 = arith.constant 1 : index
    %c0_104 = arith.constant 0 : index
    %c0_105 = arith.constant 0 : index
    %140 = vector.load %arg18[%c1_103, %c0_104, %c0_105] : memref<7x192x128xbf16, #tpu.memory_space<vmem>>, vector<1x192x128xbf16>
    %141 = vector.shape_cast %140 : vector<1x192x128xbf16> to vector<192x128xbf16>
    %cst_106 = arith.constant dense<0.000000e+00> : vector<16x128xf32>
    %142 = tpu.matmul %139, %141, %cst_106 {dimension_numbers = #tpu.dot_dimension_numbers<[1], [0], [0], [1], [0, 0, 1, 1], [], []>} : vector<16x192xbf16>, vector<192x128xbf16>, vector<16x128xf32> -> vector<16x128xf32>
    %143 = arith.addf %138, %142 : vector<16x128xf32>
    %144 = vector.extract_strided_slice %132 {offsets = [2, 0], sizes = [16, 192], strides = [1, 1]} : vector<22x192xbf16> to vector<16x192xbf16>
    %c2_107 = arith.constant 2 : index
    %c0_108 = arith.constant 0 : index
    %c0_109 = arith.constant 0 : index
    %145 = vector.load %arg18[%c2_107, %c0_108, %c0_109] : memref<7x192x128xbf16, #tpu.memory_space<vmem>>, vector<1x192x128xbf16>
    %146 = vector.shape_cast %145 : vector<1x192x128xbf16> to vector<192x128xbf16>
    %cst_110 = arith.constant dense<0.000000e+00> : vector<16x128xf32>
    %147 = tpu.matmul %144, %146, %cst_110 {dimension_numbers = #tpu.dot_dimension_numbers<[1], [0], [0], [1], [0, 0, 1, 1], [], []>} : vector<16x192xbf16>, vector<192x128xbf16>, vector<16x128xf32> -> vector<16x128xf32>
    %148 = arith.addf %143, %147 : vector<16x128xf32>
    %149 = vector.extract_strided_slice %132 {offsets = [3, 0], sizes = [16, 192], strides = [1, 1]} : vector<22x192xbf16> to vector<16x192xbf16>
    %c3 = arith.constant 3 : index
    %c0_111 = arith.constant 0 : index
    %c0_112 = arith.constant 0 : index
    %150 = vector.load %arg18[%c3, %c0_111, %c0_112] : memref<7x192x128xbf16, #tpu.memory_space<vmem>>, vector<1x192x128xbf16>
    %151 = vector.shape_cast %150 : vector<1x192x128xbf16> to vector<192x128xbf16>
    %cst_113 = arith.constant dense<0.000000e+00> : vector<16x128xf32>
    %152 = tpu.matmul %149, %151, %cst_113 {dimension_numbers = #tpu.dot_dimension_numbers<[1], [0], [0], [1], [0, 0, 1, 1], [], []>} : vector<16x192xbf16>, vector<192x128xbf16>, vector<16x128xf32> -> vector<16x128xf32>
    %153 = arith.addf %148, %152 : vector<16x128xf32>
    %154 = vector.extract_strided_slice %132 {offsets = [4, 0], sizes = [16, 192], strides = [1, 1]} : vector<22x192xbf16> to vector<16x192xbf16>
    %c4 = arith.constant 4 : index
    %c0_114 = arith.constant 0 : index
    %c0_115 = arith.constant 0 : index
    %155 = vector.load %arg18[%c4, %c0_114, %c0_115] : memref<7x192x128xbf16, #tpu.memory_space<vmem>>, vector<1x192x128xbf16>
    %156 = vector.shape_cast %155 : vector<1x192x128xbf16> to vector<192x128xbf16>
    %cst_116 = arith.constant dense<0.000000e+00> : vector<16x128xf32>
    %157 = tpu.matmul %154, %156, %cst_116 {dimension_numbers = #tpu.dot_dimension_numbers<[1], [0], [0], [1], [0, 0, 1, 1], [], []>} : vector<16x192xbf16>, vector<192x128xbf16>, vector<16x128xf32> -> vector<16x128xf32>
    %158 = arith.addf %153, %157 : vector<16x128xf32>
    %159 = vector.extract_strided_slice %132 {offsets = [5, 0], sizes = [16, 192], strides = [1, 1]} : vector<22x192xbf16> to vector<16x192xbf16>
    %c5 = arith.constant 5 : index
    %c0_117 = arith.constant 0 : index
    %c0_118 = arith.constant 0 : index
    %160 = vector.load %arg18[%c5, %c0_117, %c0_118] : memref<7x192x128xbf16, #tpu.memory_space<vmem>>, vector<1x192x128xbf16>
    %161 = vector.shape_cast %160 : vector<1x192x128xbf16> to vector<192x128xbf16>
    %cst_119 = arith.constant dense<0.000000e+00> : vector<16x128xf32>
    %162 = tpu.matmul %159, %161, %cst_119 {dimension_numbers = #tpu.dot_dimension_numbers<[1], [0], [0], [1], [0, 0, 1, 1], [], []>} : vector<16x192xbf16>, vector<192x128xbf16>, vector<16x128xf32> -> vector<16x128xf32>
    %163 = arith.addf %158, %162 : vector<16x128xf32>
    %164 = vector.extract_strided_slice %132 {offsets = [6, 0], sizes = [16, 192], strides = [1, 1]} : vector<22x192xbf16> to vector<16x192xbf16>
    %c6 = arith.constant 6 : index
    %c0_120 = arith.constant 0 : index
    %c0_121 = arith.constant 0 : index
    %165 = vector.load %arg18[%c6, %c0_120, %c0_121] : memref<7x192x128xbf16, #tpu.memory_space<vmem>>, vector<1x192x128xbf16>
    %166 = vector.shape_cast %165 : vector<1x192x128xbf16> to vector<192x128xbf16>
    %cst_122 = arith.constant dense<0.000000e+00> : vector<16x128xf32>
    %167 = tpu.matmul %164, %166, %cst_122 {dimension_numbers = #tpu.dot_dimension_numbers<[1], [0], [0], [1], [0, 0, 1, 1], [], []>} : vector<16x192xbf16>, vector<192x128xbf16>, vector<16x128xf32> -> vector<16x128xf32>
    %168 = arith.addf %163, %167 : vector<16x128xf32>
    %c0_123 = arith.constant 0 : index
    %c0_124 = arith.constant 0 : index
    %169 = vector.load %arg19[%c0_123, %c0_124] : memref<1x128xf32, #tpu.memory_space<vmem>>, vector<1x128xf32>
    %170 = vector.broadcast %169 : vector<1x128xf32> to vector<16x128xf32>
    %171 = arith.addf %168, %170 : vector<16x128xf32>
    %cst_125 = arith.constant 1.000000e+01 : f32
    %172 = vector.broadcast %cst_125 : f32 to vector<16x128xf32>
    %173 = arith.mulf %171, %172 : vector<16x128xf32>
    %cst_126 = arith.constant dense<0xFF800000> : vector<128xf32>
    %174 = vector.multi_reduction <maximumf>, %173, %cst_126 [0] : vector<16x128xf32> to vector<128xf32>
    %175 = vector.shape_cast %174 : vector<128xf32> to vector<1x128xf32>
    %c8_i32 = arith.constant 8 : i32
    %176 = tpu.dynamic_rotate %175 by %c8_i32 dim 1 : vector<1x128xf32>, i32 -> vector<1x128xf32>
    %177 = arith.maximumf %175, %176 : vector<1x128xf32>
    %c16_i32 = arith.constant 16 : i32
    %178 = tpu.dynamic_rotate %177 by %c16_i32 dim 1 : vector<1x128xf32>, i32 -> vector<1x128xf32>
    %179 = arith.maximumf %177, %178 : vector<1x128xf32>
    %c32_i32 = arith.constant 32 : i32
    %180 = tpu.dynamic_rotate %179 by %c32_i32 dim 1 : vector<1x128xf32>, i32 -> vector<1x128xf32>
    %181 = arith.maximumf %179, %180 : vector<1x128xf32>
    %c64_i32 = arith.constant 64 : i32
    %182 = tpu.dynamic_rotate %181 by %c64_i32 dim 1 : vector<1x128xf32>, i32 -> vector<1x128xf32>
    %183 = arith.maximumf %181, %182 : vector<1x128xf32>
    %184 = vector.broadcast %183 : vector<1x128xf32> to vector<16x128xf32>
    %185 = arith.subf %173, %184 : vector<16x128xf32>
    %186 = math.exp %185 : vector<16x128xf32>
    %cst_127 = arith.constant dense<0.000000e+00> : vector<128xf32>
    %187 = vector.multi_reduction <add>, %186, %cst_127 [0] : vector<16x128xf32> to vector<128xf32>
    %188 = vector.shape_cast %187 : vector<128xf32> to vector<1x128xf32>
    %c8_i32_128 = arith.constant 8 : i32
    %189 = tpu.dynamic_rotate %188 by %c8_i32_128 dim 1 : vector<1x128xf32>, i32 -> vector<1x128xf32>
    %190 = arith.addf %188, %189 : vector<1x128xf32>
    %c16_i32_129 = arith.constant 16 : i32
    %191 = tpu.dynamic_rotate %190 by %c16_i32_129 dim 1 : vector<1x128xf32>, i32 -> vector<1x128xf32>
    %192 = arith.addf %190, %191 : vector<1x128xf32>
    %c32_i32_130 = arith.constant 32 : i32
    %193 = tpu.dynamic_rotate %192 by %c32_i32_130 dim 1 : vector<1x128xf32>, i32 -> vector<1x128xf32>
    %194 = arith.addf %192, %193 : vector<1x128xf32>
    %c64_i32_131 = arith.constant 64 : i32
    %195 = tpu.dynamic_rotate %194 by %c64_i32_131 dim 1 : vector<1x128xf32>, i32 -> vector<1x128xf32>
    %196 = arith.addf %194, %195 : vector<1x128xf32>
    %197 = tpu.reciprocal %196 : vector<1x128xf32> -> vector<1x128xf32>
    %198 = vector.broadcast %197 : vector<1x128xf32> to vector<16x128xf32>
    %199 = arith.mulf %186, %198 : vector<16x128xf32>
    %c0_132 = arith.constant 0 : index
    %c0_133 = arith.constant 0 : index
    %200 = vector.load %arg20[%c0_132, %c0_133] : memref<16x128xf32, #tpu.memory_space<vmem>>, vector<16x128xf32>
    %c0_134 = arith.constant 0 : index
    %c0_135 = arith.constant 0 : index
    %201 = vector.load %arg21[%c0_134, %c0_135] : memref<16x128xf32, #tpu.memory_space<vmem>>, vector<16x128xf32>
    %202 = arith.mulf %199, %200 : vector<16x128xf32>
    %cst_136 = arith.constant dense<0.000000e+00> : vector<128xf32>
    %203 = vector.multi_reduction <add>, %202, %cst_136 [0] : vector<16x128xf32> to vector<128xf32>
    %204 = vector.shape_cast %203 : vector<128xf32> to vector<1x128xf32>
    %c8_i32_137 = arith.constant 8 : i32
    %205 = tpu.dynamic_rotate %204 by %c8_i32_137 dim 1 : vector<1x128xf32>, i32 -> vector<1x128xf32>
    %206 = arith.addf %204, %205 : vector<1x128xf32>
    %c16_i32_138 = arith.constant 16 : i32
    %207 = tpu.dynamic_rotate %206 by %c16_i32_138 dim 1 : vector<1x128xf32>, i32 -> vector<1x128xf32>
    %208 = arith.addf %206, %207 : vector<1x128xf32>
    %c32_i32_139 = arith.constant 32 : i32
    %209 = tpu.dynamic_rotate %208 by %c32_i32_139 dim 1 : vector<1x128xf32>, i32 -> vector<1x128xf32>
    %210 = arith.addf %208, %209 : vector<1x128xf32>
    %c64_i32_140 = arith.constant 64 : i32
    %211 = tpu.dynamic_rotate %210 by %c64_i32_140 dim 1 : vector<1x128xf32>, i32 -> vector<1x128xf32>
    %212 = arith.addf %210, %211 : vector<1x128xf32>
    %213 = arith.mulf %199, %201 : vector<16x128xf32>
    %cst_141 = arith.constant dense<0.000000e+00> : vector<128xf32>
    %214 = vector.multi_reduction <add>, %213, %cst_141 [0] : vector<16x128xf32> to vector<128xf32>
    %215 = vector.shape_cast %214 : vector<128xf32> to vector<1x128xf32>
    %c8_i32_142 = arith.constant 8 : i32
    %216 = tpu.dynamic_rotate %215 by %c8_i32_142 dim 1 : vector<1x128xf32>, i32 -> vector<1x128xf32>
    %217 = arith.addf %215, %216 : vector<1x128xf32>
    %c16_i32_143 = arith.constant 16 : i32
    %218 = tpu.dynamic_rotate %217 by %c16_i32_143 dim 1 : vector<1x128xf32>, i32 -> vector<1x128xf32>
    %219 = arith.addf %217, %218 : vector<1x128xf32>
    %c32_i32_144 = arith.constant 32 : i32
    %220 = tpu.dynamic_rotate %219 by %c32_i32_144 dim 1 : vector<1x128xf32>, i32 -> vector<1x128xf32>
    %221 = arith.addf %219, %220 : vector<1x128xf32>
    %c64_i32_145 = arith.constant 64 : i32
    %222 = tpu.dynamic_rotate %221 by %c64_i32_145 dim 1 : vector<1x128xf32>, i32 -> vector<1x128xf32>
    %223 = arith.addf %221, %222 : vector<1x128xf32>
    %224 = vector.broadcast %212 : vector<1x128xf32> to vector<16x128xf32>
    %225 = arith.subf %200, %224 : vector<16x128xf32>
    %226 = vector.broadcast %223 : vector<1x128xf32> to vector<16x128xf32>
    %227 = arith.subf %201, %226 : vector<16x128xf32>
    %228 = arith.mulf %199, %225 : vector<16x128xf32>
    %229 = arith.mulf %199, %227 : vector<16x128xf32>
    %230 = arith.mulf %228, %225 : vector<16x128xf32>
    %cst_146 = arith.constant dense<0.000000e+00> : vector<128xf32>
    %231 = vector.multi_reduction <add>, %230, %cst_146 [0] : vector<16x128xf32> to vector<128xf32>
    %232 = vector.shape_cast %231 : vector<128xf32> to vector<1x128xf32>
    %c8_i32_147 = arith.constant 8 : i32
    %233 = tpu.dynamic_rotate %232 by %c8_i32_147 dim 1 : vector<1x128xf32>, i32 -> vector<1x128xf32>
    %234 = arith.addf %232, %233 : vector<1x128xf32>
    %c16_i32_148 = arith.constant 16 : i32
    %235 = tpu.dynamic_rotate %234 by %c16_i32_148 dim 1 : vector<1x128xf32>, i32 -> vector<1x128xf32>
    %236 = arith.addf %234, %235 : vector<1x128xf32>
    %c32_i32_149 = arith.constant 32 : i32
    %237 = tpu.dynamic_rotate %236 by %c32_i32_149 dim 1 : vector<1x128xf32>, i32 -> vector<1x128xf32>
    %238 = arith.addf %236, %237 : vector<1x128xf32>
    %c64_i32_150 = arith.constant 64 : i32
    %239 = tpu.dynamic_rotate %238 by %c64_i32_150 dim 1 : vector<1x128xf32>, i32 -> vector<1x128xf32>
    %240 = arith.addf %238, %239 : vector<1x128xf32>
    %241 = arith.mulf %228, %227 : vector<16x128xf32>
    %cst_151 = arith.constant dense<0.000000e+00> : vector<128xf32>
    %242 = vector.multi_reduction <add>, %241, %cst_151 [0] : vector<16x128xf32> to vector<128xf32>
    %243 = vector.shape_cast %242 : vector<128xf32> to vector<1x128xf32>
    %c8_i32_152 = arith.constant 8 : i32
    %244 = tpu.dynamic_rotate %243 by %c8_i32_152 dim 1 : vector<1x128xf32>, i32 -> vector<1x128xf32>
    %245 = arith.addf %243, %244 : vector<1x128xf32>
    %c16_i32_153 = arith.constant 16 : i32
    %246 = tpu.dynamic_rotate %245 by %c16_i32_153 dim 1 : vector<1x128xf32>, i32 -> vector<1x128xf32>
    %247 = arith.addf %245, %246 : vector<1x128xf32>
    %c32_i32_154 = arith.constant 32 : i32
    %248 = tpu.dynamic_rotate %247 by %c32_i32_154 dim 1 : vector<1x128xf32>, i32 -> vector<1x128xf32>
    %249 = arith.addf %247, %248 : vector<1x128xf32>
    %c64_i32_155 = arith.constant 64 : i32
    %250 = tpu.dynamic_rotate %249 by %c64_i32_155 dim 1 : vector<1x128xf32>, i32 -> vector<1x128xf32>
    %251 = arith.addf %249, %250 : vector<1x128xf32>
    %252 = arith.mulf %229, %227 : vector<16x128xf32>
    %cst_156 = arith.constant dense<0.000000e+00> : vector<128xf32>
    %253 = vector.multi_reduction <add>, %252, %cst_156 [0] : vector<16x128xf32> to vector<128xf32>
    %254 = vector.shape_cast %253 : vector<128xf32> to vector<1x128xf32>
    %c8_i32_157 = arith.constant 8 : i32
    %255 = tpu.dynamic_rotate %254 by %c8_i32_157 dim 1 : vector<1x128xf32>, i32 -> vector<1x128xf32>
    %256 = arith.addf %254, %255 : vector<1x128xf32>
    %c16_i32_158 = arith.constant 16 : i32
    %257 = tpu.dynamic_rotate %256 by %c16_i32_158 dim 1 : vector<1x128xf32>, i32 -> vector<1x128xf32>
    %258 = arith.addf %256, %257 : vector<1x128xf32>
    %c32_i32_159 = arith.constant 32 : i32
    %259 = tpu.dynamic_rotate %258 by %c32_i32_159 dim 1 : vector<1x128xf32>, i32 -> vector<1x128xf32>
    %260 = arith.addf %258, %259 : vector<1x128xf32>
    %c64_i32_160 = arith.constant 64 : i32
    %261 = tpu.dynamic_rotate %260 by %c64_i32_160 dim 1 : vector<1x128xf32>, i32 -> vector<1x128xf32>
    %262 = arith.addf %260, %261 : vector<1x128xf32>
    %263 = arith.mulf %240, %262 : vector<1x128xf32>
    %264 = arith.mulf %251, %251 : vector<1x128xf32>
    %265 = arith.subf %263, %264 : vector<1x128xf32>
    %cst_161 = arith.constant 9.99999993E-9 : f32
    %266 = vector.broadcast %cst_161 : f32 to vector<1x128xf32>
    %267 = arith.addf %265, %266 : vector<1x128xf32>
    %268 = tpu.reciprocal %267 : vector<1x128xf32> -> vector<1x128xf32>
    %269 = arith.mulf %262, %268 : vector<1x128xf32>
    %cst_162 = arith.constant 0.000000e+00 : f32
    %270 = vector.broadcast %cst_162 : f32 to vector<1x128xf32>
    %271 = arith.subf %270, %251 : vector<1x128xf32>
    %272 = arith.mulf %271, %268 : vector<1x128xf32>
    %273 = arith.mulf %240, %268 : vector<1x128xf32>
    %274 = vector.broadcast %269 : vector<1x128xf32> to vector<16x128xf32>
    %275 = arith.mulf %274, %225 : vector<16x128xf32>
    %276 = arith.mulf %275, %225 : vector<16x128xf32>
    %cst_163 = arith.constant 2.000000e+00 : f32
    %277 = vector.broadcast %cst_163 : f32 to vector<1x128xf32>
    %278 = arith.mulf %277, %272 : vector<1x128xf32>
    %279 = vector.broadcast %278 : vector<1x128xf32> to vector<16x128xf32>
    %280 = arith.mulf %279, %225 : vector<16x128xf32>
    %281 = arith.mulf %280, %227 : vector<16x128xf32>
    %282 = arith.addf %276, %281 : vector<16x128xf32>
    %283 = vector.broadcast %273 : vector<1x128xf32> to vector<16x128xf32>
    %284 = arith.mulf %283, %227 : vector<16x128xf32>
    %285 = arith.mulf %284, %227 : vector<16x128xf32>
    %286 = arith.addf %282, %285 : vector<16x128xf32>
    %cst_164 = arith.constant -5.000000e-01 : f32
    %287 = vector.broadcast %cst_164 : f32 to vector<16x128xf32>
    %288 = arith.mulf %287, %286 : vector<16x128xf32>
    %289 = math.exp %288 : vector<16x128xf32>
    %cst_165 = arith.constant 0.000000e+00 : f32
    %290 = vector.broadcast %cst_165 : f32 to vector<3x128xf32>
    %291 = tpu.concatenate %289, %212, %223, %240, %251, %262, %290 in 0 : vector<16x128xf32>, vector<1x128xf32>, vector<1x128xf32>, vector<1x128xf32>, vector<1x128xf32>, vector<1x128xf32>, vector<3x128xf32> -> vector<24x128xf32>
    %c0_166 = arith.constant 0 : index
    %c0_167 = arith.constant 0 : index
    %c0_168 = arith.constant 0 : index
    %292 = vector.load %arg22[%c0_166, %c0_167, %c0_168] : memref<1x24x128xf32, #tpu.memory_space<vmem>>, vector<1x24x128xf32>
    %293 = vector.shape_cast %292 : vector<1x24x128xf32> to vector<24x128xf32>
    %294 = vector.shape_cast %291 : vector<24x128xf32> to vector<1x24x128xf32>
    tpu.vector_store %arg22[%c0_166, %c0_167, %c0_168], %294 {strides = array<i32>} : memref<1x24x128xf32, #tpu.memory_space<vmem>>, vector<1x24x128xf32>,
    return
  }
  func.func @transform_0(%arg0: i32) -> (i32, i32, i32) {
    %c0_i32 = arith.constant 0 : i32
    %c0_i32_0 = arith.constant 0 : i32
    %c0_i32_1 = arith.constant 0 : i32
    return %arg0, %c0_i32, %c0_i32_0 : i32, i32, i32
  }
  func.func @transform_1(%arg0: i32) -> (i32, i32, i32) {
    %c0_i32 = arith.constant 0 : i32
    %c0_i32_0 = arith.constant 0 : i32
    %c0_i32_1 = arith.constant 0 : i32
    %c0_i32_2 = arith.constant 0 : i32
    return %c0_i32, %c0_i32_0, %c0_i32_1 : i32, i32, i32
  }
  func.func @transform_2(%arg0: i32) -> (i32, i32) {
    %c0_i32 = arith.constant 0 : i32
    %c0_i32_0 = arith.constant 0 : i32
    %c0_i32_1 = arith.constant 0 : i32
    return %c0_i32, %c0_i32_0 : i32, i32
  }
  func.func @transform_3(%arg0: i32) -> (i32, i32) {
    %c0_i32 = arith.constant 0 : i32
    %c0_i32_0 = arith.constant 0 : i32
    %c0_i32_1 = arith.constant 0 : i32
    return %c0_i32, %c0_i32_0 : i32, i32
  }
  func.func @transform_4(%arg0: i32) -> (i32, i32) {
    %c0_i32 = arith.constant 0 : i32
    %c0_i32_0 = arith.constant 0 : i32
    %c0_i32_1 = arith.constant 0 : i32
    return %c0_i32, %c0_i32_0 : i32, i32
  }
  func.func @transform_5(%arg0: i32) -> (i32, i32, i32) {
    %c0_i32 = arith.constant 0 : i32
    %c0_i32_0 = arith.constant 0 : i32
    %c0_i32_1 = arith.constant 0 : i32
    %c0_i32_2 = arith.constant 0 : i32
    return %c0_i32, %c0_i32_0, %c0_i32_1 : i32, i32, i32
  }
  func.func @transform_6(%arg0: i32) -> (i32, i32) {
    %c0_i32 = arith.constant 0 : i32
    %c0_i32_0 = arith.constant 0 : i32
    %c0_i32_1 = arith.constant 0 : i32
    return %c0_i32, %c0_i32_0 : i32, i32
  }
  func.func @transform_7(%arg0: i32) -> (i32, i32) {
    %c0_i32 = arith.constant 0 : i32
    %c0_i32_0 = arith.constant 0 : i32
    %c0_i32_1 = arith.constant 0 : i32
    return %c0_i32, %c0_i32_0 : i32, i32
  }
  func.func @transform_8(%arg0: i32) -> (i32, i32) {
    %c0_i32 = arith.constant 0 : i32
    %c0_i32_0 = arith.constant 0 : i32
    %c0_i32_1 = arith.constant 0 : i32
    return %c0_i32, %c0_i32_0 : i32, i32
  }
  func.func @transform_9(%arg0: i32) -> (i32, i32) {
    %c0_i32 = arith.constant 0 : i32
    %c0_i32_0 = arith.constant 0 : i32
    %c0_i32_1 = arith.constant 0 : i32
    return %c0_i32, %c0_i32_0 : i32, i32
  }
  func.func @transform_10(%arg0: i32) -> (i32, i32) {
    %c0_i32 = arith.constant 0 : i32
    %c0_i32_0 = arith.constant 0 : i32
    %c0_i32_1 = arith.constant 0 : i32
    return %c0_i32, %c0_i32_0 : i32, i32
  }
  func.func @transform_11(%arg0: i32) -> (i32, i32, i32) {
    %c0_i32 = arith.constant 0 : i32
    %c0_i32_0 = arith.constant 0 : i32
    %c0_i32_1 = arith.constant 0 : i32
    %c0_i32_2 = arith.constant 0 : i32
    return %c0_i32, %c0_i32_0, %c0_i32_1 : i32, i32, i32
  }
  func.func @transform_12(%arg0: i32) -> (i32, i32) {
    %c0_i32 = arith.constant 0 : i32
    %c0_i32_0 = arith.constant 0 : i32
    %c0_i32_1 = arith.constant 0 : i32
    return %c0_i32, %c0_i32_0 : i32, i32
  }
  func.func @transform_13(%arg0: i32) -> (i32, i32) {
    %c0_i32 = arith.constant 0 : i32
    %c0_i32_0 = arith.constant 0 : i32
    %c0_i32_1 = arith.constant 0 : i32
    return %c0_i32, %c0_i32_0 : i32, i32
  }
  func.func @transform_14(%arg0: i32) -> (i32, i32) {
    %c0_i32 = arith.constant 0 : i32
    %c0_i32_0 = arith.constant 0 : i32
    %c0_i32_1 = arith.constant 0 : i32
    return %c0_i32, %c0_i32_0 : i32, i32
  }
  func.func @transform_15(%arg0: i32) -> (i32, i32, i32) {
    %c0_i32 = arith.constant 0 : i32
    %c0_i32_0 = arith.constant 0 : i32
    %c0_i32_1 = arith.constant 0 : i32
    %c0_i32_2 = arith.constant 0 : i32
    return %c0_i32, %c0_i32_0, %c0_i32_1 : i32, i32, i32
  }
  func.func @transform_16(%arg0: i32) -> (i32, i32) {
    %c0_i32 = arith.constant 0 : i32
    %c0_i32_0 = arith.constant 0 : i32
    %c0_i32_1 = arith.constant 0 : i32
    return %c0_i32, %c0_i32_0 : i32, i32
  }
  func.func @transform_17(%arg0: i32) -> (i32, i32, i32) {
    %c0_i32 = arith.constant 0 : i32
    %c0_i32_0 = arith.constant 0 : i32
    %c0_i32_1 = arith.constant 0 : i32
    %c0_i32_2 = arith.constant 0 : i32
    return %c0_i32, %c0_i32_0, %c0_i32_1 : i32, i32, i32
  }
  func.func @transform_18(%arg0: i32) -> (i32, i32) {
    %c0_i32 = arith.constant 0 : i32
    %c0_i32_0 = arith.constant 0 : i32
    %c0_i32_1 = arith.constant 0 : i32
    return %c0_i32, %c0_i32_0 : i32, i32
  }
  func.func @transform_19(%arg0: i32) -> (i32, i32) {
    %c0_i32 = arith.constant 0 : i32
    %c0_i32_0 = arith.constant 0 : i32
    %c0_i32_1 = arith.constant 0 : i32
    return %c0_i32, %c0_i32_0 : i32, i32
  }
  func.func @transform_20(%arg0: i32) -> (i32, i32) {
    %c0_i32 = arith.constant 0 : i32
    %c0_i32_0 = arith.constant 0 : i32
    %c0_i32_1 = arith.constant 0 : i32
    return %c0_i32, %c0_i32_0 : i32, i32
  }
  func.func @transform_21(%arg0: i32) -> (i32, i32, i32) {
    %c0_i32 = arith.constant 0 : i32
    %c0_i32_0 = arith.constant 0 : i32
    %c0_i32_1 = arith.constant 0 : i32
    return %arg0, %c0_i32, %c0_i32_0 : i32, i32, i32
  }
}

</mosaic_0001>

<bundles_post_ra>
// kernel: kp_detector_forward.1
= control target key start
LH: loop header
LB: loop body
LE: loop exit
PB: predicated region body
PF: predicated region fallthrough
CT: control target
= control target key end

     0   :  { %s8397_s0 = inlined_call_operand.vmem [shape: f32[2,16,64], index: 0, kind: input, shape index: {}]   ;;  %s8398_s1 = inlined_call_operand.hbm [shape: bf16[3,64,256], index: 1, kind: input, shape index: {}]   ;;  %s8399_s2 = inlined_call_operand.vmem [shape: f32[1,256], index: 2, kind: input, shape index: {}]   ;;  %s8400_s3 = inlined_call_operand.vmem [shape: bf16[8,16], index: 3, kind: input, shape index: {}]   ;;  %s8401_s4 = inlined_call_operand.hbm [shape: bf16[256,128], index: 4, kind: input, shape index: {}]   ;;  %s8402_s5 = inlined_call_operand.vmem [shape: bf16[3,128,256], index: 5, kind: input, shape index: {}]   ;;  %s8403_s6 = inlined_call_operand.vmem [shape: f32[1,256], index: 6, kind: input, shape index: {}]   ;;  %s8404_s7 = inlined_call_operand.vmem [shape: bf16[4,8], index: 7, kind: input, shape index: {}]   ;;  %s8405_s8 = inlined_call_operand.hbm [shape: bf16[256,128], index: 8, kind: input, shape index: {}]   ;;  %s8406_s9 = inlined_call_operand.vmem [shape: bf16[8,4], index: 9, kind: input, shape index: {}]   ;;  %s8407_s10 = inlined_call_operand.hbm [shape: bf16[128,256], index: 10, kind: input, shape index: {}]   ;;  %s8408_s11 = inlined_call_operand.hbm [shape: bf16[3,256,128], index: 11, kind: input, shape index: {}]   ;;  %s8409_s12 = inlined_call_operand.vmem [shape: f32[1,128], index: 12, kind: input, shape index: {}]   ;;  %s8410_s13 = inlined_call_operand.vmem [shape: bf16[16,8], index: 13, kind: input, shape index: {}]   ;;  %s8411_s14 = inlined_call_operand.hbm [shape: bf16[128,256], index: 14, kind: input, shape index: {}]   ;;  %s8412_s15 = inlined_call_operand.hbm [shape: bf16[3,512,128], index: 15, kind: input, shape index: {}]   ;;  %s8413_s16 = inlined_call_operand.vmem [shape: f32[1,128], index: 16, kind: input, shape index: {}]   ;;  %s8414_s17 = inlined_call_operand.hbm [shape: bf16[7,192,128], index: 17, kind: input, shape index: {}]   ;;  %s8415_s18 = inlined_call_operand.vmem [shape: f32[1,128], index: 18, kind: input, shape index: {}]   ;;  %s8416_s19 = inlined_call_operand.vmem [shape: f32[16,128], index: 19, kind: input, shape index: {}]   ;;  %s8417_s20 = inlined_call_operand.vmem [shape: f32[16,128], index: 20, kind: input, shape index: {}]   ;;  %s8418_s21 = inlined_call_operand.vmem [shape: f32[2,24,128], index: 21, kind: output, shape index: {}]  }
   0x1   :  { %8425 = sst [smem:[#allocation21_spill]] %s8397_s0 }
   0x2   :  { %8426 = sst [smem:[#allocation22_spill]] %s8398_s1 }
   0x3   :  { %8427 = sst [smem:[#allocation23_spill]] %s8399_s2 }
   0x4   :  { %8428 = sst [smem:[#allocation24_spill]] %s8400_s3 }
   0x5   :  { %8429 = sst [smem:[#allocation25_spill]] %s8401_s4 }
   0x6   :  { %8430 = sst [smem:[#allocation26_spill]] %s8402_s5 }
   0x7   :  { %8431 = sst [smem:[#allocation27_spill]] %s8407_s10 }
   0x8   :  { %8432 = sst [smem:[#allocation28_spill]] %s8415_s18 }
   0x9   :  { %8433 = sst [smem:[#allocation29_spill]] %s8416_s19 }
   0xa   :  { %8434 = sst [smem:[#allocation30_spill]] %s8417_s20 }
   0xb   :  { %8435 = sst [smem:[#allocation31_spill]] %s8418_s21 }
   0xc   :  { %26 = vsyncpa [#allocation3], 0 }
   0xd   :  { %27 = vsyncpa [#allocation5], 0 }
   0xe   :  { %28 = vsyncpa [#allocation8], 0 }
   0xf   :  { %29 = vsyncpa [#allocation11], 0 }
  0x10   :  { %30 = vsyncpa [#allocation14], 0  ;;  %s7668_s2 = smov 0  }
  0x11 LB: > { %8436 = sst [smem:[#allocation20_spill]] %s7540_s2  ;;  %s7677_s28 = sadd.s32 4294967295, %s7540_s2   ;;  %s7540_s2 = sphi %s7668_s2, %s36_s2  }
  0x12   : > { %s8437_s27 = sld [smem:[#allocation25_spill]]  ;;  %p5257_p0 = scmp.ge.s32.totalorder %s7540_s2, 1 }
  0x13   : > { %p513_p1 = scmp.lt.s32.totalorder %s7540_s2, 3  ;;  %p7217_p2 = scmp.eq.s32.totalorder %s7677_s28, 0 }
  0x14   : > { %s7542_s0 = smov [#allocation4]   ;;  %s8440_s10 = sld [smem:[#allocation27_spill]] }
  0x15   : > { %p7682_p3 = pnand %p5257_p0, %p513_p1  ;;  %s546_s4 = sshll.u32 %s7542_s0, 4  ;;  %s547_s4 = int_to_ptr.vmem [resolvable:$true] %s546_s4 }
  0x16   : > { %s7543_s1 = smov [#allocation7]   ;;  %s8423_s25 = smov 64  }
  0x17   : > { %p7192_p4 = pneg %p7682_p3  ;;  %s586_s24 = sshll.u32 %s7543_s1, 4  ;;  %s587_s24 = int_to_ptr.vmem [resolvable:$true] %s586_s24 }
  0x18   : > { %s544_s3 = sshll.u32 %s8437_s27, 4  ;;  %s7545_s26 = smov 4   ;;  %s545_s3 = int_to_ptr.hbm [resolvable:$true] %s544_s3 }
  0x19   : > { %p7690_p5 = pnand %p7217_p2, %p7192_p4  ;;  %s618_s2 = sshll.u32 %s8411_s14, 4  ;;  %s619_s2 = int_to_ptr.hbm [resolvable:$true] %s618_s2 }
  0x1a   : > { %s584_s23 = sshll.u32 %s8440_s10, 4  ;;  %s7546_s5 = smov 128   ;;  %s585_s23 = int_to_ptr.hbm [resolvable:$true] %s584_s23 }
  0x1b   : > { %7198 = dma.hbm_to_vmem [thread:$0]  (!%p7690_p5), %s545_s3, 2048, %s547_s4, [#allocation5], %s8423_s25, %s8423_s25, %s7545_s26  }
  0x1c   : > { %s7547_s22 = smov 8   ;;  %s7548_s10 = smov [#allocation10]  }
  0x1d   : > { %7204 = dma.hbm_to_vmem [thread:$0]  (!%p7690_p5), %s585_s23, 2048, %s587_s24, [#allocation8], %s7546_s5, %s7546_s5, %s7547_s22  }
  0x1e   : > { %s620_s1 = sshll.u32 %s7548_s10, 4  ;;  %s8441_s20 = sld [smem:[#allocation22_spill]]  ;;  %s621_s1 = int_to_ptr.vmem [resolvable:$true] %s620_s1 }
  0x1f   : > { %7210 = dma.hbm_to_vmem [thread:$0]  (!%p7690_p5), %s619_s2, 2048, %s621_s1, [#allocation11], %s7546_s5, %s7546_s5, %s7547_s22  }
  0x20   : > { %s567_s27 = sshll.u32 %s8405_s8, 4  ;;  %s7549_s0 = smov [#allocation2]   ;;  %s568_s27 = int_to_ptr.hbm [resolvable:$true] %s567_s27 }
  0x21   : > { %s526_s25 = sshll.u32 %s7549_s0, 4  ;;  %s7550_s10 = smov [#allocation6]   ;;  %s527_s25 = int_to_ptr.vmem [resolvable:$true] %s526_s25 }
  0x22   : > { %s569_s19 = sshll.u32 %s7550_s10, 4  ;;  %s598_s23 = sshll.u32 %s8408_s11, 4  ;;  %s570_s19 = int_to_ptr.vmem [resolvable:$true] %s569_s19  ;;  %s599_s23 = int_to_ptr.hbm [resolvable:$true] %s598_s23 }
  0x23   : > { %s8442_s2 = smov 64   ;;  %s632_s3 = sshll.u32 %s8412_s15, 4  ;;  %s633_s3 = int_to_ptr.hbm [resolvable:$true] %s632_s3 }
  0x24   : > { %s524_s18 = sshll.u32 %s8441_s20, 4  ;;  %s7553_s10 = smov [#allocation13]   ;;  %s525_s18 = int_to_ptr.hbm [resolvable:$true] %s524_s18 }
  0x25   : > { %7195 = dma.hbm_to_vmem [thread:$0]  (!%p7690_p5), %s525_s18, 3072, %s527_s25, [#allocation3], %s7546_s5, %s7546_s5, %s7547_s22  }
  0x26   : > { %7201 = dma.hbm_to_vmem [thread:$0]  (!%p7690_p5), %s568_s27, 2048, %s570_s19, [#allocation5], %s8442_s2, %s8442_s2, %s7545_s26  }
  0x27   : > { %s7551_s18 = smov [#allocation9]   ;;  %s7552_s5 = smov [#allocation12]  }
  0x28   : > { %s600_s25 = sshll.u32 %s7551_s18, 4  ;;  %s634_s22 = sshll.u32 %s7552_s5, 4  ;;  %s601_s25 = int_to_ptr.vmem [resolvable:$true] %s600_s25  ;;  %s635_s22 = int_to_ptr.vmem [resolvable:$true] %s634_s22 }
  0x29   : > { %7207 = dma.hbm_to_vmem [thread:$0]  (!%p7690_p5), %s599_s23, 6144, %s601_s25, [#allocation8], %s8442_s2, %s8442_s2, %s7545_s26  }
  0x2a   : > { %s649_s27 = sshll.u32 %s8414_s17, 4  ;;  %s651_s19 = sshll.u32 %s7553_s10, 4  ;;  %s650_s27 = int_to_ptr.hbm [resolvable:$true] %s649_s27  ;;  %s652_s19 = int_to_ptr.vmem [resolvable:$true] %s651_s19 }
  0x2b   : > { %7213 = dma.hbm_to_vmem [thread:$0]  (!%p7690_p5), %s633_s3, 12288, %s635_s22, [#allocation11], %s8442_s2, %s8442_s2, %s7545_s26  }
  0x2c   : > { %7216 = dma.hbm_to_vmem [thread:$0]  (!%p7690_p5), %s650_s27, 10752, %s652_s19, [#allocation14], %s8442_s2, %s8442_s2, %s7545_s26  }
  0x2d   : > { %684 = sbr.rel (%p7682_p3) target bundleno = 4032 (0xfc0), region = 104 }
  0x32   : > { %7519 = dma.done.wait (%p7217_p2), [#allocation3], 3072  }
  0x33   : > { %7521 = vsyncadd (%p7217_p2), [#allocation3], 4294964224 }
  0x34   : > { %7523 = dma.done.wait (%p7217_p2), [#allocation5], 4096  }
  0x35   : > { %7525 = vsyncadd (%p7217_p2), [#allocation5], 4294963200 }
  0x36   : > { %7527 = dma.done.wait (%p7217_p2), [#allocation8], 8192  }
  0x37   : > { %7529 = vsyncadd (%p7217_p2), [#allocation8], 4294959104 }
  0x38   : > { %7531 = dma.done.wait (%p7217_p2), [#allocation11], 14336  }
  0x39   : > { %7533 = vsyncadd (%p7217_p2), [#allocation11], 4294952960 }
  0x3a   : > { %7535 = dma.done.wait (%p7217_p2), [#allocation14], 10752  }
  0x3b   : > { %7537 = vsyncadd (%p7217_p2), [#allocation14], 4294956544  ;;  %p780_p6 = scmp.lt.s32.totalorder %s7677_s28, 1  ;;  %v5339_v0 = vld [vmem:[#allocation2 + $0x30] sm:$0xf]  ;;  %s8443_s21 = sld [smem:[#allocation21_spill]] }
  0x3c   : > { %v6801_v1 = vld [vmem:[#allocation2 + $0x34] sm:$0xf0]  ;;  %v6800_v2 = vld [vmem:[#allocation2 + $0x34] sm:$0xf]  ;;  %v5341_v4 = vld [vmem:[#allocation2 + $0x38] sm:$0xf0] }
  0x3d   : > { %s8457_s28 = smov (!%p780_p6, %s7677_s28), 1  ;;  %v5340_v3 = vor.u32 %v6801_v1, %v5339_v0  ;;  %v5305_v5 = vld [vmem:[#allocation2 + $0x70] sm:$0xf]  ;;  %v6809_v6 = vld [vmem:[#allocation2 + $0x74] sm:$0xf0]  ;;  %v5344_v7 = vor.u32 %v6800_v2, %v5341_v4  ;;  %vm809_vm0 = vcmask 1040384  }
  0x3e   : > { %s6793_s29 = sshll.u32 %s8457_s28, 4  ;;  %v5306_v8 = vor.u32 %v6809_v6, %v5305_v5  ;;  %v6808_v9 = vld [vmem:[#allocation2 + $0x74] sm:$0xf]  ;;  %v5307_v10 = vld [vmem:[#allocation2 + $0x78] sm:$0xf0]  ;;  %vm884_vm3 = vcmask 523264  }
  0x3f   : > { %v5331_v11 = vld [vmem:[#allocation2 + $0x20] sm:$0xf]  ;;  %962 = vmatpush.bf16.msra.mxu2 %v5340_v3  ;;  %v5310_v12 = vor.u32 %v6808_v9, %v5307_v10  ;;  %v6799_v13 = vld [vmem:[#allocation2 + $0x24] sm:$0xf0]  ;;  %v6798_v14 = vld [vmem:[#allocation2 + $0x24] sm:$0xf]  ;;  %976 = vmatpush.bf16.msra.mxu3 %v5344_v7 }
  0x40   : > { %v5333_v15 = vld [vmem:[#allocation2 + $0x28] sm:$0xf0]  ;;  %892 = vmatpush.bf16.msra.mxu0 %v5306_v8  ;;  %v5332_v16 = vor.u32 %v6799_v13, %v5331_v11  ;;  %v5297_v18 = vld [vmem:[#allocation2 + $0x60] sm:$0xf]  ;;  %v6807_v19 = vld [vmem:[#allocation2 + $0x64] sm:$0xf0] }
  0x41   : > { %v5336_v17 = vor.u32 %v6798_v14, %v5333_v15  ;;  %v6806_v20 = vld [vmem:[#allocation2 + $0x64] sm:$0xf]  ;;  %906 = vmatpush.bf16.msra.mxu1 %v5310_v12  ;;  %v5298_v21 = vor.u32 %v6807_v19, %v5297_v18  ;;  %v5299_v22 = vld [vmem:[#allocation2 + $0x68] sm:$0xf0]  ;;  %v5323_v23 = vld [vmem:[#allocation2 + $0x10] sm:$0xf]  ;;  %s7778_s20 = scalar_lea.vmem %s8443_s21, %s6793_s29 }
  0x42   : > { %v6797_v24 = vld [vmem:[#allocation2 + $0x14] sm:$0xf0]  ;;  %v5302_v25 = vor.u32 %v6806_v20, %v5299_v22  ;;  %v6796_v26 = vld [vmem:[#allocation2 + $0x14] sm:$0xf]  ;;  %v5325_v27 = vld [vmem:[#allocation2 + $0x18] sm:$0xf0] }
  0x43   : > { %v5289_v28 = vld [vmem:[#allocation2 + $0x50] sm:$0xf]  ;;  %963 = vmatpush.bf16.msra.mxu2 %v5332_v16  ;;  %v5324_v29 = vor.u32 %v6797_v24, %v5323_v23  ;;  %v6805_v30 = vld [vmem:[#allocation2 + $0x54] sm:$0xf0]  ;;  %v6804_v31 = vld [vmem:[#allocation2 + $0x54] sm:$0xf]  ;;  %977 = vmatpush.bf16.msra.mxu3 %v5336_v17  ;;  %v5328_v33 = vor.u32 %v6796_v26, %v5325_v27 }
  0x44   : > { %v5291_v32 = vld [vmem:[#allocation2 + $0x58] sm:$0xf0]  ;;  %893 = vmatpush.bf16.msra.mxu0 %v5298_v21  ;;  %v5290_v34 = vor.u32 %v6805_v30, %v5289_v28  ;;  %v5315_v35 = vld [vmem:[#allocation2] sm:$0xf]  ;;  %v6795_v36 = vld [vmem:[#allocation2 + $0x4] sm:$0xf0] }
  0x45   : > { %v6794_v37 = vld [vmem:[#allocation2 + $0x4] sm:$0xf]  ;;  %907 = vmatpush.bf16.msra.mxu1 %v5302_v25  ;;  %v5294_v38 = vor.u32 %v6804_v31, %v5291_v32  ;;  %v5317_v39 = vld [vmem:[#allocation2 + $0x8] sm:$0xf0]  ;;  %v5281_v40 = vld [vmem:[#allocation2 + $0x40] sm:$0xf]  ;;  %v5316_v45 = vor.u32 %v6795_v36, %v5315_v35 }
  0x46   : > { %v6803_v41 = vld [vmem:[#allocation2 + $0x44] sm:$0xf0]  ;;  %v6802_v42 = vld [vmem:[#allocation2 + $0x44] sm:$0xf]  ;;  %v5283_v43 = vld [vmem:[#allocation2 + $0x48] sm:$0xf0]  ;;  %v5320_v50 = vor.u32 %v6794_v37, %v5317_v39 }
  0x47   : > { %v791_v44 = vld [vmem:[%s7778_s20] sm:$0xff]  ;;  %964 = vmatpush.bf16.msra.mxu2 %v5324_v29  ;;  %v792_v46 = vld [vmem:[%s7778_s20 + $0x8] sm:$0xff]  ;;  %v5373_v48 = vld [vmem:[#allocation2 + $0xb0] sm:$0xf]  ;;  %978 = vmatpush.bf16.msra.mxu3 %v5328_v33  ;;  %v5282_v51 = vor.u32 %v6803_v41, %v5281_v40  ;;  %v5286_v55 = vor.u32 %v6802_v42, %v5283_v43  ;;  %vm810_vm1 = vsmask.f32 256 }
  0x48   : > { %v793_v47 = vpack.c.bf16 %v791_v44, %v791_v44  ;;  %v6817_v49 = vld [vmem:[#allocation2 + $0xb4] sm:$0xf0]  ;;  %894 = vmatpush.bf16.msra.mxu0 %v5290_v34  ;;  %v794_v52 = vpack.c.bf16 %v792_v46, %v792_v46  ;;  %v6816_v53 = vld [vmem:[#allocation2 + $0xb4] sm:$0xf]  ;;  %v5375_v54 = vld [vmem:[#allocation2 + $0xb8] sm:$0xf0] }
  0x49   : > { %908 = vmatpush.bf16.msra.mxu1 %v5294_v38  ;;  %v5374_v57 = vor.u32 %v6817_v49, %v5373_v48  ;;  %v5378_v59 = vor.u32 %v6816_v53, %v5375_v54  ;;  %v5365_v60 = vld [vmem:[#allocation2 + $0xa0] sm:$0xf]  ;;  %v6815_v61 = vld [vmem:[#allocation2 + $0xa4] sm:$0xf0]  ;;  %v6814_v62 = vld [vmem:[#allocation2 + $0xa4] sm:$0xf] }
  0x4a   : > { %v797_v56 = vunpack.c.l.b16 %v793_v47  ;;  %v798_v58 = vunpack.c.l.b16 %v794_v52  ;;  %v5367_v63 = vld [vmem:[#allocation2 + $0xa8] sm:$0xf0]  ;;  %v5366_v1 = vor.u32 %v6815_v61, %v5365_v60  ;;  %v5357_v5 = vld [vmem:[#allocation2 + $0x90] sm:$0xf]  ;;  %v6813_v6 = vld [vmem:[#allocation2 + $0x94] sm:$0xf0] }
  0x4b   : > { %965 = vmatpush.bf16.msra.mxu2 %v5316_v45  ;;  %979 = vmatpush.bf16.msra.mxu3 %v5320_v50  ;;  %v5370_v4 = vor.u32 %v6814_v62, %v5367_v63  ;;  %v6812_v7 = vld [vmem:[#allocation2 + $0x94] sm:$0xf]  ;;  %v5359_v8 = vld [vmem:[#allocation2 + $0x98] sm:$0xf0]  ;;  %vm7783_vm2 = vmand %vm809_vm0, %vm810_vm1  ;;  %v5358_v13 = vor.u32 %v6813_v6, %v5357_v5  ;;  %vm831_vm4 = vsmask.f32 7424 }
  0x4c   : > { %895 = vmatpush.bf16.msra.mxu0 %v5282_v51  ;;  %v799_v0 = vpack.c.b16 %v798_v58, %v797_v56  ;;  %v5362_v14 = vor.u32 %v6812_v7, %v5359_v8  ;;  %v5349_v15 = vld [vmem:[#allocation2 + $0x80] sm:$0xf]  ;;  %v6811_v16 = vld [vmem:[#allocation2 + $0x84] sm:$0xf0]  ;;  %v6810_v18 = vld [vmem:[#allocation2 + $0x84] sm:$0xf] }
  0x4d   : > { %909 = vmatpush.bf16.msra.mxu1 %v5286_v55  ;;  %v5351_v19 = vld [vmem:[#allocation2 + $0x88] sm:$0xf0]  ;;  %v5350_v23 = vor.u32 %v6811_v16, %v5349_v15  ;;  %vm997_vm5 = vcmask 1046528   ;;  %v6825_v34 = vld [vmem:[#allocation4 + $0x38] sm:$0xff]  ;;  %v6824_v36 = vld [vmem:[#allocation4 + $0x30] sm:$0xff]  ;;  %s8446_s24 = sld [smem:[#allocation23_spill]] }
  0x4e   : > { %v801_v2 = vshrl.u32 %v799_v0, 16  ;;  %v804_v3 = vshll.u32 %v799_v0, 16  ;;  %v5354_v24 = vor.u32 %v6810_v18, %v5351_v19  ;;  %v6833_v35 = vld [vmem:[#allocation4 + $0x78] sm:$0xff]  ;;  %v6832_v37 = vld [vmem:[#allocation4 + $0x70] sm:$0xff]  ;;  %v6823_v42 = vld [vmem:[#allocation4 + $0x28] sm:$0xff]  ;;  %s8447_s18 = sld [smem:[#allocation24_spill]] }
  0x4f   : > { %v6831_v43 = vld [vmem:[#allocation4 + $0x68] sm:$0xff]  ;;  %v6822_v44 = vld [vmem:[#allocation4 + $0x20] sm:$0xff]  ;;  %v6821_v49 = vld [vmem:[#allocation4 + $0x18] sm:$0xff]  ;;  %vm1093_vm6 = vcmask 130048   ;;  %s8448_s22 = sld [smem:[#allocation26_spill]]  ;;  %vm1292_vm7 = vcmask 1044480  }
  0x50   : > { %1048 = vmatpush.bf16.msrb.mxu0 %v5374_v57  ;;  %v803_v9 = vrot.slane %v801_v2, 7  ;;  %v6830_v45 = vld [vmem:[#allocation4 + $0x60] sm:$0xff]  ;;  %v6829_v50 = vld [vmem:[#allocation4 + $0x58] sm:$0xff]  ;;  %v6828_v60 = vld [vmem:[#allocation4 + $0x50] sm:$0xff]  ;;  %vm1293_vm8 = vsmask.f32 4352 }
  0x51   : > { %1062 = vmatpush.bf16.msrb.mxu1 %v5378_v59  ;;  %v6820_v59 = vld [vmem:[#allocation4 + $0x10] sm:$0xff]  ;;  %v6819_v5 = vld [vmem:[#allocation4 + $0x8] sm:$0xff]  ;;  %v6826_v18 = vld [vmem:[#allocation4 + $0x40] sm:$0xff]  ;;  %vm1694_vm10 = vcmask 1043456   ;;  %vm1690_vm11 = vcmask 64512   ;;  %vm1889_vm12 = vcmask 1041408  }
  0x52   : > { %v806_v11 = vor.u32 %v804_v3, %v803_v9  ;;  %v813_v12 = vsel %vm7783_vm2, %v803_v9, 0  ;;  %v6827_v6 = vld [vmem:[#allocation4 + $0x48] sm:$0xff]  ;;  %vm8097_vm9 = vmand %vm1292_vm7, %vm1293_vm8  ;;  %vm1885_vm13 = vcmask 31744   ;;  %vm3864_vm14 = vsmask.f32 1280  ;;  %s8451_s5 = sld [smem:[#allocation28_spill]] }
  0x53   : > { %v840_v17 = vshll.u32 %v813_v12, 16  ;;  %v999_v30 = vrot.slane %v813_v12, 1  ;;  %v1076_v48 = vld [vmem:[%s8446_s24] sm:$0x3]  ;;  %vm3865_vm15 = vmand %vm1889_vm12, %vm3864_vm14  ;;  %vm4315_vm1 = vsmask.f32 6400 }
  0x54   : > { %1049 = vmatpush.bf16.msrb.mxu0 %v5366_v1  ;;  %v812_v20 = vsel %vm7783_vm2, 0, %v806_v11  ;;  %v1078_v56 = vperm.slane %v1076_v48, 0  ;;  %v1079_v58 = vperm.slane %v1076_v48, 1  ;;  %v1090_v16 = vld [vmem:[%s8447_s18] sm:$0xf]  ;;  %s7554_s4 = smov 8  }
  0x55   : > { %1063 = vmatpush.bf16.msrb.mxu1 %v5370_v4  ;;  %5345 = vmatmul.msk.bf16.vlgmr.msra.gmra.mxu2 %vm884_vm3, %v812_v20  ;;  %v833_v21 = vshrl.u32 %v812_v20, 16  ;;  %v835_v22 = vshll.u32 %v812_v20, 16  ;;  %v842_v26 = vrot.slane %v840_v17, 1  ;;  %v998_v29 = vrot.slane %v812_v20, 1  ;;  %v6818_v17 = vld [vmem:[#allocation4] sm:$0xff]  ;;  %s7555_s0 = smov 16  }
  0x56   : > { %5346 = vmatmul.msk.bf16.vlgmr.msra.gmra.mxu3 %vm884_vm3, %v812_v20  ;;  %v5521_v19 = vld [vmem:[%s8448_s22 + $0xf0] sm:$0xf]  ;;  %v6865_v20 = vld [vmem:[%s8448_s22 + $0xf4] sm:$0xf0]  ;;  %v5497_v48 = vld [vmem:[%s8448_s22 + $0xc0] sm:$0xf] }
  0x57   : > { %v837_v25 = vrot.slane %v835_v22, 1  ;;  %v1000_v31 = vsel %vm997_vm5, %v998_v29, %v999_v30  ;;  %v5522_v22 = vor.u32 %v6865_v20, %v5521_v19  ;;  %v5585_v29 = vld [vmem:[%s8448_s22 + $0x70] sm:$0xf]  ;;  %s7556_s27 = smov 32   ;;  %s7557_s10 = smov 64  }
  0x58   : > { %1050 = vmatpush.bf16.msrb.mxu0 %v5358_v13  ;;  %s8452_s30 = sld [smem:[#allocation30_spill]]  ;;  %s7159_s18 = smul.u32 24, %s8457_s28 }
  0x59   : > { %1064 = vmatpush.bf16.msrb.mxu1 %v5362_v14  ;;  %v838_v27 = vor.u32 %v837_v25, %v833_v21  ;;  %v6864_v21 = vld [vmem:[%s8448_s22 + $0xf4] sm:$0xf]  ;;  %v6863_v25 = vld [vmem:[%s8448_s22 + $0xe4] sm:$0xf0]  ;;  %s8453_s24 = sld [smem:[#allocation29_spill]] }
  0x5b   : > { %v843_v28 = vsel %vm831_vm4, %v838_v27, %v842_v26  ;;  %v6862_v27 = vld [vmem:[%s8448_s22 + $0xe4] sm:$0xf] }
  0x5c   : > { %1051 = vmatpush.bf16.msrb.mxu0 %v5350_v23  ;;  %5312 = vmatmul.msk.bf16.vlgmr.msra.gmra.mxu1 %vm884_vm3, %v843_v28  ;;  %v5523_v23 = vld [vmem:[%s8448_s22 + $0xf8] sm:$0xf0] }
  0x5d   : > { %1065 = vmatpush.bf16.msrb.mxu1 %v5354_v24  ;;  %5311 = vmatmul.msk.bf16.vlgmr.msra.gmra.mxu0 %vm884_vm3, %v843_v28  ;;  %v5513_v24 = vld [vmem:[%s8448_s22 + $0xe0] sm:$0xf]  ;;  %v5526_v26 = vor.u32 %v6864_v21, %v5523_v23  ;;  %v5515_v28 = vld [vmem:[%s8448_s22 + $0xe8] sm:$0xf0]  ;;  %v6841_v23 = vld [vmem:[%s8448_s22 + $0x34] sm:$0xf0] }
  0x5e   : > { %v5514_v30 = vor.u32 %v6863_v25, %v5513_v24  ;;  %v6840_v24 = vld [vmem:[%s8448_s22 + $0x34] sm:$0xf] }
  0x60   : > { %1253 = vmatpush.bf16.msra.mxu0 %v6825_v34  ;;  %v5518_v34 = vor.u32 %v6862_v27, %v5515_v28  ;;  %v5473_v27 = vld [vmem:[%s8448_s22 + $0x90] sm:$0xf]  ;;  %v6853_v28 = vld [vmem:[%s8448_s22 + $0x94] sm:$0xf0] }
  0x61   : > { %1266 = vmatpush.bf16.msra.mxu1 %v6833_v35 }
  0x64   : > { %1254 = vmatpush.bf16.msra.mxu0 %v6824_v36 }
  0x65   : > { %1267 = vmatpush.bf16.msra.mxu1 %v6832_v37  ;;  %v5505_v37 = vld [vmem:[%s8448_s22 + $0xd0] sm:$0xf] }
  0x68   : > { %1255 = vmatpush.bf16.msra.mxu0 %v6823_v42  ;;  %v6847_v42 = vld [vmem:[%s8448_s22 + $0x64] sm:$0xf0] }
  0x69   : > { %1268 = vmatpush.bf16.msra.mxu1 %v6831_v43 }
  0x6c   : > { %5380 = vmatmul.msk.bf16.vlgmr.msrb.gmra.mxu1 %vm884_vm3, %v1000_v31  ;;  %1256 = vmatpush.bf16.msra.mxu0 %v6822_v44  ;;  %v6846_v44 = vld [vmem:[%s8448_s22 + $0x64] sm:$0xf] }
  0x6d   : > { %5379 = vmatmul.msk.bf16.vlgmr.msrb.gmra.mxu0 %vm884_vm3, %v1000_v31  ;;  %1269 = vmatpush.bf16.msra.mxu1 %v6830_v45  ;;  %v6849_v31 = vld [vmem:[%s8448_s22 + $0x74] sm:$0xf0]  ;;  %v5579_v45 = vld [vmem:[%s8448_s22 + $0x68] sm:$0xf0] }
  0x6e   : > { %v5586_v35 = vor.u32 %v6849_v31, %v5585_v29  ;;  %v6852_v31 = vld [vmem:[%s8448_s22 + $0x94] sm:$0xf] }
  0x70   : > { %1257 = vmatpush.bf16.msra.mxu0 %v6821_v49  ;;  %v6859_v49 = vld [vmem:[%s8448_s22 + $0xc4] sm:$0xf0] }
  0x71   : > { %1270 = vmatpush.bf16.msra.mxu1 %v6829_v50 }
  0x74   : > { %1258 = vmatpush.bf16.msra.mxu0 %v6820_v59  ;;  %v5561_v59 = vld [vmem:[%s8448_s22 + $0x40] sm:$0xf] }
  0x75   : > { %1271 = vmatpush.bf16.msra.mxu1 %v6828_v60  ;;  %v5498_v60 = vor.u32 %v6859_v49, %v5497_v48  ;;  %v6880_v48 = vld [vmem:[%s8448_s22 + $0x174] sm:$0xf] }
  0x78   : > { %1259 = vmatpush.bf16.msra.mxu0 %v6819_v5 }
  0x79   : > { %1272 = vmatpush.bf16.msra.mxu1 %v6827_v6 }
  0x7c   : > { %1260 = vmatpush.bf16.msra.mxu0 %v6818_v17 }
  0x7d   : > { %1273 = vmatpush.bf16.msra.mxu1 %v6826_v18 }
  0x80   : > { %1523 = vmatpush.bf16.msrb.mxu0 %v5586_v35  ;;  %v6839_v35 = vld [vmem:[%s8448_s22 + $0x24] sm:$0xf0] }
  0xd8   : > { %v967_v40 = vpop.f32.mrf.mxu2 }
  0xd9   : > { %v911_v33 = vpop.f32.mrf.mxu1  ;;  %v981_v41 = vpop.f32.mrf.mxu3 }
  0xda   : > { %v897_v32 = vpop.f32.mrf.mxu0  ;;  %v982_v52 = vadd.f32 %v981_v41, %v911_v33  ;;  %v5587_v33 = vld [vmem:[%s8448_s22 + $0x78] sm:$0xf0]  ;;  %v5577_v41 = vld [vmem:[%s8448_s22 + $0x60] sm:$0xf] }
  0xdb   : > { %v968_v51 = vadd.f32 %v967_v40, %v897_v32  ;;  %v6848_v32 = vld [vmem:[%s8448_s22 + $0x74] sm:$0xf]  ;;  %v5507_v40 = vld [vmem:[%s8448_s22 + $0xd8] sm:$0xf0]  ;;  %v5578_v43 = vor.u32 %v6847_v42, %v5577_v41  ;;  %v6851_v41 = vld [vmem:[%s8448_s22 + $0x84] sm:$0xf0] }
  0xdc   : > { %v5590_v36 = vor.u32 %v6848_v32, %v5587_v33  ;;  %v5475_v32 = vld [vmem:[%s8448_s22 + $0x98] sm:$0xf0]  ;;  %v6850_v42 = vld [vmem:[%s8448_s22 + $0x84] sm:$0xf] }
  0xdd   : > { %1524 = vmatpush.bf16.msrb.mxu0 %v5578_v43  ;;  %v5478_v33 = vor.u32 %v6852_v31, %v5475_v32  ;;  %v5467_v43 = vld [vmem:[%s8448_s22 + $0x88] sm:$0xf0]  ;;  %v5617_v31 = vld [vmem:[%s8448_s22 + $0x110] sm:$0xf]  ;;  %v6869_v32 = vld [vmem:[%s8448_s22 + $0x114] sm:$0xf0] }
  0xde   : > { %1536 = vmatpush.bf16.msrb.mxu1 %v5590_v36  ;;  %v6838_v36 = vld [vmem:[%s8448_s22 + $0x24] sm:$0xf] }
  0xe0   : > { %v969_v53 = vpop.f32.mrf.mxu2 }
  0xe1   : > { %v913_v39 = vpop.f32.mrf.mxu1  ;;  %v983_v54 = vpop.f32.mrf.mxu3 }
  0xe2   : > { %v899_v38 = vpop.f32.mrf.mxu0  ;;  %v984_v62 = vadd.f32 %v983_v54, %v913_v39  ;;  %v6860_v39 = vld [vmem:[%s8448_s22 + $0xd4] sm:$0xf]  ;;  %v6858_v54 = vld [vmem:[%s8448_s22 + $0xc4] sm:$0xf] }
  0xe3   : > { %v970_v61 = vadd.f32 %v969_v53, %v899_v38  ;;  %v6861_v38 = vld [vmem:[%s8448_s22 + $0xd4] sm:$0xf0]  ;;  %v5510_v50 = vor.u32 %v6860_v39, %v5507_v40  ;;  %v6844_v53 = vld [vmem:[%s8448_s22 + $0x54] sm:$0xf]  ;;  %v5465_v39 = vld [vmem:[%s8448_s22 + $0x80] sm:$0xf] }
  0xe9   : > { %v1067_v47 = vpop.f32.mrf.mxu1 }
  0xea   : > { %v1053_v46 = vpop.f32.mrf.mxu0  ;;  %v1073_v57 = vadd.f32 %v1067_v47, %v982_v52  ;;  %v5582_v47 = vor.u32 %v6846_v44, %v5579_v45  ;;  %v6845_v52 = vld [vmem:[%s8448_s22 + $0x54] sm:$0xf0]  ;;  %v5466_v44 = vor.u32 %v6851_v41, %v5465_v39  ;;  %v5470_v45 = vor.u32 %v6850_v42, %v5467_v43  ;;  %v6866_v39 = vld [vmem:[%s8448_s22 + $0x104] sm:$0xf] }
  0xeb   : > { %v1072_v55 = vadd.f32 %v1053_v46, %v968_v51  ;;  %v5506_v46 = vor.u32 %v6861_v38, %v5505_v37  ;;  %v5569_v51 = vld [vmem:[%s8448_s22 + $0x50] sm:$0xf]  ;;  %v5547_v38 = vld [vmem:[%s8448_s22 + $0x28] sm:$0xf0] }
  0xec   : > { %v1083_v2 = vadd.f32 %v1079_v58, %v1073_v57  ;;  %1537 = vmatpush.bf16.msrb.mxu1 %v5582_v47  ;;  %v5570_v57 = vor.u32 %v6845_v52, %v5569_v51  ;;  %v5550_v40 = vor.u32 %v6838_v36, %v5547_v38  ;;  %v6881_v47 = vld [vmem:[%s8448_s22 + $0x174] sm:$0xf0]  ;;  %v5537_v51 = vld [vmem:[%s8448_s22 + $0x10] sm:$0xf]  ;;  %v6867_v38 = vld [vmem:[%s8448_s22 + $0x104] sm:$0xf0] }
  0xed   : > { %v1082_v1 = vadd.f32 %v1078_v56, %v1072_v55  ;;  %v5499_v55 = vld [vmem:[%s8448_s22 + $0xc8] sm:$0xf0]  ;;  %v6837_v52 = vld [vmem:[%s8448_s22 + $0x14] sm:$0xf0] }
  0xee   : > { %v1087_v11 = vmax.f32 %v1083_v2, 0.0  ;;  %v6857_v2 = vld [vmem:[%s8448_s22 + $0xb4] sm:$0xf0]  ;;  %1525 = vmatpush.bf16.msrb.mxu0 %v5570_v57 }
  0xef   : > { %v1086_v9 = vmax.f32 %v1082_v1, 0.0  ;;  %v5489_v1 = vld [vmem:[%s8448_s22 + $0xb0] sm:$0xf] }
  0xf1   : > { %v1069_v0 = vpop.f32.mrf.mxu1 }
  0xf2   : > { %v1055_v63 = vpop.f32.mrf.mxu0  ;;  %v1075_v4 = vadd.f32 %v1069_v0, %v984_v62  ;;  %v6842_v62 = vld [vmem:[%s8448_s22 + $0x44] sm:$0xf]  ;;  %v5502_v0 = vor.u32 %v6858_v54, %v5499_v55  ;;  %v5538_v54 = vor.u32 %v6837_v52, %v5537_v51  ;;  %v6836_v55 = vld [vmem:[%s8448_s22 + $0x14] sm:$0xf] }
  0xf3   : > { %v1074_v3 = vadd.f32 %v1055_v63, %v970_v61  ;;  %v6843_v61 = vld [vmem:[%s8448_s22 + $0x44] sm:$0xf0]  ;;  %v5563_v63 = vld [vmem:[%s8448_s22 + $0x48] sm:$0xf0] }
  0xf4   : > { %v1085_v8 = vadd.f32 %v1079_v58, %v1075_v4  ;;  %v5491_v4 = vld [vmem:[%s8448_s22 + $0xb8] sm:$0xf0]  ;;  %v5562_v5 = vor.u32 %v6843_v61, %v5561_v59  ;;  %v5566_v6 = vor.u32 %v6842_v62, %v5563_v63  ;;  %v6879_v59 = vld [vmem:[%s8448_s22 + $0x164] sm:$0xf0]  ;;  %v5659_v62 = vld [vmem:[%s8448_s22 + $0x168] sm:$0xf0] }
  0xf5   : > { %v1084_v7 = vadd.f32 %v1078_v56, %v1074_v3  ;;  %v5571_v56 = vld [vmem:[%s8448_s22 + $0x58] sm:$0xf0]  ;;  %v6856_v3 = vld [vmem:[%s8448_s22 + $0xb4] sm:$0xf] }
  0xf6   : > { %v1089_v13 = vmax.f32 %v1085_v8, 0.0  ;;  %v5574_v58 = vor.u32 %v6844_v53, %v5571_v56  ;;  %v5494_v8 = vor.u32 %v6856_v3, %v5491_v4  ;;  %1526 = vmatpush.bf16.msrb.mxu0 %v5562_v5  ;;  %v5539_v56 = vld [vmem:[%s8448_s22 + $0x18] sm:$0xf0]  ;;  %v5531_v4 = vld [vmem:[%s8448_s22 + $0x8] sm:$0xf0] }
  0xf7   : > { %v1088_v12 = vmax.f32 %v1084_v7, 0.0  ;;  %v5490_v7 = vor.u32 %v6857_v2, %v5489_v1  ;;  %v5542_v57 = vor.u32 %v6836_v55, %v5539_v56  ;;  %v6835_v1 = vld [vmem:[%s8448_s22 + $0x4] sm:$0xf0]  ;;  %v6834_v2 = vld [vmem:[%s8448_s22 + $0x4] sm:$0xf] }
  0xf8   : > { %v1092_v15 = vpack.c.bf16 %v1089_v13, %v1087_v11  ;;  %1538 = vmatpush.bf16.msrb.mxu1 %v5574_v58  ;;  %v6855_v11 = vld [vmem:[%s8448_s22 + $0xa4] sm:$0xf0]  ;;  %v5483_v13 = vld [vmem:[%s8448_s22 + $0xa8] sm:$0xf0]  ;;  %v5657_v58 = vld [vmem:[%s8448_s22 + $0x160] sm:$0xf]  ;;  %v5534_v5 = vor.u32 %v6834_v2, %v5531_v4 }
  0xf9   : > { %v1091_v14 = vpack.c.bf16 %v1088_v12, %v1086_v9  ;;  %v5481_v9 = vld [vmem:[%s8448_s22 + $0xa0] sm:$0xf]  ;;  %v6854_v12 = vld [vmem:[%s8448_s22 + $0xa4] sm:$0xf]  ;;  %v5658_v61 = vor.u32 %v6879_v59, %v5657_v58  ;;  %v6897_v4 = vld [vmem:[#allocation6 + $0x78] sm:$0xff] }
  0xfa   : > { %1117 = vmatpush.bf16.msrb.mxu3 %v1092_v15  ;;  %v5486_v15 = vor.u32 %v6854_v12, %v5483_v13  ;;  %v5641_v13 = vld [vmem:[%s8448_s22 + $0x140] sm:$0xf] }
  0xfb   : > { %1104 = vmatpush.bf16.msrb.mxu2 %v1091_v14  ;;  %v5482_v14 = vor.u32 %v6855_v11, %v5481_v9  ;;  %v5651_v11 = vld [vmem:[%s8448_s22 + $0x158] sm:$0xf0]  ;;  %v8132_v55 = vld [vmem:[%s8410_s13] sm:$0xff] }
  0xfc   : > { %1539 = vmatpush.bf16.msrb.mxu1 %v5566_v6  ;;  %v5649_v6 = vld [vmem:[%s8448_s22 + $0x150] sm:$0xf] }
  0xfd   : > { %5382 = vmatmul.msk.bf16.vlgmr.msrb.gmra.mxu3 %vm1093_vm6, %v1090_v16 }
  0xfe   : > { %5381 = vmatmul.msk.bf16.vlgmr.msrb.gmra.mxu2 %vm1093_vm6, %v1090_v16  ;;  %1430 = vmatpush.bf16.msra.mxu3 %v5526_v26  ;;  %v5555_v26 = vld [vmem:[%s8448_s22 + $0x38] sm:$0xf0] }
  0xff   : > { %1417 = vmatpush.bf16.msra.mxu2 %v5522_v22  ;;  %v5553_v22 = vld [vmem:[%s8448_s22 + $0x30] sm:$0xf]  ;;  %v5558_v29 = vor.u32 %v6840_v24, %v5555_v26  ;;  %v6871_v26 = vld [vmem:[%s8448_s22 + $0x124] sm:$0xf0] }
 0x100   : > { %v5554_v25 = vor.u32 %v6841_v23, %v5553_v22  ;;  %v5635_v23 = vld [vmem:[%s8448_s22 + $0x138] sm:$0xf0] }
 0x101   : > { %1540 = vmatpush.bf16.msrb.mxu1 %v5558_v29 }
 0x102   : > { %1431 = vmatpush.bf16.msra.mxu3 %v5518_v34  ;;  %1527 = vmatpush.bf16.msrb.mxu0 %v5554_v25  ;;  %v5545_v34 = vld [vmem:[%s8448_s22 + $0x20] sm:$0xf] }
 0x103   : > { %1418 = vmatpush.bf16.msra.mxu2 %v5514_v30  ;;  %v5474_v30 = vor.u32 %v6853_v28, %v5473_v27  ;;  %v5546_v37 = vor.u32 %v6839_v35, %v5545_v34  ;;  %v5625_v25 = vld [vmem:[%s8448_s22 + $0x120] sm:$0xf]  ;;  %v6870_v27 = vld [vmem:[%s8448_s22 + $0x124] sm:$0xf]  ;;  %v5627_v28 = vld [vmem:[%s8448_s22 + $0x128] sm:$0xf0]  ;;  %v5618_v35 = vor.u32 %v6869_v32, %v5617_v31 }
 0x104   : > { %v5626_v29 = vor.u32 %v6871_v26, %v5625_v25  ;;  %v5619_v34 = vld [vmem:[%s8448_s22 + $0x118] sm:$0xf0]  ;;  %v6883_v31 = vld [vmem:[#allocation6 + $0x8] sm:$0xff] }
 0x105   : > { %1541 = vmatpush.bf16.msrb.mxu1 %v5550_v40  ;;  %v5611_v40 = vld [vmem:[%s8448_s22 + $0x108] sm:$0xf0] }
 0x106   : > { %1432 = vmatpush.bf16.msra.mxu3 %v5510_v50  ;;  %1528 = vmatpush.bf16.msrb.mxu0 %v5546_v37  ;;  %v5667_v50 = vld [vmem:[%s8448_s22 + $0x178] sm:$0xf0]  ;;  %v5609_v37 = vld [vmem:[%s8448_s22 + $0x100] sm:$0xf]  ;;  %v6891_v32 = vld [vmem:[#allocation6 + $0x48] sm:$0xff] }
 0x107   : > { %1419 = vmatpush.bf16.msra.mxu2 %v5506_v46  ;;  %v5665_v46 = vld [vmem:[%s8448_s22 + $0x170] sm:$0xf]  ;;  %v5670_v53 = vor.u32 %v6880_v48, %v5667_v50 }
 0x108   : > { %v5666_v49 = vor.u32 %v6881_v47, %v5665_v46 }
 0x109   : > { %1542 = vmatpush.bf16.msrb.mxu1 %v5542_v57 }
 0x10a   : > { %1433 = vmatpush.bf16.msra.mxu3 %v5502_v0  ;;  %1529 = vmatpush.bf16.msrb.mxu0 %v5538_v54  ;;  %v5529_v0 = vld [vmem:[%s8448_s22] sm:$0xf] }
 0x10b   : > { %1420 = vmatpush.bf16.msra.mxu2 %v5498_v60  ;;  %v6878_v60 = vld [vmem:[%s8448_s22 + $0x164] sm:$0xf]  ;;  %v5530_v3 = vor.u32 %v6835_v1, %v5529_v0 }
 0x10c   : > { %v5662_v63 = vor.u32 %v6878_v60, %v5659_v62 }
 0x10d   : > { %1543 = vmatpush.bf16.msrb.mxu1 %v5534_v5  ;;  %v6888_v5 = vld [vmem:[#allocation6 + $0x30] sm:$0xff] }
 0x10e   : > { %1434 = vmatpush.bf16.msra.mxu3 %v5494_v8  ;;  %v6876_v8 = vld [vmem:[%s8448_s22 + $0x154] sm:$0xf]  ;;  %1530 = vmatpush.bf16.msrb.mxu0 %v5530_v3  ;;  %v6889_v3 = vld [vmem:[#allocation6 + $0x38] sm:$0xff] }
 0x10f   : > { %1421 = vmatpush.bf16.msra.mxu2 %v5490_v7  ;;  %v6877_v7 = vld [vmem:[%s8448_s22 + $0x154] sm:$0xf0]  ;;  %v5654_v12 = vor.u32 %v6876_v8, %v5651_v11  ;;  %v6895_v11 = vld [vmem:[#allocation6 + $0x68] sm:$0xff] }
 0x110   : > { %v5650_v9 = vor.u32 %v6877_v7, %v5649_v6  ;;  %v6896_v6 = vld [vmem:[#allocation6 + $0x70] sm:$0xff] }
 0x112   : > { %1435 = vmatpush.bf16.msra.mxu3 %v5486_v15  ;;  %v6874_v15 = vld [vmem:[%s8448_s22 + $0x144] sm:$0xf] }
 0x113   : > { %1422 = vmatpush.bf16.msra.mxu2 %v5482_v14  ;;  %v6875_v14 = vld [vmem:[%s8448_s22 + $0x144] sm:$0xf0] }
 0x116   : > { %1436 = vmatpush.bf16.msra.mxu3 %v5478_v33  ;;  %v6868_v33 = vld [vmem:[%s8448_s22 + $0x114] sm:$0xf] }
 0x117   : > { %1423 = vmatpush.bf16.msra.mxu2 %v5474_v30  ;;  %v5630_v30 = vor.u32 %v6870_v27, %v5627_v28  ;;  %v5622_v36 = vor.u32 %v6868_v33, %v5619_v34 }
 0x11a   : > { %1437 = vmatpush.bf16.msra.mxu3 %v5470_v45  ;;  %v5614_v45 = vor.u32 %v6866_v39, %v5611_v40 }
 0x11b   : > { %1424 = vmatpush.bf16.msra.mxu2 %v5466_v44  ;;  %v5610_v44 = vor.u32 %v6867_v38, %v5609_v37 }
 0x11e   : > { %1662 = vmatpush.bf16.msrb.mxu3 %v5670_v53 }
 0x11f   : > { %1649 = vmatpush.bf16.msrb.mxu2 %v5666_v49 }
 0x122   : > { %1663 = vmatpush.bf16.msrb.mxu3 %v5662_v63 }
 0x123   : > { %1650 = vmatpush.bf16.msrb.mxu2 %v5658_v61 }
 0x126   : > { %1664 = vmatpush.bf16.msrb.mxu3 %v5654_v12  ;;  %v6886_v12 = vld [vmem:[#allocation6 + $0x20] sm:$0xff] }
 0x127   : > { %1651 = vmatpush.bf16.msrb.mxu2 %v5650_v9  ;;  %v6887_v9 = vld [vmem:[#allocation6 + $0x28] sm:$0xff] }
 0x180   : > { %v1119_v17 = vpop.f32.mrf.mxu3 }
 0x181   : > { %v1106_v16 = vpop.f32.mrf.mxu2  ;;  %v1124_v19 = vpack.c.bf16 %v1119_v17, %v1119_v17  ;;  %v5643_v17 = vld [vmem:[%s8448_s22 + $0x148] sm:$0xf0] }
 0x182   : > { %v1123_v18 = vpack.c.bf16 %v1106_v16, %v1106_v16  ;;  %v5642_v16 = vor.u32 %v6875_v14, %v5641_v13  ;;  %v6894_v13 = vld [vmem:[#allocation6 + $0x60] sm:$0xff] }
 0x183   : > { %1274 = vmatmul.bf16.vlgmr.msra.gmra.mxu1 %v1124_v19  ;;  %v5633_v19 = vld [vmem:[%s8448_s22 + $0x130] sm:$0xf] }
 0x184   : > { %1261 = vmatmul.bf16.vlgmr.msra.gmra.mxu0 %v1123_v18  ;;  %v5646_v18 = vor.u32 %v6874_v15, %v5643_v17  ;;  %1652 = vmatpush.bf16.msrb.mxu2 %v5642_v16  ;;  %v6885_v16 = vld [vmem:[#allocation6 + $0x18] sm:$0xff] }
 0x185   : > { %v6893_v17 = vld [vmem:[#allocation6 + $0x58] sm:$0xff] }
 0x186   : > { %1665 = vmatpush.bf16.msrb.mxu3 %v5646_v18  ;;  %v1677_v18 = vld [vmem:[%s8403_s6] sm:$0x3] }
 0x188   : > { %v1121_v21 = vpop.f32.mrf.mxu3 }
 0x189   : > { %v1108_v20 = vpop.f32.mrf.mxu2  ;;  %v6872_v21 = vld [vmem:[%s8448_s22 + $0x134] sm:$0xf] }
 0x18a   : > { %v6873_v20 = vld [vmem:[%s8448_s22 + $0x134] sm:$0xf0]  ;;  %v5638_v24 = vor.u32 %v6872_v21, %v5635_v23  ;;  %v1679_v21 = vperm.slane %v1677_v18, 0  ;;  %v6884_v23 = vld [vmem:[#allocation6 + $0x10] sm:$0xff] }
 0x18b   : > { %v5634_v22 = vor.u32 %v6873_v20, %v5633_v19 }
 0x18c   : > { %1666 = vmatpush.bf16.msrb.mxu3 %v5638_v24  ;;  %v6892_v24 = vld [vmem:[#allocation6 + $0x50] sm:$0xff] }
 0x18d   : > { %1653 = vmatpush.bf16.msrb.mxu2 %v5634_v22  ;;  %v1680_v22 = vperm.slane %v1677_v18, 1  ;;  %v5790_v18 = vld [vmem:[#allocation7 + $0x68] sm:$0xf0] }
 0x190   : > { %1667 = vmatpush.bf16.msrb.mxu3 %v5630_v30 }
 0x191   : > { %1654 = vmatpush.bf16.msrb.mxu2 %v5626_v29 }
 0x194   : > { %1668 = vmatpush.bf16.msrb.mxu3 %v5622_v36 }
 0x195   : > { %1655 = vmatpush.bf16.msrb.mxu2 %v5618_v35 }
 0x198   : > { %1669 = vmatpush.bf16.msrb.mxu3 %v5614_v45 }
 0x199   : > { %1656 = vmatpush.bf16.msrb.mxu2 %v5610_v44 }
 0x200   : > { %v1275_v42 = vpop.f32.mrf.mxu1 }
 0x201   : > { %v1262_v41 = vpop.f32.mrf.mxu0 }
 0x202   : > { %v1276_v43 = vadd.f32 %v1275_v42, %v1262_v41  ;;  %v1687_v41 = vld [vmem:[%s8404_s7] sm:$0x3] }
 0x203   : > { %v6882_v42 = vld [vmem:[#allocation6] sm:$0xff] }
 0x204   : > { %v8093_v46 = vpack.c.bf16 %v1276_v43, %v1276_v43  ;;  %v6890_v43 = vld [vmem:[#allocation6 + $0x40] sm:$0xff] }
 0x206   : > { %v1281_v47 = vunpack.c.l.b16 %v8093_v46 }
 0x208   : > { %v1282_v48 = vpack.c.b16 %v1281_v47, %v1281_v47  ;;  %v1277_v50 = vpop.f32.mrf.mxu1 }
 0x209   : > { %v1264_v49 = vpop.f32.mrf.mxu0 }
 0x20a   : > { %v1284_v51 = vshrl.u32 %v1282_v48, 16  ;;  %v1287_v53 = vshll.u32 %v1282_v48, 16 }
 0x20c   : > { %v1286_v52 = vrot.slane %v1284_v51, 7  ;;  %v5796_v51 = vld [vmem:[#allocation7 + $0x70] sm:$0xf] }
 0x20e   : > { %v1289_v54 = vor.u32 %v1287_v53, %v1286_v52  ;;  %v6913_v52 = vld [vmem:[#allocation7 + $0x74] sm:$0xf0] }
 0x20f   : > { %v5797_v53 = vor.u32 %v6913_v52, %v5796_v51  ;;  %v6929_v51 = vld [vmem:[#allocation9 + $0x78] sm:$0xff]  ;;  %v6920_v52 = vld [vmem:[#allocation9 + $0x30] sm:$0xff] }
 0x210   : > { %v1291_v56 = vsel %vm7783_vm2, 0, %v1289_v54  ;;  %v5788_v54 = vld [vmem:[#allocation7 + $0x60] sm:$0xf] }
 0x211   : > { %v1295_v57 = vsel %vm8097_vm9, %v1291_v56, 0  ;;  %v6911_v56 = vld [vmem:[#allocation7 + $0x64] sm:$0xf0] }
 0x212   : > { %1531 = vmatmul.bf16.vlgmr.msrb.gmra.mxu0 %v1295_v57  ;;  %1544 = vmatmul.bf16.vlgmr.msrb.gmra.mxu1 %v1295_v57  ;;  %v1332_v58 = vshll.u32 %v1295_v57, 16  ;;  %v1330_v59 = vshrl.u32 %v1295_v57, 16  ;;  %v1567_v62 = vrot.slane %v1295_v57, 1  ;;  %v5789_v57 = vor.u32 %v6911_v56, %v5788_v54  ;;  %v6935_v54 = vld [vmem:[#allocation9 + $0xa8] sm:$0xff] }
 0x213   : > { %v6943_v56 = vld [vmem:[#allocation9 + $0xe8] sm:$0xff] }
 0x214   : > { %v1334_v60 = vrot.slane %v1332_v58, 1  ;;  %v5780_v58 = vld [vmem:[#allocation7 + $0x50] sm:$0xf] }
 0x216   : > { %v1335_v61 = vor.u32 %v1334_v60, %v1330_v59  ;;  %v6909_v59 = vld [vmem:[#allocation7 + $0x54] sm:$0xf0] }
 0x217   : > { %v5781_v60 = vor.u32 %v6909_v59, %v5780_v58  ;;  %v6927_v58 = vld [vmem:[#allocation9 + $0x68] sm:$0xff]  ;;  %v6934_v59 = vld [vmem:[#allocation9 + $0xa0] sm:$0xff] }
 0x218   : > { %1425 = vmatmul.bf16.vlgmr.msra.gmra.mxu2 %v1335_v61  ;;  %1438 = vmatmul.bf16.vlgmr.msra.gmra.mxu3 %v1335_v61  ;;  %v5772_v61 = vld [vmem:[#allocation7 + $0x40] sm:$0xf] }
 0x219   : > { %1857 = vmatpush.bf16.msra.mxu2 %v6889_v3  ;;  %1870 = vmatpush.bf16.msra.mxu3 %v6897_v4  ;;  %v5756_v3 = vld [vmem:[#allocation7 + $0x20] sm:$0xf]  ;;  %v6903_v4 = vld [vmem:[#allocation7 + $0x24] sm:$0xf0] }
 0x21d   : > { %1858 = vmatpush.bf16.msra.mxu2 %v6888_v5  ;;  %1871 = vmatpush.bf16.msra.mxu3 %v6896_v6  ;;  %v5757_v5 = vor.u32 %v6903_v4, %v5756_v3  ;;  %v5748_v6 = vld [vmem:[#allocation7 + $0x10] sm:$0xf]  ;;  %v6931_v3 = vld [vmem:[#allocation9 + $0x88] sm:$0xff] }
 0x221   : > { %1859 = vmatpush.bf16.msra.mxu2 %v6887_v9  ;;  %1872 = vmatpush.bf16.msra.mxu3 %v6895_v11  ;;  %v6912_v11 = vld [vmem:[#allocation7 + $0x74] sm:$0xf] }
 0x225   : > { %1860 = vmatpush.bf16.msra.mxu2 %v6886_v12  ;;  %1873 = vmatpush.bf16.msra.mxu3 %v6894_v13  ;;  %v5798_v12 = vld [vmem:[#allocation7 + $0x78] sm:$0xf0] }
 0x228   : > { %1657 = vmatmul.bf16.vlgmr.msrb.gmra.mxu2 %v1567_v62  ;;  %1670 = vmatmul.bf16.vlgmr.msrb.gmra.mxu3 %v1567_v62  ;;  %v6907_v62 = vld [vmem:[#allocation7 + $0x44] sm:$0xf0] }
 0x229   : > { %1861 = vmatpush.bf16.msra.mxu2 %v6885_v16  ;;  %1874 = vmatpush.bf16.msra.mxu3 %v6893_v17  ;;  %v5801_v16 = vor.u32 %v6912_v11, %v5798_v12  ;;  %v6910_v17 = vld [vmem:[#allocation7 + $0x64] sm:$0xf]  ;;  %v6917_v11 = vld [vmem:[#allocation9 + $0x18] sm:$0xff] }
 0x22a   : > { %v6925_v12 = vld [vmem:[#allocation9 + $0x58] sm:$0xff] }
 0x22d   : > { %1862 = vmatpush.bf16.msra.mxu2 %v6884_v23  ;;  %1875 = vmatpush.bf16.msra.mxu3 %v6892_v24  ;;  %v6908_v24 = vld [vmem:[#allocation7 + $0x54] sm:$0xf] }
 0x231   : > { %1863 = vmatpush.bf16.msra.mxu2 %v6883_v31  ;;  %1876 = vmatpush.bf16.msra.mxu3 %v6891_v32  ;;  %v5766_v31 = vld [vmem:[#allocation7 + $0x38] sm:$0xf0] }
 0x235   : > { %1864 = vmatpush.bf16.msra.mxu2 %v6882_v42  ;;  %1877 = vmatpush.bf16.msra.mxu3 %v6890_v43  ;;  %v5742_v43 = vld [vmem:[#allocation7 + $0x8] sm:$0xf0] }
 0x28f   : > { %v1532_v63 = vpop.f32.mrf.mxu0  ;;  %v1545_v0 = vpop.f32.mrf.mxu1 }
 0x297   : > { %v1534_v1 = vpop.f32.mrf.mxu0  ;;  %v1547_v2 = vpop.f32.mrf.mxu1 }
 0x298   : > { %v6905_v1 = vld [vmem:[#allocation7 + $0x34] sm:$0xf0] }
 0x29b   : > { %v1426_v7 = vpop.f32.mrf.mxu2  ;;  %v1439_v8 = vpop.f32.mrf.mxu3 }
 0x29c   : > { %v1533_v19 = vadd.f32 %v1532_v63, %v1426_v7  ;;  %v1546_v20 = vadd.f32 %v1545_v0, %v1439_v8  ;;  %v5773_v63 = vor.u32 %v6907_v62, %v5772_v61  ;;  %v5764_v0 = vld [vmem:[#allocation7 + $0x30] sm:$0xf]  ;;  %v6901_v7 = vld [vmem:[#allocation7 + $0x14] sm:$0xf0]  ;;  %v6918_v61 = vld [vmem:[#allocation9 + $0x20] sm:$0xff] }
 0x29d   : > { %v5765_v2 = vor.u32 %v6905_v1, %v5764_v0  ;;  %v5749_v13 = vor.u32 %v6901_v7, %v5748_v6  ;;  %v6926_v62 = vld [vmem:[#allocation9 + $0x60] sm:$0xff]  ;;  %v6941_v0 = vld [vmem:[#allocation9 + $0xd8] sm:$0xff]  ;;  %v6932_v1 = vld [vmem:[#allocation9 + $0x90] sm:$0xff] }
 0x29e   : > { %v6930_v6 = vld [vmem:[#allocation9 + $0x80] sm:$0xff]  ;;  %v6953_v7 = vld [vmem:[#allocation9 + $0x138] sm:$0xff] }
 0x2a3   : > { %v1428_v14 = vpop.f32.mrf.mxu2  ;;  %v1441_v15 = vpop.f32.mrf.mxu3 }
 0x2ab   : > { %v1658_v25 = vpop.f32.mrf.mxu2  ;;  %v1671_v26 = vpop.f32.mrf.mxu3 }
 0x2ac   : > { %v1675_v27 = vadd.f32 %v1658_v25, %v1533_v19  ;;  %v1676_v28 = vadd.f32 %v1671_v26, %v1546_v20  ;;  %v1883_v20 = vld [vmem:[%s8406_s9] sm:$0xf]  ;;  %v5782_v25 = vld [vmem:[#allocation7 + $0x58] sm:$0xf0] }
 0x2ad   : > { %v5785_v26 = vor.u32 %v6908_v24, %v5782_v25  ;;  %v6914_v24 = vld [vmem:[#allocation9] sm:$0xff] }
 0x2ae   : > { %v1683_v29 = vadd.f32 %v1679_v21, %v1675_v27  ;;  %v1684_v30 = vadd.f32 %v1680_v22, %v1676_v28  ;;  %v5793_v21 = vor.u32 %v6910_v17, %v5790_v18  ;;  %v6906_v27 = vld [vmem:[#allocation7 + $0x44] sm:$0xf]  ;;  %v5774_v28 = vld [vmem:[#allocation7 + $0x48] sm:$0xf0] }
 0x2af   : > { %v6950_v17 = vld [vmem:[#allocation9 + $0x120] sm:$0xff] }
 0x2b0   : > { %v1685_v33 = vmax.f32 %v1683_v29, 0.0  ;;  %v1686_v34 = vmax.f32 %v1684_v30, 0.0  ;;  %v5777_v29 = vor.u32 %v6906_v27, %v5774_v28  ;;  %v6904_v30 = vld [vmem:[#allocation7 + $0x34] sm:$0xf]  ;;  %v6938_v18 = vld [vmem:[#allocation9 + $0xc0] sm:$0xff]  ;;  %v6959_v27 = vld [vmem:[#allocation9 + $0x168] sm:$0xff] }
 0x2b1   : > { %v5769_v32 = vor.u32 %v6904_v30, %v5766_v31  ;;  %v6922_v25 = vld [vmem:[#allocation9 + $0x40] sm:$0xff]  ;;  %v6947_v28 = vld [vmem:[#allocation9 + $0x108] sm:$0xff]  ;;  %v6957_v31 = vld [vmem:[#allocation9 + $0x158] sm:$0xff] }
 0x2b2   : > { %v1688_v35 = vpack.c.bf16 %v1685_v33, %v1685_v33  ;;  %v1689_v36 = vpack.c.bf16 %v1686_v34, %v1686_v34  ;;  %v6902_v33 = vld [vmem:[#allocation7 + $0x24] sm:$0xf]  ;;  %v5758_v34 = vld [vmem:[#allocation7 + $0x28] sm:$0xf0] }
 0x2b3   : > { %v1660_v37 = vpop.f32.mrf.mxu2  ;;  %v1673_v38 = vpop.f32.mrf.mxu3  ;;  %v6946_v30 = vld [vmem:[#allocation9 + $0x100] sm:$0xff] }
 0x2b4   : > { %v1696_v39 = vsel %vm1694_vm10, %v1688_v35, 0  ;;  %v1699_v40 = vsel %vm1694_vm10, %v1689_v36, 0  ;;  %v5761_v35 = vor.u32 %v6902_v33, %v5758_v34  ;;  %v6900_v36 = vld [vmem:[#allocation7 + $0x14] sm:$0xf]  ;;  %v5750_v37 = vld [vmem:[#allocation7 + $0x18] sm:$0xf0] }
 0x2b5   : > { %1708 = vmatpush.bf16.msra.mxu0 %v1696_v39  ;;  %1721 = vmatpush.bf16.msra.mxu1 %v1699_v40  ;;  %v5753_v38 = vor.u32 %v6900_v36, %v5750_v37  ;;  %v5740_v39 = vld [vmem:[#allocation7] sm:$0xf]  ;;  %v6899_v40 = vld [vmem:[#allocation7 + $0x4] sm:$0xf0] }
 0x2b6   : > { %v5741_v42 = vor.u32 %v6899_v40, %v5740_v39  ;;  %v6955_v33 = vld [vmem:[#allocation9 + $0x148] sm:$0xff]  ;;  %v6954_v34 = vld [vmem:[#allocation9 + $0x140] sm:$0xff] }
 0x2b8   : > { %5671 = vmatmul.msk.bf16.vlgmr.msra.gmra.mxu0 %vm1690_vm11, %v1687_v41  ;;  %5672 = vmatmul.msk.bf16.vlgmr.msra.gmra.mxu1 %vm1690_vm11, %v1687_v41  ;;  %v6898_v41 = vld [vmem:[#allocation7 + $0x4] sm:$0xf] }
 0x2b9   : > { %2003 = vmatpush.bf16.msrb.mxu1 %v5797_v53  ;;  %v6928_v53 = vld [vmem:[#allocation9 + $0x70] sm:$0xff] }
 0x2bd   : > { %2004 = vmatpush.bf16.msrb.mxu1 %v5789_v57  ;;  %v6919_v57 = vld [vmem:[#allocation9 + $0x28] sm:$0xff] }
 0x2c1   : > { %2005 = vmatpush.bf16.msrb.mxu1 %v5781_v60  ;;  %v6942_v60 = vld [vmem:[#allocation9 + $0xe0] sm:$0xff] }
 0x2c5   : > { %2006 = vmatpush.bf16.msrb.mxu1 %v5773_v63  ;;  %v6933_v63 = vld [vmem:[#allocation9 + $0x98] sm:$0xff] }
 0x2c9   : > { %2007 = vmatpush.bf16.msrb.mxu1 %v5765_v2  ;;  %v6940_v2 = vld [vmem:[#allocation9 + $0xd0] sm:$0xff] }
 0x2cd   : > { %2008 = vmatpush.bf16.msrb.mxu1 %v5757_v5 }
 0x2d1   : > { %2009 = vmatpush.bf16.msrb.mxu1 %v5749_v13  ;;  %v6951_v13 = vld [vmem:[#allocation9 + $0x128] sm:$0xff] }
 0x2d5   : > { %2010 = vmatpush.bf16.msrb.mxu1 %v5741_v42 }
 0x335   : > { %v1710_v44 = vpop.f32.mrf.mxu0  ;;  %v1723_v45 = vpop.f32.mrf.mxu1 }
 0x336   : > { %v1727_v47 = vpack.c.bf16 %v1710_v44, %v1710_v44  ;;  %v1728_v48 = vpack.c.bf16 %v1723_v45, %v1723_v45  ;;  %v5745_v44 = vor.u32 %v6898_v41, %v5742_v43  ;;  %v6937_v45 = vld [vmem:[#allocation9 + $0xb8] sm:$0xff] }
 0x337   : > { %2232 = vmatpush.bf16.msrb.mxu2 %v6937_v45 }
 0x338   : > { %1865 = vmatmul.bf16.vlgmr.msra.gmra.mxu2 %v1727_v47  ;;  %1878 = vmatmul.bf16.vlgmr.msra.gmra.mxu3 %v1728_v48  ;;  %v6945_v47 = vld [vmem:[#allocation9 + $0xf8] sm:$0xff]  ;;  %v6936_v48 = vld [vmem:[#allocation9 + $0xb0] sm:$0xff] }
 0x339   : > { %2245 = vmatpush.bf16.msrb.mxu3 %v6945_v47 }
 0x33b   : > { %2233 = vmatpush.bf16.msrb.mxu2 %v6936_v48 }
 0x33d   : > { %v1712_v49 = vpop.f32.mrf.mxu0  ;;  %v1725_v50 = vpop.f32.mrf.mxu1 }
 0x33e   : > { %v6921_v49 = vld [vmem:[#allocation9 + $0x38] sm:$0xff]  ;;  %v6944_v50 = vld [vmem:[#allocation9 + $0xf0] sm:$0xff] }
 0x33f   : > { %2354 = vmatpush.bf16.msra.mxu1 %v6921_v49  ;;  %2246 = vmatpush.bf16.msrb.mxu3 %v6944_v50 }
 0x340   : > { %2234 = vmatpush.bf16.msrb.mxu2 %v6935_v54 }
 0x343   : > { %2355 = vmatpush.bf16.msra.mxu1 %v6920_v52  ;;  %2247 = vmatpush.bf16.msrb.mxu3 %v6943_v56 }
 0x344   : > { %2235 = vmatpush.bf16.msrb.mxu2 %v6934_v59 }
 0x347   : > { %2356 = vmatpush.bf16.msra.mxu1 %v6919_v57  ;;  %2248 = vmatpush.bf16.msrb.mxu3 %v6942_v60 }
 0x348   : > { %2236 = vmatpush.bf16.msrb.mxu2 %v6933_v63 }
 0x34b   : > { %2357 = vmatpush.bf16.msra.mxu1 %v6918_v61  ;;  %2249 = vmatpush.bf16.msrb.mxu3 %v6941_v0 }
 0x34c   : > { %2237 = vmatpush.bf16.msrb.mxu2 %v6932_v1 }
 0x34f   : > { %2250 = vmatpush.bf16.msrb.mxu3 %v6940_v2  ;;  %2358 = vmatpush.bf16.msra.mxu1 %v6917_v11  ;;  %v2702_v2 = vsel %vm1694_vm10, %v8093_v46, 0  ;;  %v6057_v46 = vld [vmem:[#allocation10 + $0x70] sm:$0xf]  ;;  %v6977_v11 = vld [vmem:[#allocation10 + $0x74] sm:$0xf] }
 0x350   : > { %2238 = vmatpush.bf16.msrb.mxu2 %v6931_v3 }
 0x354   : > { %2239 = vmatpush.bf16.msrb.mxu2 %v6930_v6 }
 0x358   : > { %2515 = vmatpush.bf16.msra.mxu2 %v6953_v7 }
 0x3bb   : > { %v1866_v8 = vpop.f32.mrf.mxu2  ;;  %v1879_v9 = vpop.f32.mrf.mxu3 }
 0x3bc   : > { %v1880_v14 = vadd.f32 %v1879_v9, %v1866_v8  ;;  %v6952_v8 = vld [vmem:[#allocation9 + $0x130] sm:$0xff] }
 0x3bd   : > { %2516 = vmatpush.bf16.msra.mxu2 %v6952_v8 }
 0x3be   : > { %v1884_v15 = vpack.c.bf16 %v1880_v14, %v1880_v14  ;;  %v6939_v14 = vld [vmem:[#allocation9 + $0xc8] sm:$0xff] }
 0x3bf   : > { %2251 = vmatpush.bf16.msrb.mxu3 %v6939_v14 }
 0x3c0   : > { %v1891_v19 = vsel %vm1889_vm12, %v1884_v15, 0  ;;  %v6916_v15 = vld [vmem:[#allocation9 + $0x10] sm:$0xff] }
 0x3c1   : > { %1900 = vmatpush.bf16.msrb.mxu0 %v1891_v19  ;;  %2517 = vmatpush.bf16.msra.mxu2 %v6951_v13  ;;  %v6961_v19 = vld [vmem:[#allocation9 + $0x178] sm:$0xff] }
 0x3c2   : > { %2359 = vmatpush.bf16.msra.mxu1 %v6916_v15  ;;  %v6059_v15 = vld [vmem:[#allocation10 + $0x78] sm:$0xf0] }
 0x3c3   : > { %v1868_v22 = vpop.f32.mrf.mxu2  ;;  %v1881_v23 = vpop.f32.mrf.mxu3  ;;  %2252 = vmatpush.bf16.msrb.mxu3 %v6938_v18  ;;  %v8136_v18 = vor.u32 %v6977_v11, %v6059_v15 }
 0x3c4   : > { %5737 = vmatmul.msk.bf16.vlgmr.msrb.gmra.mxu0 %vm1885_vm13, %v1883_v20  ;;  %v6915_v20 = vld [vmem:[#allocation9 + $0x8] sm:$0xff]  ;;  %v6949_v22 = vld [vmem:[#allocation9 + $0x118] sm:$0xff]  ;;  %v6960_v23 = vld [vmem:[#allocation9 + $0x170] sm:$0xff] }
 0x3c5   : > { %2016 = vmatpush.bf16.msra.mxu0 %v5801_v16  ;;  %v6924_v16 = vld [vmem:[#allocation9 + $0x50] sm:$0xff]  ;;  %2518 = vmatpush.bf16.msra.mxu2 %v6950_v17  ;;  %v6976_v17 = vld [vmem:[#allocation10 + $0x64] sm:$0xf0] }
 0x3c6   : > { %2360 = vmatpush.bf16.msra.mxu1 %v6915_v20  ;;  %v6051_v20 = vld [vmem:[#allocation10 + $0x68] sm:$0xf0] }
 0x3c7   : > { %2528 = vmatpush.bf16.msra.mxu3 %v6961_v19  ;;  %v6975_v19 = vld [vmem:[#allocation10 + $0x64] sm:$0xf] }
 0x3c9   : > { %2017 = vmatpush.bf16.msra.mxu0 %v5793_v21  ;;  %v6923_v21 = vld [vmem:[#allocation9 + $0x48] sm:$0xff]  ;;  %2519 = vmatpush.bf16.msra.mxu2 %v6949_v22  ;;  %v8139_v22 = vor.u32 %v6975_v19, %v6051_v20 }
 0x3ca   : > { %2361 = vmatpush.bf16.msra.mxu1 %v6914_v24  ;;  %v6974_v24 = vld [vmem:[#allocation10 + $0x54] sm:$0xf0]  ;;  %v7032_v19 = vld [vmem:[#allocation12 + $0x1a8] sm:$0xff] }
 0x3cb   : > { %2529 = vmatpush.bf16.msra.mxu3 %v6960_v23  ;;  %v6041_v23 = vld [vmem:[#allocation10 + $0x50] sm:$0xf]  ;;  %v7040_v20 = vld [vmem:[#allocation12 + $0x1e8] sm:$0xff] }
 0x3cd   : > { %2018 = vmatpush.bf16.msra.mxu0 %v5785_v26  ;;  %v6948_v26 = vld [vmem:[#allocation9 + $0x110] sm:$0xff] }
 0x3ce   : > { %2520 = vmatpush.bf16.msra.mxu2 %v6948_v26  ;;  %v6043_v26 = vld [vmem:[#allocation10 + $0x58] sm:$0xf0] }
 0x3cf   : > { %2530 = vmatpush.bf16.msra.mxu3 %v6959_v27  ;;  %v6042_v27 = vor.u32 %v6974_v24, %v6041_v23  ;;  %v7030_v23 = vld [vmem:[#allocation12 + $0x198] sm:$0xff] }
 0x3d0   : > { %v7038_v24 = vld [vmem:[#allocation12 + $0x1d8] sm:$0xff] }
 0x3d1   : > { %2019 = vmatpush.bf16.msra.mxu0 %v5777_v29  ;;  %v6958_v29 = vld [vmem:[#allocation9 + $0x160] sm:$0xff] }
 0x3d2   : > { %2521 = vmatpush.bf16.msra.mxu2 %v6947_v28 }
 0x3d3   : > { %2531 = vmatpush.bf16.msra.mxu3 %v6958_v29  ;;  %v6033_v29 = vld [vmem:[#allocation10 + $0x40] sm:$0xf] }
 0x3d5   : > { %2020 = vmatpush.bf16.msra.mxu0 %v5769_v32  ;;  %v6956_v32 = vld [vmem:[#allocation9 + $0x150] sm:$0xff] }
 0x3d6   : > { %2522 = vmatpush.bf16.msra.mxu2 %v6946_v30  ;;  %v6972_v30 = vld [vmem:[#allocation10 + $0x44] sm:$0xf0] }
 0x3d7   : > { %2532 = vmatpush.bf16.msra.mxu3 %v6957_v31 }
 0x3d9   : > { %2021 = vmatpush.bf16.msra.mxu0 %v5761_v35 }
 0x3db   : > { %2533 = vmatpush.bf16.msra.mxu3 %v6956_v32 }
 0x3dd   : > { %2022 = vmatpush.bf16.msra.mxu0 %v5753_v38 }
 0x3df   : > { %2534 = vmatpush.bf16.msra.mxu3 %v6955_v33  ;;  %v6971_v33 = vld [vmem:[#allocation10 + $0x44] sm:$0xf] }
 0x3e1   : > { %2023 = vmatpush.bf16.msra.mxu0 %v5745_v44 }
 0x3e3   : > { %2535 = vmatpush.bf16.msra.mxu3 %v6954_v34  ;;  %v6035_v34 = vld [vmem:[#allocation10 + $0x48] sm:$0xf0] }
 0x3e5   : > { %2367 = vmatpush.bf16.msrb.mxu0 %v6929_v51 }
 0x3e9   : > { %2368 = vmatpush.bf16.msrb.mxu0 %v6928_v53 }
 0x3ed   : > { %2369 = vmatpush.bf16.msrb.mxu0 %v6927_v58 }
 0x3f1   : > { %2370 = vmatpush.bf16.msrb.mxu0 %v6926_v62 }
 0x3f5   : > { %2371 = vmatpush.bf16.msrb.mxu0 %v6925_v12 }
 0x3f9   : > { %2372 = vmatpush.bf16.msrb.mxu0 %v6924_v16  ;;  %v6049_v16 = vld [vmem:[#allocation10 + $0x60] sm:$0xf] }
 0x3fd   : > { %2373 = vmatpush.bf16.msrb.mxu0 %v6923_v21  ;;  %v6050_v21 = vor.u32 %v6976_v17, %v6049_v16  ;;  %v7034_v16 = vld [vmem:[#allocation12 + $0x1b8] sm:$0xff] }
 0x3fe   : > { %v7042_v17 = vld [vmem:[#allocation12 + $0x1f8] sm:$0xff] }
 0x401   : > { %2374 = vmatpush.bf16.msrb.mxu0 %v6922_v25  ;;  %v6973_v25 = vld [vmem:[#allocation10 + $0x54] sm:$0xf] }
 0x402   : > { %v8142_v28 = vor.u32 %v6973_v25, %v6043_v26  ;;  %v7029_v25 = vld [vmem:[#allocation12 + $0x190] sm:$0xff] }
 0x403   : > { %v7037_v26 = vld [vmem:[#allocation12 + $0x1d0] sm:$0xff] }
 0x441   : > { %v1902_v4 = vpop.f32.mrf.mxu0 }
 0x442   : > { %v1906_v5 = vpack.c.bf16 %v1902_v4, %v1902_v4 }
 0x444   : > { %2011 = vmatmul.bf16.vlgmr.msrb.gmra.mxu1 %v1906_v5  ;;  %2024 = vmatmul.bf16.vlgmr.msra.gmra.mxu0 %v1906_v5 }
 0x449   : > { %v1904_v9 = vpop.f32.mrf.mxu0 }
 0x44a   : > { %v6978_v9 = vld [vmem:[#allocation10 + $0x74] sm:$0xf0] }
 0x44b   : > { %v6058_v14 = vor.u32 %v6978_v9, %v6057_v46 }
 0x44d   : > { %2673 = vmatpush.bf16.msra.mxu0 %v6058_v14 }
 0x451   : > { %2674 = vmatpush.bf16.msra.mxu0 %v6050_v21 }
 0x455   : > { %2675 = vmatpush.bf16.msra.mxu0 %v6042_v27 }
 0x4c1   : > { %v2012_v35 = vpop.f32.mrf.mxu1  ;;  %v2025_v36 = vpop.f32.mrf.mxu0 }
 0x4c2   : > { %v2029_v37 = vpack.c.bf16 %v2025_v36, %v2012_v35  ;;  %v6034_v36 = vor.u32 %v6972_v30, %v6033_v29  ;;  %v7036_v29 = vld [vmem:[#allocation12 + $0x1c8] sm:$0xff]  ;;  %v7027_v30 = vld [vmem:[#allocation12 + $0x180] sm:$0xff] }
 0x4c4   : > { %v2031_v38 = vunpack.c.l.b16 %v2029_v37  ;;  %v2032_v39 = vunpack.c.h.b16 %v2029_v37  ;;  %v6038_v37 = vor.u32 %v6971_v33, %v6035_v34  ;;  %2676 = vmatpush.bf16.msra.mxu0 %v6034_v36  ;;  %v7010_v33 = vld [vmem:[#allocation12 + $0xf8] sm:$0xff] }
 0x4c6   : > { %v2033_v40 = vpack.c.b16 %v2031_v38, %v2031_v38  ;;  %v2034_v41 = vpack.c.b16 %v2032_v39, %v2032_v39  ;;  %v6025_v38 = vld [vmem:[#allocation10 + $0x30] sm:$0xf]  ;;  %v6970_v39 = vld [vmem:[#allocation10 + $0x34] sm:$0xf0] }
 0x4c8   : > { %v2036_v42 = vshrl.u32 %v2033_v40, 16  ;;  %v2043_v43 = vshrl.u32 %v2034_v41, 16  ;;  %v2039_v48 = vshll.u32 %v2033_v40, 16  ;;  %v2046_v50 = vshll.u32 %v2034_v41, 16  ;;  %v6969_v40 = vld [vmem:[#allocation10 + $0x34] sm:$0xf] }
 0x4c9   : > { %v2014_v44 = vpop.f32.mrf.mxu1  ;;  %v2027_v45 = vpop.f32.mrf.mxu0  ;;  %v6027_v41 = vld [vmem:[#allocation10 + $0x38] sm:$0xf0] }
 0x4ca   : > { %v2038_v47 = vrot.slane %v2036_v42, 7  ;;  %v2045_v49 = vrot.slane %v2043_v43, 7  ;;  %v6026_v43 = vor.u32 %v6970_v39, %v6025_v38  ;;  %v6030_v44 = vor.u32 %v6969_v40, %v6027_v41  ;;  %v6017_v45 = vld [vmem:[#allocation10 + $0x20] sm:$0xf]  ;;  %v7009_v38 = vld [vmem:[#allocation12 + $0xf0] sm:$0xff]  ;;  %v7026_v39 = vld [vmem:[#allocation12 + $0x178] sm:$0xff] }
 0x4cb   : > { %v7017_v40 = vld [vmem:[#allocation12 + $0x130] sm:$0xff] }
 0x4cc   : > { %v2041_v51 = vor.u32 %v2039_v48, %v2038_v47  ;;  %v2048_v52 = vor.u32 %v2046_v50, %v2045_v49  ;;  %v6968_v47 = vld [vmem:[#allocation10 + $0x24] sm:$0xf0]  ;;  %v6967_v50 = vld [vmem:[#allocation10 + $0x24] sm:$0xf]  ;;  %2677 = vmatpush.bf16.msra.mxu0 %v6026_v43  ;;  %v7025_v41 = vld [vmem:[#allocation12 + $0x170] sm:$0xff] }
 0x4ce   : > { %v2051_v53 = vsel %vm7783_vm2, 0, %v2041_v51  ;;  %v2052_v54 = vsel %vm7783_vm2, 0, %v2048_v52  ;;  %v6019_v51 = vld [vmem:[#allocation10 + $0x28] sm:$0xf0] }
 0x4cf   : > { %v2053_v56 = vsel %vm8097_vm9, %v2051_v53, 0  ;;  %v2054_v57 = vsel %vm8097_vm9, %v2052_v54, 0  ;;  %v7257_v54 = vld [vmem:[%s8409_s12] ss:$0 sm:$0xff] }
 0x4d0   : > { %v2123_v58 = vshll.u32 %v2053_v56, 16  ;;  %2362 = vmatmul.bf16.vlgmr.msra.gmra.mxu1 %v2053_v56  ;;  %v2130_v59 = vshll.u32 %v2054_v57, 16  ;;  %2375 = vmatmul.bf16.vlgmr.msrb.gmra.mxu0 %v2054_v57  ;;  %v2121_v60 = vshrl.u32 %v2053_v56, 16  ;;  %v2128_v62 = vshrl.u32 %v2054_v57, 16 }
 0x4d1   : > { %v2415_v3 = vrot.slane %v2053_v56, 1  ;;  %v2416_v4 = vrot.slane %v2054_v57, 1  ;;  %v6018_v56 = vor.u32 %v6968_v47, %v6017_v45  ;;  %v7024_v45 = vld [vmem:[#allocation12 + $0x168] sm:$0xff] }
 0x4d2   : > { %v2125_v61 = vrot.slane %v2123_v58, 1  ;;  %v2132_v63 = vrot.slane %v2130_v59, 1  ;;  %v6022_v58 = vor.u32 %v6967_v50, %v6019_v51  ;;  %v6009_v59 = vld [vmem:[#allocation10 + $0x10] sm:$0xf]  ;;  %v7007_v50 = vld [vmem:[#allocation12 + $0xe0] sm:$0xff] }
 0x4d3   : > { %2678 = vmatpush.bf16.msra.mxu0 %v6018_v56  ;;  %v7015_v51 = vld [vmem:[#allocation12 + $0x120] sm:$0xff] }
 0x4d4   : > { %v2126_v0 = vor.u32 %v2125_v61, %v2121_v60  ;;  %v2133_v1 = vor.u32 %v2132_v63, %v2128_v62  ;;  %v6966_v60 = vld [vmem:[#allocation10 + $0x14] sm:$0xf0]  ;;  %v6965_v61 = vld [vmem:[#allocation10 + $0x14] sm:$0xf]  ;;  %v6011_v62 = vld [vmem:[#allocation10 + $0x18] sm:$0xf0] }
 0x4d6   : > { %2240 = vmatmul.bf16.vlgmr.msrb.gmra.mxu2 %v2126_v0  ;;  %2253 = vmatmul.bf16.vlgmr.msrb.gmra.mxu3 %v2133_v1  ;;  %v6010_v0 = vor.u32 %v6966_v60, %v6009_v59 }
 0x4d7   : > { %2711 = vmatpush.bf16.msrb.mxu2 %v2702_v2  ;;  %2719 = vmatpush.bf16.msrb.mxu3 %v6058_v14  ;;  %v6014_v2 = vor.u32 %v6965_v61, %v6011_v62  ;;  %v6997_v61 = vld [vmem:[#allocation12 + $0x90] sm:$0xff] }
 0x4d8   : > { %2679 = vmatpush.bf16.msra.mxu0 %v6010_v0  ;;  %v7005_v62 = vld [vmem:[#allocation12 + $0xd0] sm:$0xff] }
 0x4db   : > { %2720 = vmatpush.bf16.msrb.mxu3 %v6050_v21  ;;  %v7031_v21 = vld [vmem:[#allocation12 + $0x1a0] sm:$0xff] }
 0x4df   : > { %2721 = vmatpush.bf16.msrb.mxu3 %v6042_v27 }
 0x4e3   : > { %2722 = vmatpush.bf16.msrb.mxu3 %v6034_v36  ;;  %v7018_v36 = vld [vmem:[#allocation12 + $0x138] sm:$0xff] }
 0x4e6   : > { %2523 = vmatmul.bf16.vlgmr.msra.gmra.mxu2 %v2415_v3  ;;  %2536 = vmatmul.bf16.vlgmr.msra.gmra.mxu3 %v2416_v4  ;;  %v6001_v3 = vld [vmem:[#allocation10] sm:$0xf]  ;;  %v6964_v4 = vld [vmem:[#allocation10 + $0x4] sm:$0xf0] }
 0x4e7   : > { %2733 = vmatpush.bf16.msra.mxu2 %v8136_v18  ;;  %2723 = vmatpush.bf16.msrb.mxu3 %v6026_v43  ;;  %v6002_v9 = vor.u32 %v6964_v4, %v6001_v3  ;;  %v7008_v43 = vld [vmem:[#allocation12 + $0xe8] sm:$0xff]  ;;  %v7013_v4 = vld [vmem:[#allocation12 + $0x110] sm:$0xff] }
 0x4e9   : > { %2680 = vmatpush.bf16.msra.mxu0 %v6002_v9 }
 0x4eb   : > { %2734 = vmatpush.bf16.msra.mxu2 %v8139_v22  ;;  %2724 = vmatpush.bf16.msrb.mxu3 %v6018_v56 }
 0x4ed   : > { %3184 = vmatpush.bf16.msrb.mxu0 %v7018_v36  ;;  %v7066_v36 = vld [vmem:[#allocation12 + $0x2b8] sm:$0xff] }
 0x4ef   : > { %2735 = vmatpush.bf16.msra.mxu2 %v8142_v28  ;;  %2725 = vmatpush.bf16.msrb.mxu3 %v6010_v0 }
 0x4f1   : > { %3185 = vmatpush.bf16.msrb.mxu0 %v7017_v40 }
 0x4f3   : > { %2736 = vmatpush.bf16.msra.mxu2 %v6038_v37  ;;  %2726 = vmatpush.bf16.msrb.mxu3 %v6002_v9 }
 0x4f6   : > { %6063 = vmatmul.msk.bf16.vlgmr.msrb.gmra.mxu2 %vm1690_vm11, %v8132_v55 }
 0x4f7   : > { %2737 = vmatpush.bf16.msra.mxu2 %v6030_v44  ;;  %3212 = vmatpush.bf16.msra.mxu3 %v7034_v16  ;;  %v6995_v16 = vld [vmem:[#allocation12 + $0x80] sm:$0xff] }
 0x4fb   : > { %2738 = vmatpush.bf16.msra.mxu2 %v6022_v58 }
 0x4ff   : > { %2739 = vmatpush.bf16.msra.mxu2 %v6014_v2 }
 0x54d   : > { %v2363_v5 = vpop.f32.mrf.mxu1  ;;  %v2376_v6 = vpop.f32.mrf.mxu0 }
 0x555   : > { %v2365_v7 = vpop.f32.mrf.mxu1  ;;  %v2378_v8 = vpop.f32.mrf.mxu0 }
 0x556   : > { %v6963_v7 = vld [vmem:[#allocation10 + $0x4] sm:$0xf]  ;;  %v6003_v8 = vld [vmem:[#allocation10 + $0x8] sm:$0xf0] }
 0x559   : > { %v2241_v12 = vpop.f32.mrf.mxu2  ;;  %v2254_v13 = vpop.f32.mrf.mxu3 }
 0x55a   : > { %v2255_v35 = vadd.f32 %v2254_v13, %v2241_v12  ;;  %v6006_v12 = vor.u32 %v6963_v7, %v6003_v8  ;;  %v7004_v7 = vld [vmem:[#allocation12 + $0xc8] sm:$0xff] }
 0x55c   : > { %v2364_v42 = vadd.f32 %v2363_v5, %v2255_v35  ;;  %2740 = vmatpush.bf16.msra.mxu2 %v6006_v12 }
 0x55e   : > { %v2377_v52 = vadd.f32 %v2376_v6, %v2364_v42  ;;  %v7000_v42 = vld [vmem:[#allocation12 + $0xa8] sm:$0xff] }
 0x560   : > { %3226 = vmatpush.bf16.msrb.mxu2 %v7042_v17  ;;  %v7003_v17 = vld [vmem:[#allocation12 + $0xc0] sm:$0xff] }
 0x561   : > { %v2243_v31 = vpop.f32.mrf.mxu2  ;;  %v2256_v32 = vpop.f32.mrf.mxu3 }
 0x562   : > { %v7035_v31 = vld [vmem:[#allocation12 + $0x1c0] sm:$0xff]  ;;  %v7002_v32 = vld [vmem:[#allocation12 + $0xb8] sm:$0xff] }
 0x569   : > { %v2524_v48 = vpop.f32.mrf.mxu2  ;;  %v2537_v49 = vpop.f32.mrf.mxu3 }
 0x56a   : > { %v2538_v53 = vadd.f32 %v2537_v49, %v2524_v48  ;;  %v6999_v49 = vld [vmem:[#allocation12 + $0xa0] sm:$0xff] }
 0x56c   : > { %v2541_v57 = vadd.f32 %v2538_v53, %v2377_v52  ;;  %v7023_v52 = vld [vmem:[#allocation12 + $0x160] sm:$0xff]  ;;  %v6998_v53 = vld [vmem:[#allocation12 + $0x98] sm:$0xff] }
 0x56e   : > { %v2546_v63 = vadd.f32 %v7257_v54, %v2541_v57  ;;  %v7006_v54 = vld [vmem:[#allocation12 + $0xd8] sm:$0xff] }
 0x56f   : > { %v7014_v57 = vld [vmem:[#allocation12 + $0x118] sm:$0xff] }
 0x570   : > { %v2547_v1 = vmax.f32 %v2546_v63, 0.0 }
 0x571   : > { %v2526_v5 = vpop.f32.mrf.mxu2  ;;  %v2539_v6 = vpop.f32.mrf.mxu3 }
 0x572   : > { %v2550_v46 = vpack.c.bf16 %v2547_v1, %v2547_v1  ;;  %v7021_v5 = vld [vmem:[#allocation12 + $0x150] sm:$0xff]  ;;  %v6996_v6 = vld [vmem:[#allocation12 + $0x88] sm:$0xff] }
 0x574   : > { %v2560_v11 = vsel %vm1694_vm10, %v2550_v46, 0 }
 0x575   : > { %2569 = vmatpush.bf16.msrb.mxu1 %v2560_v11 }
 0x578   : > { %5998 = vmatmul.msk.bf16.vlgmr.msrb.gmra.mxu1 %vm1690_vm11, %v8132_v55  ;;  %v7033_v55 = vld [vmem:[#allocation12 + $0x1b0] sm:$0xff] }
 0x579   : > { %2687 = vmatpush.bf16.msra.mxu1 %v8136_v18  ;;  %v2713_v13 = vpop.f32.mrf.mxu2  ;;  %v7041_v18 = vld [vmem:[#allocation12 + $0x1f0] sm:$0xff]  ;;  %3213 = vmatpush.bf16.msra.mxu3 %v7033_v55 }
 0x57a   : > { %3227 = vmatpush.bf16.msrb.mxu2 %v7041_v18 }
 0x57d   : > { %2688 = vmatpush.bf16.msra.mxu1 %v8139_v22  ;;  %3214 = vmatpush.bf16.msra.mxu3 %v7032_v19  ;;  %v7039_v22 = vld [vmem:[#allocation12 + $0x1e0] sm:$0xff] }
 0x57e   : > { %3228 = vmatpush.bf16.msrb.mxu2 %v7040_v20 }
 0x581   : > { %2689 = vmatpush.bf16.msra.mxu1 %v8142_v28  ;;  %v2715_v14 = vpop.f32.mrf.mxu2  ;;  %3215 = vmatpush.bf16.msra.mxu3 %v7031_v21  ;;  %v7028_v28 = vld [vmem:[#allocation12 + $0x188] sm:$0xff] }
 0x582   : > { %v2718_v15 = vpack.c.bf16 %v2715_v14, %v2713_v13  ;;  %3229 = vmatpush.bf16.msrb.mxu2 %v7039_v22  ;;  %v7012_v14 = vld [vmem:[#allocation12 + $0x108] sm:$0xff] }
 0x584   : > { %2727 = vmatmul.bf16.vlgmr.msrb.gmra.mxu3 %v2718_v15  ;;  %2741 = vmatmul.bf16.vlgmr.msra.gmra.mxu2 %v2718_v15  ;;  %v7020_v15 = vld [vmem:[#allocation12 + $0x148] sm:$0xff] }
 0x585   : > { %2690 = vmatpush.bf16.msra.mxu1 %v6038_v37  ;;  %3216 = vmatpush.bf16.msra.mxu3 %v7030_v23  ;;  %v7001_v37 = vld [vmem:[#allocation12 + $0xb0] sm:$0xff] }
 0x586   : > { %3230 = vmatpush.bf16.msrb.mxu2 %v7038_v24 }
 0x589   : > { %2691 = vmatpush.bf16.msra.mxu1 %v6030_v44  ;;  %3217 = vmatpush.bf16.msra.mxu3 %v7029_v25  ;;  %v7016_v44 = vld [vmem:[#allocation12 + $0x128] sm:$0xff] }
 0x58a   : > { %3231 = vmatpush.bf16.msrb.mxu2 %v7037_v26  ;;  %3186 = vmatpush.bf16.msrb.mxu0 %v7016_v44  ;;  %v7072_v44 = vld [vmem:[#allocation12 + $0x2e8] sm:$0xff] }
 0x58d   : > { %2692 = vmatpush.bf16.msra.mxu1 %v6022_v58  ;;  %3218 = vmatpush.bf16.msra.mxu3 %v7028_v28  ;;  %v7022_v58 = vld [vmem:[#allocation12 + $0x158] sm:$0xff] }
 0x58e   : > { %3232 = vmatpush.bf16.msrb.mxu2 %v7036_v29  ;;  %3187 = vmatpush.bf16.msrb.mxu0 %v7015_v51  ;;  %v7069_v51 = vld [vmem:[#allocation12 + $0x2d0] sm:$0xff] }
 0x591   : > { %2693 = vmatpush.bf16.msra.mxu1 %v6014_v2  ;;  %3219 = vmatpush.bf16.msra.mxu3 %v7027_v30 }
 0x592   : > { %3233 = vmatpush.bf16.msrb.mxu2 %v7035_v31  ;;  %3188 = vmatpush.bf16.msrb.mxu0 %v7014_v57 }
 0x595   : > { %2694 = vmatpush.bf16.msra.mxu1 %v6006_v12  ;;  %3460 = vmatpush.bf16.msrb.mxu3 %v7002_v32 }
 0x596   : > { %3474 = vmatpush.bf16.msra.mxu2 %v7010_v33  ;;  %3189 = vmatpush.bf16.msrb.mxu0 %v7013_v4  ;;  %v6993_v4 = vld [vmem:[#allocation12 + $0x70] sm:$0xff] }
 0x599   : > { %3198 = vmatpush.bf16.msrb.mxu1 %v7026_v39  ;;  %3461 = vmatpush.bf16.msrb.mxu3 %v7001_v37 }
 0x59a   : > { %3475 = vmatpush.bf16.msra.mxu2 %v7009_v38  ;;  %3190 = vmatpush.bf16.msrb.mxu0 %v7012_v14  ;;  %v7074_v38 = vld [vmem:[#allocation12 + $0x2f8] sm:$0xff]  ;;  %v6988_v14 = vld [vmem:[#allocation12 + $0x48] sm:$0xff] }
 0x59d   : > { %3199 = vmatpush.bf16.msrb.mxu1 %v7025_v41  ;;  %3462 = vmatpush.bf16.msrb.mxu3 %v7000_v42  ;;  %v7065_v41 = vld [vmem:[#allocation12 + $0x2b0] sm:$0xff] }
 0x59e   : > { %3476 = vmatpush.bf16.msra.mxu2 %v7008_v43  ;;  %v7073_v42 = vld [vmem:[#allocation12 + $0x2f0] sm:$0xff]  ;;  %v7064_v43 = vld [vmem:[#allocation12 + $0x2a8] sm:$0xff] }
 0x5a1   : > { %3200 = vmatpush.bf16.msrb.mxu1 %v7024_v45  ;;  %3463 = vmatpush.bf16.msrb.mxu3 %v6999_v49  ;;  %v7063_v45 = vld [vmem:[#allocation12 + $0x2a0] sm:$0xff]  ;;  %v7070_v49 = vld [vmem:[#allocation12 + $0x2d8] sm:$0xff] }
 0x5a2   : > { %3477 = vmatpush.bf16.msra.mxu2 %v7007_v50  ;;  %v7061_v50 = vld [vmem:[#allocation12 + $0x290] sm:$0xff] }
 0x5a5   : > { %3201 = vmatpush.bf16.msrb.mxu1 %v7023_v52  ;;  %3464 = vmatpush.bf16.msrb.mxu3 %v6998_v53  ;;  %v7060_v52 = vld [vmem:[#allocation12 + $0x288] sm:$0xff] }
 0x5a6   : > { %3478 = vmatpush.bf16.msra.mxu2 %v7006_v54  ;;  %v7068_v53 = vld [vmem:[#allocation12 + $0x2c8] sm:$0xff]  ;;  %v7059_v54 = vld [vmem:[#allocation12 + $0x280] sm:$0xff] }
 0x5a9   : > { %3202 = vmatpush.bf16.msrb.mxu1 %v7022_v58  ;;  %3465 = vmatpush.bf16.msrb.mxu3 %v6997_v61 }
 0x5aa   : > { %3479 = vmatpush.bf16.msra.mxu2 %v7005_v62 }
 0x5ad   : > { %3203 = vmatpush.bf16.msrb.mxu1 %v7021_v5  ;;  %3466 = vmatpush.bf16.msrb.mxu3 %v6996_v6  ;;  %v6984_v5 = vld [vmem:[#allocation12 + $0x28] sm:$0xff] }
 0x5ae   : > { %3480 = vmatpush.bf16.msra.mxu2 %v7004_v7  ;;  %v6992_v6 = vld [vmem:[#allocation12 + $0x68] sm:$0xff]  ;;  %v6983_v7 = vld [vmem:[#allocation12 + $0x20] sm:$0xff] }
 0x5b1   : > { %3204 = vmatpush.bf16.msrb.mxu1 %v7020_v15  ;;  %3467 = vmatpush.bf16.msrb.mxu3 %v6995_v16  ;;  %v6979_v15 = vld [vmem:[#allocation12] sm:$0xff] }
 0x5b2   : > { %3481 = vmatpush.bf16.msra.mxu2 %v7003_v17  ;;  %v6987_v16 = vld [vmem:[#allocation12 + $0x40] sm:$0xff] }
 0x5f5   : > { %v2571_v27 = vpop.f32.mrf.mxu1 }
 0x5fd   : > { %v2573_v34 = vpop.f32.mrf.mxu1 }
 0x5fe   : > { %v2576_v35 = vpack.c.bf16 %v2573_v34, %v2571_v27 }
 0x600   : > { %2681 = vmatmul.bf16.vlgmr.msra.gmra.mxu0 %v2576_v35  ;;  %2695 = vmatmul.bf16.vlgmr.msra.gmra.mxu1 %v2576_v35 }
 0x607   : > { %v2728_v47 = vpop.f32.mrf.mxu3  ;;  %v2742_v48 = vpop.f32.mrf.mxu2 }
 0x608   : > { %v2748_v56 = vpack.c.bf16 %v2742_v48, %v2728_v47  ;;  %v7071_v47 = vld [vmem:[#allocation12 + $0x2e0] sm:$0xff]  ;;  %v7062_v48 = vld [vmem:[#allocation12 + $0x298] sm:$0xff] }
 0x60a   : > { %v2757_v63 = vunpack.c.l.b16 %v2748_v56  ;;  %v2758_v0 = vunpack.c.h.b16 %v2748_v56  ;;  %v7067_v56 = vld [vmem:[#allocation12 + $0x2c0] sm:$0xff] }
 0x60f   : > { %v2730_v59 = vpop.f32.mrf.mxu3  ;;  %v2744_v60 = vpop.f32.mrf.mxu2 }
 0x610   : > { %v2750_v1 = vpack.c.bf16 %v2744_v60, %v2730_v59 }
 0x612   : > { %v2761_v2 = vunpack.c.l.b16 %v2750_v1  ;;  %v2762_v3 = vunpack.c.h.b16 %v2750_v1  ;;  %v6986_v1 = vld [vmem:[#allocation12 + $0x38] sm:$0xff] }
 0x614   : > { %v2765_v8 = vpack.c.b16 %v2761_v2, %v2757_v63  ;;  %v2766_v46 = vpack.c.b16 %v2762_v3, %v2758_v0  ;;  %v7011_v63 = vld [vmem:[#allocation12 + $0x100] sm:$0xff]  ;;  %v6994_v2 = vld [vmem:[#allocation12 + $0x78] sm:$0xff]  ;;  %v6985_v3 = vld [vmem:[#allocation12 + $0x30] sm:$0xff] }
 0x615   : > { %v7019_v0 = vld [vmem:[#allocation12 + $0x140] sm:$0xff]  ;;  %3191 = vmatpush.bf16.msrb.mxu0 %v7011_v63  ;;  %v7046_v63 = vld [vmem:[#allocation12 + $0x218] sm:$0xff] }
 0x616   : > { %v2782_v9 = vshrl.u32 %v2765_v8, 16  ;;  %v2785_v11 = vshll.u32 %v2765_v8, 16  ;;  %v2789_v12 = vshrl.u32 %v2766_v46, 16  ;;  %v2792_v13 = vshll.u32 %v2766_v46, 16  ;;  %3205 = vmatpush.bf16.msrb.mxu1 %v7019_v0  ;;  %v6991_v8 = vld [vmem:[#allocation12 + $0x60] sm:$0xff]  ;;  %v6982_v46 = vld [vmem:[#allocation12 + $0x18] sm:$0xff] }
 0x617   : > { %v7054_v0 = vld [vmem:[#allocation12 + $0x258] sm:$0xff] }
 0x618   : > { %v2784_v55 = vrot.slane %v2782_v9, 7  ;;  %v2791_v18 = vrot.slane %v2789_v12, 7  ;;  %v6990_v9 = vld [vmem:[#allocation12 + $0x58] sm:$0xff]  ;;  %v6989_v12 = vld [vmem:[#allocation12 + $0x50] sm:$0xff] }
 0x619   : > { %3432 = vmatpush.bf16.msra.mxu0 %v6986_v1  ;;  %v7045_v1 = vld [vmem:[#allocation12 + $0x210] sm:$0xff] }
 0x61a   : > { %v2787_v19 = vor.u32 %v2785_v11, %v2784_v55  ;;  %v2794_v20 = vor.u32 %v2792_v13, %v2791_v18  ;;  %v2809_v21 = vsel %vm7783_vm2, %v2784_v55, 0  ;;  %v2810_v22 = vsel %vm7783_vm2, %v2791_v18, 0  ;;  %3446 = vmatpush.bf16.msra.mxu1 %v6994_v2  ;;  %v6981_v11 = vld [vmem:[#allocation12 + $0x10] sm:$0xff]  ;;  %v6980_v13 = vld [vmem:[#allocation12 + $0x8] sm:$0xff] }
 0x61b   : > { %v2972_v23 = vshll.u32 %v2809_v21, 16  ;;  %v2984_v26 = vshll.u32 %v2810_v22, 16  ;;  %v3568_v58 = vrot.slane %v2809_v21, 1  ;;  %v3571_v60 = vrot.slane %v2810_v22, 1  ;;  %v7053_v2 = vld [vmem:[#allocation12 + $0x250] sm:$0xff] }
 0x61c   : > { %v2805_v24 = vsel %vm7783_vm2, 0, %v2787_v19  ;;  %v2806_v25 = vsel %vm7783_vm2, 0, %v2794_v20 }
 0x61d   : > { %v2965_v27 = vshrl.u32 %v2805_v24, 16  ;;  %v2967_v28 = vshll.u32 %v2805_v24, 16  ;;  %v2977_v29 = vshrl.u32 %v2806_v25, 16  ;;  %v2979_v30 = vshll.u32 %v2806_v25, 16  ;;  %3433 = vmatpush.bf16.msra.mxu0 %v6985_v3  ;;  %v7044_v3 = vld [vmem:[#allocation12 + $0x208] sm:$0xff] }
 0x61e   : > { %v2974_v32 = vrot.slane %v2972_v23, 1  ;;  %v2986_v34 = vrot.slane %v2984_v26, 1  ;;  %v3567_v57 = vrot.slane %v2805_v24, 1  ;;  %v3570_v59 = vrot.slane %v2806_v25, 1  ;;  %3447 = vmatpush.bf16.msra.mxu1 %v6993_v4  ;;  %v7052_v4 = vld [vmem:[#allocation12 + $0x248] sm:$0xff] }
 0x61f   : > { %v2969_v31 = vrot.slane %v2967_v28, 1  ;;  %v2981_v33 = vrot.slane %v2979_v30, 1 }
 0x620   : > { %v3569_v61 = vsel %vm997_vm5, %v3567_v57, %v3568_v58  ;;  %v3572_v62 = vsel %vm997_vm5, %v3570_v59, %v3571_v60  ;;  %v7049_v57 = vld [vmem:[#allocation12 + $0x230] sm:$0xff]  ;;  %v7048_v59 = vld [vmem:[#allocation12 + $0x228] sm:$0xff] }
 0x621   : > { %v2970_v35 = vor.u32 %v2969_v31, %v2965_v27  ;;  %v2982_v37 = vor.u32 %v2981_v33, %v2977_v29  ;;  %3434 = vmatpush.bf16.msra.mxu0 %v6984_v5  ;;  %v7057_v58 = vld [vmem:[#allocation12 + $0x270] sm:$0xff]  ;;  %v7056_v60 = vld [vmem:[#allocation12 + $0x268] sm:$0xff]  ;;  %v7043_v5 = vld [vmem:[#allocation12 + $0x200] sm:$0xff] }
 0x622   : > { %3448 = vmatpush.bf16.msra.mxu1 %v6992_v6  ;;  %v7051_v6 = vld [vmem:[#allocation12 + $0x240] sm:$0xff] }
 0x623   : > { %v2975_v39 = vsel %vm831_vm4, %v2970_v35, %v2974_v32  ;;  %v2987_v40 = vsel %vm831_vm4, %v2982_v37, %v2986_v34 }
 0x624   : > { %3220 = vmatmul.bf16.vlgmr.msra.gmra.mxu3 %v2975_v39  ;;  %3234 = vmatmul.bf16.vlgmr.msrb.gmra.mxu2 %v2987_v40 }
 0x625   : > { %3797 = vmatpush.bf16.msra.mxu3 %v7066_v36  ;;  %3811 = vmatpush.bf16.msrb.mxu2 %v7074_v38 }
 0x626   : > { %3435 = vmatpush.bf16.msra.mxu0 %v6983_v7  ;;  %3449 = vmatpush.bf16.msra.mxu1 %v6991_v8 }
 0x629   : > { %3798 = vmatpush.bf16.msra.mxu3 %v7065_v41  ;;  %3812 = vmatpush.bf16.msrb.mxu2 %v7073_v42 }
 0x62a   : > { %3436 = vmatpush.bf16.msra.mxu0 %v6982_v46  ;;  %3450 = vmatpush.bf16.msra.mxu1 %v6990_v9 }
 0x62d   : > { %3799 = vmatpush.bf16.msra.mxu3 %v7064_v43  ;;  %3813 = vmatpush.bf16.msrb.mxu2 %v7072_v44 }
 0x62e   : > { %3437 = vmatpush.bf16.msra.mxu0 %v6981_v11  ;;  %3451 = vmatpush.bf16.msra.mxu1 %v6989_v12 }
 0x631   : > { %3800 = vmatpush.bf16.msra.mxu3 %v7063_v45  ;;  %3814 = vmatpush.bf16.msrb.mxu2 %v7071_v47 }
 0x632   : > { %3438 = vmatpush.bf16.msra.mxu0 %v6980_v13  ;;  %3452 = vmatpush.bf16.msra.mxu1 %v6988_v14  ;;  %v7082_v13 = vld [vmem:[#allocation13 + $0x38] sm:$0xff] }
 0x634   : > { %3468 = vmatmul.bf16.vlgmr.msrb.gmra.mxu3 %v2805_v24  ;;  %3482 = vmatmul.bf16.vlgmr.msra.gmra.mxu2 %v2806_v25 }
 0x635   : > { %3801 = vmatpush.bf16.msra.mxu3 %v7062_v48  ;;  %3815 = vmatpush.bf16.msrb.mxu2 %v7070_v49 }
 0x636   : > { %3439 = vmatpush.bf16.msra.mxu0 %v6979_v15  ;;  %3453 = vmatpush.bf16.msra.mxu1 %v6987_v16  ;;  %v7106_v16 = vld [vmem:[#allocation13 + $0xf8] sm:$0xff] }
 0x639   : > { %3802 = vmatpush.bf16.msra.mxu3 %v7061_v50  ;;  %3816 = vmatpush.bf16.msrb.mxu2 %v7069_v51  ;;  %v7050_v51 = vld [vmem:[#allocation12 + $0x238] sm:$0xff] }
 0x63d   : > { %3803 = vmatpush.bf16.msra.mxu3 %v7060_v52  ;;  %3817 = vmatpush.bf16.msrb.mxu2 %v7068_v53 }
 0x641   : > { %3804 = vmatpush.bf16.msra.mxu3 %v7059_v54  ;;  %3818 = vmatpush.bf16.msrb.mxu2 %v7067_v56  ;;  %v7058_v54 = vld [vmem:[#allocation12 + $0x278] sm:$0xff] }
 0x644   : > { %3805 = vmatmul.bf16.vlgmr.msra.gmra.mxu3 %v3569_v61  ;;  %3819 = vmatmul.bf16.vlgmr.msrb.gmra.mxu2 %v3572_v62  ;;  %v7047_v61 = vld [vmem:[#allocation12 + $0x220] sm:$0xff] }
 0x645   : > { %v7055_v62 = vld [vmem:[#allocation12 + $0x260] sm:$0xff]  ;;  %4121 = vmatpush.bf16.msrb.mxu3 %v7082_v13  ;;  %4260 = vmatpush.bf16.msra.mxu2 %v7106_v16 }
 0x67d   : > { %v2682_v17 = vpop.f32.mrf.mxu0  ;;  %v2696_v55 = vpop.f32.mrf.mxu1 }
 0x67e   : > { %v2747_v18 = vpack.c.bf16 %v2696_v55, %v2682_v17  ;;  %v7081_v17 = vld [vmem:[#allocation13 + $0x30] sm:$0xff]  ;;  %v7094_v55 = vld [vmem:[#allocation13 + $0x98] sm:$0xff] }
 0x67f   : > { %4122 = vmatpush.bf16.msrb.mxu3 %v7081_v17 }
 0x680   : > { %v2755_v22 = vunpack.c.l.b16 %v2747_v18  ;;  %v2756_v23 = vunpack.c.h.b16 %v2747_v18  ;;  %v7105_v18 = vld [vmem:[#allocation13 + $0xf0] sm:$0xff] }
 0x681   : > { %4261 = vmatpush.bf16.msra.mxu2 %v7105_v18 }
 0x685   : > { %v2684_v19 = vpop.f32.mrf.mxu0  ;;  %v2698_v20 = vpop.f32.mrf.mxu1 }
 0x686   : > { %v2749_v21 = vpack.c.bf16 %v2698_v20, %v2684_v19  ;;  %v7080_v20 = vld [vmem:[#allocation13 + $0x28] sm:$0xff] }
 0x687   : > { %4123 = vmatpush.bf16.msrb.mxu3 %v7080_v20  ;;  %v7108_v20 = vld [vmem:[#allocation13 + $0x108] sm:$0xff] }
 0x688   : > { %v2759_v24 = vunpack.c.l.b16 %v2749_v21  ;;  %v2760_v25 = vunpack.c.h.b16 %v2749_v21 }
 0x68a   : > { %v2763_v26 = vpack.c.b16 %v2759_v24, %v2755_v22  ;;  %v2764_v27 = vpack.c.b16 %v2760_v25, %v2756_v23  ;;  %v7093_v23 = vld [vmem:[#allocation13 + $0x90] sm:$0xff]  ;;  %v7104_v24 = vld [vmem:[#allocation13 + $0xe8] sm:$0xff]  ;;  %v7079_v25 = vld [vmem:[#allocation13 + $0x20] sm:$0xff] }
 0x68b   : > { %4262 = vmatpush.bf16.msra.mxu2 %v7104_v24  ;;  %4124 = vmatpush.bf16.msrb.mxu3 %v7079_v25 }
 0x68c   : > { %v2768_v28 = vshrl.u32 %v2763_v26, 16  ;;  %v2775_v29 = vshrl.u32 %v2764_v27, 16  ;;  %v2771_v31 = vshll.u32 %v2763_v26, 16  ;;  %v2778_v33 = vshll.u32 %v2764_v27, 16  ;;  %v7092_v27 = vld [vmem:[#allocation13 + $0x88] sm:$0xff] }
 0x68e   : > { %v2770_v30 = vrot.slane %v2768_v28, 7  ;;  %v2777_v32 = vrot.slane %v2775_v29, 7  ;;  %v7103_v28 = vld [vmem:[#allocation13 + $0xe0] sm:$0xff] }
 0x68f   : > { %4263 = vmatpush.bf16.msra.mxu2 %v7103_v28 }
 0x690   : > { %v2773_v34 = vor.u32 %v2771_v31, %v2770_v30  ;;  %v2780_v35 = vor.u32 %v2778_v33, %v2777_v32  ;;  %v2807_v36 = vsel %vm7783_vm2, %v2770_v30, 0  ;;  %v2808_v37 = vsel %vm7783_vm2, %v2777_v32, 0  ;;  %v7078_v30 = vld [vmem:[#allocation13 + $0x18] sm:$0xff]  ;;  %v7091_v32 = vld [vmem:[#allocation13 + $0x80] sm:$0xff] }
 0x691   : > { %v2948_v41 = vshll.u32 %v2807_v36, 16  ;;  %v2960_v43 = vshll.u32 %v2808_v37, 16  ;;  %v3562_v46 = vrot.slane %v2807_v36, 1  ;;  %v3565_v9 = vrot.slane %v2808_v37, 1  ;;  %4125 = vmatpush.bf16.msrb.mxu3 %v7078_v30  ;;  %v7102_v33 = vld [vmem:[#allocation13 + $0xd8] sm:$0xff]  ;;  %v7107_v30 = vld [vmem:[#allocation13 + $0x100] sm:$0xff] }
 0x692   : > { %v2803_v38 = vsel %vm7783_vm2, 0, %v2773_v34  ;;  %v2804_v39 = vsel %vm7783_vm2, 0, %v2780_v35  ;;  %v7077_v34 = vld [vmem:[#allocation13 + $0x10] sm:$0xff]  ;;  %v7090_v37 = vld [vmem:[#allocation13 + $0x78] sm:$0xff]  ;;  %vm4465_vm2 = vcmask 1045504  }
 0x693   : > { %v2943_v40 = vshll.u32 %v2803_v38, 16  ;;  %v2955_v42 = vshll.u32 %v2804_v39, 16  ;;  %v2941_v44 = vshrl.u32 %v2803_v38, 16  ;;  %v2953_v47 = vshrl.u32 %v2804_v39, 16  ;;  %4264 = vmatpush.bf16.msra.mxu2 %v7102_v33 }
 0x694   : > { %v2950_v50 = vrot.slane %v2948_v41, 1  ;;  %v2962_v53 = vrot.slane %v2960_v43, 1  ;;  %v3561_v7 = vrot.slane %v2803_v38, 1  ;;  %v3564_v8 = vrot.slane %v2804_v39, 1 }
 0x695   : > { %v2945_v45 = vrot.slane %v2943_v40, 1  ;;  %v2957_v48 = vrot.slane %v2955_v42, 1  ;;  %4126 = vmatpush.bf16.msrb.mxu3 %v7077_v34  ;;  %v7076_v42 = vld [vmem:[#allocation13 + $0x8] sm:$0xff] }
 0x696   : > { %v3563_v11 = vsel %vm997_vm5, %v3561_v7, %v3562_v46  ;;  %v3566_v12 = vsel %vm997_vm5, %v3564_v8, %v3565_v9  ;;  %v7085_v46 = vld [vmem:[#allocation13 + $0x50] sm:$0xff] }
 0x697   : > { %v2946_v49 = vor.u32 %v2945_v45, %v2941_v44  ;;  %v2958_v52 = vor.u32 %v2957_v48, %v2953_v47  ;;  %v7089_v44 = vld [vmem:[#allocation13 + $0x70] sm:$0xff]  ;;  %v7100_v47 = vld [vmem:[#allocation13 + $0xc8] sm:$0xff] }
 0x698   : > { %v7097_v45 = vld [vmem:[#allocation13 + $0xb0] sm:$0xff] }
 0x699   : > { %v2951_v56 = vsel %vm831_vm4, %v2946_v49, %v2950_v50  ;;  %v2963_v10 = vsel %vm831_vm4, %v2958_v52, %v2962_v53  ;;  %4127 = vmatpush.bf16.msrb.mxu3 %v7076_v42  ;;  %v7075_v49 = vld [vmem:[#allocation13] sm:$0xff]  ;;  %v7122_v50 = vld [vmem:[#allocation13 + $0x178] sm:$0xff]  ;;  %v7088_v52 = vld [vmem:[#allocation13 + $0x68] sm:$0xff] }
 0x69a   : > { %3192 = vmatmul.bf16.vlgmr.msrb.gmra.mxu0 %v2951_v56  ;;  %3206 = vmatmul.bf16.vlgmr.msrb.gmra.mxu1 %v2963_v10  ;;  %v7096_v53 = vld [vmem:[#allocation13 + $0xa8] sm:$0xff]  ;;  %v7109_v9 = vld [vmem:[#allocation13 + $0x110] sm:$0xff]  ;;  %v7272_v42 = vld [vmem:[%s7778_s20] sm:$0xff] }
 0x69b   : > { %3769 = vmatpush.bf16.msrb.mxu0 %v7050_v51  ;;  %3783 = vmatpush.bf16.msrb.mxu1 %v7058_v54  ;;  %v7099_v54 = vld [vmem:[#allocation13 + $0xc0] sm:$0xff] }
 0x69d   : > { %4128 = vmatpush.bf16.msrb.mxu3 %v7075_v49 }
 0x69f   : > { %3770 = vmatpush.bf16.msrb.mxu0 %v7049_v57  ;;  %3784 = vmatpush.bf16.msrb.mxu1 %v7057_v58  ;;  %v7134_v58 = vld [vmem:[#allocation13 + $0x1d8] sm:$0xff] }
 0x6a1   : > { %4428 = vmatpush.bf16.msra.mxu3 %v7122_v50 }
 0x6a3   : > { %3771 = vmatpush.bf16.msrb.mxu0 %v7048_v59  ;;  %3785 = vmatpush.bf16.msrb.mxu1 %v7056_v60 }
 0x6a7   : > { %3772 = vmatpush.bf16.msrb.mxu0 %v7047_v61  ;;  %3786 = vmatpush.bf16.msrb.mxu1 %v7055_v62  ;;  %v3221_v14 = vpop.f32.mrf.mxu3  ;;  %v8178_v15 = vpop.f32.mrf.mxu2  ;;  %v7121_v61 = vld [vmem:[#allocation13 + $0x170] sm:$0xff] }
 0x6a8   : > { %4429 = vmatpush.bf16.msra.mxu3 %v7121_v61 }
 0x6aa   : > { %3440 = vmatmul.bf16.vlgmr.msra.gmra.mxu0 %v2803_v38  ;;  %3454 = vmatmul.bf16.vlgmr.msra.gmra.mxu1 %v2804_v39  ;;  %v7098_v38 = vld [vmem:[#allocation13 + $0xb8] sm:$0xff]  ;;  %v7101_v39 = vld [vmem:[#allocation13 + $0xd0] sm:$0xff] }
 0x6ab   : > { %3773 = vmatpush.bf16.msrb.mxu0 %v7046_v63  ;;  %3787 = vmatpush.bf16.msrb.mxu1 %v7054_v0  ;;  %v7087_v63 = vld [vmem:[#allocation13 + $0x60] sm:$0xff] }
 0x6ac   : > { %4265 = vmatpush.bf16.msra.mxu2 %v7101_v39  ;;  %v7095_v0 = vld [vmem:[#allocation13 + $0xa0] sm:$0xff] }
 0x6af   : > { %3774 = vmatpush.bf16.msrb.mxu0 %v7045_v1  ;;  %3788 = vmatpush.bf16.msrb.mxu1 %v7053_v2  ;;  %v8180_v22 = vpop.f32.mrf.mxu3  ;;  %v8182_v26 = vpop.f32.mrf.mxu2  ;;  %v7086_v2 = vld [vmem:[#allocation13 + $0x58] sm:$0xff] }
 0x6b0   : > { %4266 = vmatpush.bf16.msra.mxu2 %v7100_v47 }
 0x6b3   : > { %3775 = vmatpush.bf16.msrb.mxu0 %v7044_v3  ;;  %3789 = vmatpush.bf16.msrb.mxu1 %v7052_v4  ;;  %v7110_v3 = vld [vmem:[#allocation13 + $0x118] sm:$0xff]  ;;  %v7133_v4 = vld [vmem:[#allocation13 + $0x1d0] sm:$0xff] }
 0x6b4   : > { %4267 = vmatpush.bf16.msra.mxu2 %v7099_v54 }
 0x6b7   : > { %3776 = vmatpush.bf16.msrb.mxu0 %v7043_v5  ;;  %3790 = vmatpush.bf16.msrb.mxu1 %v7051_v6  ;;  %v8184_v35 = vpop.f32.mrf.mxu3  ;;  %v8186_v36 = vpop.f32.mrf.mxu2  ;;  %v7120_v5 = vld [vmem:[#allocation13 + $0x168] sm:$0xff] }
 0x6b8   : > { %4566 = vmatpush.bf16.msrb.mxu2 %v7134_v58  ;;  %4430 = vmatpush.bf16.msra.mxu3 %v7120_v5 }
 0x6ba   : > { %3777 = vmatmul.bf16.vlgmr.msrb.gmra.mxu0 %v3563_v11  ;;  %3791 = vmatmul.bf16.vlgmr.msrb.gmra.mxu1 %v3566_v12  ;;  %v7132_v11 = vld [vmem:[#allocation13 + $0x1c8] sm:$0xff] }
 0x6bb   : > { %4019 = vmatpush.bf16.msra.mxu0 %v7094_v55  ;;  %4037 = vmatpush.bf16.msra.mxu1 %v7098_v38 }
 0x6bc   : > { %4567 = vmatpush.bf16.msrb.mxu2 %v7133_v4 }
 0x6bf   : > { %4020 = vmatpush.bf16.msra.mxu0 %v7093_v23  ;;  %4038 = vmatpush.bf16.msra.mxu1 %v7097_v45  ;;  %v8188_v51 = vpop.f32.mrf.mxu3  ;;  %v8191_v59 = vpop.f32.mrf.mxu2  ;;  %v7273_v45 = vld [vmem:[%s7778_s20 + $0x8] sm:$0xff] }
 0x6c0   : > { %4568 = vmatpush.bf16.msrb.mxu2 %v7132_v11 }
 0x6c3   : > { %4021 = vmatpush.bf16.msra.mxu0 %v7092_v27  ;;  %4039 = vmatpush.bf16.msra.mxu1 %v7096_v53 }
 0x6c7   : > { %4022 = vmatpush.bf16.msra.mxu0 %v7091_v32  ;;  %4040 = vmatpush.bf16.msra.mxu1 %v7095_v0  ;;  %v3806_v12 = vpop.f32.mrf.mxu3  ;;  %v3820_v55 = vpop.f32.mrf.mxu2  ;;  %v7142_v0 = vld [vmem:[#allocation13 + $0x218] sm:$0xff] }
 0x6cb   : > { %4023 = vmatpush.bf16.msra.mxu0 %v7090_v37  ;;  %4139 = vmatpush.bf16.msrb.mxu1 %v7086_v2 }
 0x6cf   : > { %4024 = vmatpush.bf16.msra.mxu0 %v7089_v44  ;;  %4140 = vmatpush.bf16.msrb.mxu1 %v7085_v46  ;;  %v3808_v33 = vpop.f32.mrf.mxu3  ;;  %v7141_v46 = vld [vmem:[#allocation13 + $0x210] sm:$0xff] }
 0x6d3   : > { %4025 = vmatpush.bf16.msra.mxu0 %v7088_v52 }
 0x6d7   : > { %4026 = vmatpush.bf16.msra.mxu0 %v7087_v63 }
 0x6db   : > { %4278 = vmatpush.bf16.msrb.mxu0 %v7110_v3 }
 0x6df   : > { %4279 = vmatpush.bf16.msrb.mxu0 %v7109_v9 }
 0x6e3   : > { %4280 = vmatpush.bf16.msrb.mxu0 %v7108_v20  ;;  %v7130_v20 = vld [vmem:[#allocation13 + $0x1b8] sm:$0xff] }
 0x6e7   : > { %4281 = vmatpush.bf16.msrb.mxu0 %v7107_v30 }
 0x717   : > { %v3193_v19 = vpop.f32.mrf.mxu0  ;;  %v3207_v21 = vpop.f32.mrf.mxu1 }
 0x718   : > { %v3208_v40 = vadd.f32 %v3207_v21, %v3193_v19  ;;  %v7084_v19 = vld [vmem:[#allocation13 + $0x48] sm:$0xff]  ;;  %v7131_v21 = vld [vmem:[#allocation13 + $0x1c0] sm:$0xff] }
 0x719   : > { %4141 = vmatpush.bf16.msrb.mxu1 %v7084_v19  ;;  %4569 = vmatpush.bf16.msrb.mxu2 %v7131_v21 }
 0x71a   : > { %v3222_v48 = vadd.f32 %v3221_v14, %v3208_v40  ;;  %v7119_v14 = vld [vmem:[#allocation13 + $0x160] sm:$0xff] }
 0x71b   : > { %4431 = vmatpush.bf16.msra.mxu3 %v7119_v14 }
 0x71c   : > { %v3236_v10 = vadd.f32 %v8178_v15, %v3222_v48 }
 0x71f   : > { %v3195_v29 = vpop.f32.mrf.mxu0  ;;  %v3209_v31 = vpop.f32.mrf.mxu1 }
 0x720   : > { %v3210_v56 = vadd.f32 %v3209_v31, %v3195_v29  ;;  %v7083_v29 = vld [vmem:[#allocation13 + $0x40] sm:$0xff] }
 0x721   : > { %4142 = vmatpush.bf16.msrb.mxu1 %v7083_v29 }
 0x722   : > { %v3224_v1 = vadd.f32 %v8180_v22, %v3210_v56 }
 0x724   : > { %v3238_v7 = vadd.f32 %v8182_v26, %v3224_v1  ;;  %v7258_v26 = vld [vmem:[%s8413_s16] ss:$0 sm:$0xff] }
 0x727   : > { %v3441_v41 = vpop.f32.mrf.mxu0  ;;  %v3455_v43 = vpop.f32.mrf.mxu1 }
 0x728   : > { %v3442_v62 = vadd.f32 %v3441_v41, %v3236_v10 }
 0x72a   : > { %v3456_v6 = vadd.f32 %v3455_v43, %v3442_v62 }
 0x72c   : > { %v3470_v15 = vadd.f32 %v8184_v35, %v3456_v6 }
 0x72e   : > { %v3484_v22 = vadd.f32 %v8186_v36, %v3470_v15  ;;  %v3822_v36 = vpop.f32.mrf.mxu2 }
 0x72f   : > { %v3443_v57 = vpop.f32.mrf.mxu0  ;;  %v3457_v60 = vpop.f32.mrf.mxu1 }
 0x730   : > { %v3444_v16 = vadd.f32 %v3443_v57, %v3238_v7  ;;  %v7154_v7 = vld [vmem:[#allocation13 + $0x278] sm:$0xff] }
 0x732   : > { %v3458_v23 = vadd.f32 %v3457_v60, %v3444_v16 }
 0x734   : > { %v3472_v31 = vadd.f32 %v8188_v51, %v3458_v23  ;;  %v7118_v23 = vld [vmem:[#allocation13 + $0x158] sm:$0xff] }
 0x736   : > { %v3486_v37 = vadd.f32 %v8191_v59, %v3472_v31 }
 0x737   : > { %v3778_v8 = vpop.f32.mrf.mxu0  ;;  %v3792_v13 = vpop.f32.mrf.mxu1 }
 0x738   : > { %v3793_v17 = vadd.f32 %v3792_v13, %v3778_v8 }
 0x73a   : > { %v3807_v18 = vadd.f32 %v3806_v12, %v3793_v17 }
 0x73c   : > { %v3821_v24 = vadd.f32 %v3820_v55, %v3807_v18 }
 0x73e   : > { %v3825_v25 = vadd.f32 %v3821_v24, %v3484_v22  ;;  %v7153_v24 = vld [vmem:[#allocation13 + $0x270] sm:$0xff] }
 0x73f   : > { %v3780_v27 = vpop.f32.mrf.mxu0  ;;  %v3794_v28 = vpop.f32.mrf.mxu1 }
 0x740   : > { %v3795_v32 = vadd.f32 %v3794_v28, %v3780_v27  ;;  %v3831_v34 = vadd.f32 %v7258_v26, %v3825_v25 }
 0x742   : > { %v3809_v35 = vadd.f32 %v3808_v33, %v3795_v32  ;;  %v3833_v39 = vmax.f32 %v3831_v34, 0.0  ;;  %v7129_v32 = vld [vmem:[#allocation13 + $0x1b0] sm:$0xff]  ;;  %v7152_v34 = vld [vmem:[#allocation13 + $0x268] sm:$0xff] }
 0x743   : > { %v7117_v33 = vld [vmem:[#allocation13 + $0x150] sm:$0xff] }
 0x744   : > { %v3823_v38 = vadd.f32 %v3822_v36, %v3809_v35  ;;  %v3835_v43 = vpack.c.bf16 %v7272_v42, %v3833_v39  ;;  %v7139_v35 = vld [vmem:[#allocation13 + $0x200] sm:$0xff]  ;;  %v7116_v39 = vld [vmem:[#allocation13 + $0x148] sm:$0xff] }
 0x746   : > { %v3826_v40 = vadd.f32 %v3823_v38, %v3486_v37  ;;  %v3839_v48 = vunpack.c.l.b16 %v3835_v43  ;;  %v3840_v49 = vunpack.c.h.b16 %v3835_v43  ;;  %v7128_v38 = vld [vmem:[#allocation13 + $0x1a8] sm:$0xff] }
 0x748   : > { %v3832_v41 = vadd.f32 %v7258_v26, %v3826_v40  ;;  %v7140_v26 = vld [vmem:[#allocation13 + $0x208] sm:$0xff]  ;;  %v7151_v40 = vld [vmem:[#allocation13 + $0x260] sm:$0xff] }
 0x74a   : > { %v3834_v44 = vmax.f32 %v3832_v41, 0.0  ;;  %v7138_v41 = vld [vmem:[#allocation13 + $0x1f8] sm:$0xff] }
 0x74c   : > { %v3836_v47 = vpack.c.bf16 %v7273_v45, %v3834_v44  ;;  %v7127_v45 = vld [vmem:[#allocation13 + $0x1a0] sm:$0xff] }
 0x74e   : > { %v3841_v50 = vunpack.c.l.b16 %v3836_v47  ;;  %v3842_v51 = vunpack.c.h.b16 %v3836_v47  ;;  %v7115_v47 = vld [vmem:[#allocation13 + $0x140] sm:$0xff] }
 0x750   : > { %v3844_v52 = vpack.c.b16 %v3842_v51, %v3840_v49  ;;  %v3843_v53 = vpack.c.b16 %v3841_v50, %v3839_v48  ;;  %v7150_v48 = vld [vmem:[#allocation13 + $0x258] sm:$0xff]  ;;  %v7137_v50 = vld [vmem:[#allocation13 + $0x1f0] sm:$0xff] }
 0x752   : > { %v3854_v54 = vshrl.u32 %v3844_v52, 16  ;;  %v3857_v56 = vshll.u32 %v3844_v52, 16  ;;  %v3846_v10 = vshrl.u32 %v3843_v53, 16  ;;  %v3849_v57 = vshll.u32 %v3843_v53, 16  ;;  %v7126_v53 = vld [vmem:[#allocation13 + $0x198] sm:$0xff] }
 0x754   : > { %v3856_v58 = vrot.slane %v3854_v54, 6  ;;  %v3859_v59 = vrot.slane %v3857_v56, 7  ;;  %v3848_v60 = vrot.slane %v3846_v10, 6  ;;  %v3851_v61 = vrot.slane %v3849_v57, 7  ;;  %v7114_v56 = vld [vmem:[#allocation13 + $0x138] sm:$0xff]  ;;  %v7149_v10 = vld [vmem:[#allocation13 + $0x250] sm:$0xff] }
 0x756   : > { %v3860_v62 = vor.u32 %v3859_v59, %v3856_v58  ;;  %v3852_v63 = vor.u32 %v3851_v61, %v3848_v60  ;;  %v7136_v58 = vld [vmem:[#allocation13 + $0x1e8] sm:$0xff]  ;;  %v7125_v59 = vld [vmem:[#allocation13 + $0x190] sm:$0xff] }
 0x758   : > { %v8205_v1 = vsel %vm3865_vm15, 0, %v3860_v62  ;;  %v8207_v2 = vsel %vm3865_vm15, %v3860_v62, 0  ;;  %v8209_v3 = vsel %vm3865_vm15, 0, %v3852_v63  ;;  %v8211_v4 = vsel %vm3865_vm15, %v3852_v63, 0 }
 0x759   : > { %4129 = vmatmul.bf16.vlgmr.msrb.gmra.mxu3 %v8209_v3  ;;  %v4178_v5 = vrot.slane %v8209_v3, 1  ;;  %v4179_v6 = vrot.slane %v8211_v4, 1  ;;  %v8217_v8 = vshll.u32 %v8209_v3, 16  ;;  %v8220_v9 = vshll.u32 %v8211_v4, 16 }
 0x75a   : > { %4694 = vmatpush.bf16.msrb.mxu3 %v7142_v0  ;;  %v8223_v11 = vshll.u32 %v8205_v1, 16  ;;  %v8226_v12 = vshll.u32 %v8207_v2, 16  ;;  %v8230_v14 = vshrl.u32 %v8209_v3, 16  ;;  %v8234_v16 = vshrl.u32 %v8205_v1, 16  ;;  %v7113_v0 = vld [vmem:[#allocation13 + $0x130] sm:$0xff] }
 0x75b   : > { %v4180_v13 = vsel %vm997_vm5, %v4178_v5, %v4179_v6  ;;  %v3924_v15 = vrot.slane %v8217_v8, 1  ;;  %v4328_v55 = vshrl.u32 %v8207_v2, 16  ;;  %v3929_v19 = vrot.slane %v8220_v9, 1  ;;  %v7148_v5 = vld [vmem:[#allocation13 + $0x248] sm:$0xff]  ;;  %v7135_v6 = vld [vmem:[#allocation13 + $0x1e0] sm:$0xff] }
 0x75c   : > { %4268 = vmatmul.bf16.vlgmr.msra.gmra.mxu2 %v4180_v13  ;;  %v3936_v17 = vrot.slane %v8223_v11, 1  ;;  %v3941_v22 = vrot.slane %v8226_v12, 1  ;;  %v4325_v27 = vrot.slane %v8234_v16, 1  ;;  %v4326_v29 = vrot.slane %v8223_v11, 2 }
 0x75d   : > { %4831 = vmatpush.bf16.msra.mxu2 %v7154_v7  ;;  %v3925_v18 = vor.u32 %v3924_v15, %v8230_v14  ;;  %v4330_v30 = vrot.slane %v4328_v55, 1  ;;  %v4331_v31 = vrot.slane %v8226_v12, 2  ;;  %v4469_v42 = vrot.slane %v8205_v1, 2  ;;  %v7124_v7 = vld [vmem:[#allocation13 + $0x188] sm:$0xff] }
 0x75e   : > { %4695 = vmatpush.bf16.msrb.mxu3 %v7141_v46  ;;  %v3937_v21 = vor.u32 %v3936_v17, %v8234_v16  ;;  %v4327_v36 = vor.u32 %v4326_v29, %v4325_v27  ;;  %v4470_v43 = vrot.slane %v8207_v2, 2  ;;  %v4181_v51 = vrot.slane %v8205_v1, 1  ;;  %v7112_v15 = vld [vmem:[#allocation13 + $0x128] sm:$0xff]  ;;  %v7147_v17 = vld [vmem:[#allocation13 + $0x240] sm:$0xff] }
 0x75f   : > { %v3930_v25 = vsel %vm831_vm4, %v3925_v18, %v3929_v19  ;;  %v4332_v37 = vor.u32 %v4331_v31, %v4330_v30  ;;  %v4182_v52 = vrot.slane %v8207_v2, 1  ;;  %v4319_v54 = vshrl.u32 %v8211_v4, 16 }
 0x760   : > { %4027 = vmatmul.bf16.vlgmr.msra.gmra.mxu0 %v3930_v25  ;;  %v3942_v28 = vsel %vm831_vm4, %v3937_v21, %v3941_v22  ;;  %v4471_v49 = vsel %vm4465_vm2, %v4469_v42, %v4470_v43  ;;  %v4604_v60 = vrot.slane %v8230_v14, 2  ;;  %v4605_v61 = vrot.slane %v8217_v8, 3  ;;  %v7123_v25 = vld [vmem:[#allocation13 + $0x180] sm:$0xff] }
 0x761   : > { %6496 = vmatmul.msk.bf16.vlgmr.msra.gmra.mxu1 %vm884_vm3, %v3942_v28  ;;  %4548 = vmatpush.bf16.msra.mxu0 %v7130_v20  ;;  %v4333_v44 = vsel %vm4315_vm1, %v4327_v36, %v4332_v37  ;;  %v4183_v57 = vsel %vm997_vm5, %v4181_v51, %v4182_v52  ;;  %v4607_v62 = vrot.slane %v4319_v54, 2  ;;  %v4608_v63 = vrot.slane %v8220_v9, 3  ;;  %v7158_v28 = vld [vmem:[#allocation13 + $0x298] sm:$0xff]  ;;  %v7155_v36 = vld [vmem:[#allocation13 + $0x280] sm:$0xff] }
 0x762   : > { %4410 = vmatpush.bf16.msra.mxu1 %v7118_v23  ;;  %4832 = vmatpush.bf16.msra.mxu2 %v7153_v24  ;;  %v4606_v46 = vor.u32 %v4605_v61, %v4604_v60  ;;  %vm4603_vm4 = vsmask.f32 5376  ;;  %v4316_v18 = vrot.slane %v8230_v14, 1  ;;  %v4317_v19 = vrot.slane %v8217_v8, 2  ;;  %v7146_v8 = vld [vmem:[#allocation13 + $0x238] sm:$0xff] }
 0x763   : > { %4696 = vmatpush.bf16.msrb.mxu3 %v7140_v26  ;;  %v4609_v13 = vor.u32 %v4608_v63, %v4607_v62  ;;  %v4321_v20 = vrot.slane %v4319_v54, 1  ;;  %v4322_v21 = vrot.slane %v8220_v9, 2  ;;  %v4749_v23 = vrot.slane %v8209_v3, 3  ;;  %v7111_v26 = vld [vmem:[#allocation13 + $0x120] sm:$0xff] }
 0x764   : > { %v4750_v24 = vrot.slane %v8211_v4, 3  ;;  %v4466_v27 = vrot.slane %v8209_v3, 2  ;;  %v4467_v14 = vrot.slane %v8211_v4, 2  ;;  %v4318_v29 = vor.u32 %v4317_v19, %v4316_v18  ;;  %v7144_v3 = vld [vmem:[#allocation13 + $0x228] sm:$0xff] }
 0x765   : > { %4549 = vmatpush.bf16.msra.mxu0 %v7129_v32  ;;  %v4610_v22 = vsel %vm4603_vm4, %v4606_v46, %v4609_v13  ;;  %v4323_v9 = vor.u32 %v4322_v21, %v4321_v20  ;;  %v7145_v32 = vld [vmem:[#allocation13 + $0x230] sm:$0xff]  ;;  %v7156_v4 = vld [vmem:[#allocation13 + $0x288] sm:$0xff]  ;;  %v4611_v37 = vrot.slane %v8234_v16, 2  ;;  %v4753_v42 = vrot.slane %v8207_v2, 3 }
 0x766   : > { %4411 = vmatpush.bf16.msra.mxu1 %v7117_v33  ;;  %4833 = vmatpush.bf16.msra.mxu2 %v7152_v34  ;;  %v4751_v30 = vsel %vm1292_vm7, %v4749_v23, %v4750_v24  ;;  %v4468_v31 = vsel %vm4465_vm2, %v4466_v27, %v4467_v14  ;;  %v7157_v33 = vld [vmem:[#allocation13 + $0x290] sm:$0xff] }
 0x767   : > { %4697 = vmatpush.bf16.msrb.mxu3 %v7139_v35  ;;  %v4324_v34 = vsel %vm4315_vm1, %v4318_v29, %v4323_v9  ;;  %v7143_v35 = vld [vmem:[#allocation13 + $0x220] sm:$0xff] }
 0x769   : > { %6643 = vmatmul.msk.bf16.vlgmr.msra.gmra.mxu3 %vm884_vm3, %v4333_v44  ;;  %4550 = vmatpush.bf16.msra.mxu0 %v7128_v38  ;;  %v4612_v38 = vrot.slane %v8223_v11, 3 }
 0x76a   : > { %4412 = vmatpush.bf16.msra.mxu1 %v7116_v39  ;;  %4834 = vmatpush.bf16.msra.mxu2 %v7151_v40  ;;  %v4614_v39 = vrot.slane %v4328_v55, 2  ;;  %v4615_v40 = vrot.slane %v8226_v12, 3 }
 0x76b   : > { %4698 = vmatpush.bf16.msrb.mxu3 %v7138_v41  ;;  %v4752_v41 = vrot.slane %v8205_v1, 3  ;;  %v4613_v43 = vor.u32 %v4612_v38, %v4611_v37 }
 0x76c   : > { %6692 = vmatmul.msk.bf16.vlgmr.msrb.gmra.mxu2 %vm884_vm3, %v4471_v49  ;;  %v4616_v44 = vor.u32 %v4615_v40, %v4614_v39 }
 0x76d   : > { %4551 = vmatpush.bf16.msra.mxu0 %v7127_v45  ;;  %v4754_v45 = vsel %vm1292_vm7, %v4752_v41, %v4753_v42 }
 0x76e   : > { %4413 = vmatpush.bf16.msra.mxu1 %v7115_v47  ;;  %4835 = vmatpush.bf16.msra.mxu2 %v7150_v48  ;;  %v4617_v47 = vsel %vm4603_vm4, %v4613_v43, %v4616_v44 }
 0x76f   : > { %4699 = vmatpush.bf16.msrb.mxu3 %v7137_v50 }
 0x770   : > { %6594 = vmatmul.msk.bf16.vlgmr.msrb.gmra.mxu0 %vm884_vm3, %v4183_v57 }
 0x771   : > { %6545 = vmatmul.msk.bf16.vlgmr.msrb.gmra.mxu1 %vm884_vm3, %v8205_v1  ;;  %4552 = vmatpush.bf16.msra.mxu0 %v7126_v53 }
 0x772   : > { %4414 = vmatpush.bf16.msra.mxu1 %v7114_v56  ;;  %4836 = vmatpush.bf16.msra.mxu2 %v7149_v10 }
 0x773   : > { %4700 = vmatpush.bf16.msrb.mxu3 %v7136_v58 }
 0x775   : > { %4553 = vmatpush.bf16.msra.mxu0 %v7125_v59 }
 0x776   : > { %4415 = vmatpush.bf16.msra.mxu1 %v7113_v0  ;;  %4837 = vmatpush.bf16.msra.mxu2 %v7148_v5 }
 0x777   : > { %4701 = vmatpush.bf16.msrb.mxu3 %v7135_v6 }
 0x779   : > { %4554 = vmatpush.bf16.msra.mxu0 %v7124_v7 }
 0x77a   : > { %4416 = vmatpush.bf16.msra.mxu1 %v7112_v15  ;;  %4702 = vmatmul.bf16.vlgmr.msrb.gmra.mxu3 %v4610_v22 }
 0x77b   : > { %4838 = vmatpush.bf16.msra.mxu2 %v7147_v17 }
 0x77d   : > { %4555 = vmatpush.bf16.msra.mxu0 %v7123_v25 }
 0x77e   : > { %4839 = vmatmul.bf16.vlgmr.msra.gmra.mxu2 %v4751_v30  ;;  %4417 = vmatpush.bf16.msra.mxu1 %v7111_v26 }
 0x780   : > { %4556 = vmatmul.bf16.vlgmr.msra.gmra.mxu0 %v4468_v31 }
 0x781   : > { %4849 = vmatpush.bf16.msrb.mxu0 %v7158_v28  ;;  %4418 = vmatmul.bf16.vlgmr.msra.gmra.mxu1 %v4324_v34  ;;  %v7259_v34 = vld [vmem:[%s8451_s5] ss:$0 sm:$0xff]  ;;  %s8454_s5 = sld [smem:[#allocation31_spill]] }
 0x782   : > { %4712 = vmatpush.bf16.msrb.mxu1 %v7146_v8 }
 0x785   : > { %4850 = vmatpush.bf16.msrb.mxu0 %v7157_v33 }
 0x786   : > { %4713 = vmatpush.bf16.msrb.mxu1 %v7145_v32 }
 0x789   : > { %4851 = vmatpush.bf16.msrb.mxu0 %v7156_v4 }
 0x78a   : > { %4714 = vmatpush.bf16.msrb.mxu1 %v7144_v3 }
 0x78d   : > { %4852 = vmatpush.bf16.msrb.mxu0 %v7155_v36 }
 0x78e   : > { %4715 = vmatpush.bf16.msrb.mxu1 %v7143_v35 }
 0x790   : > { %6790 = vmatmul.msk.bf16.vlgmr.msrb.gmra.mxu0 %vm884_vm3, %v4754_v45 }
 0x791   : > { %6741 = vmatmul.msk.bf16.vlgmr.msrb.gmra.mxu1 %vm884_vm3, %v4617_v47 }
 0x7dc   : > { %v4130_v55 = vpop.f32.mrf.mxu3 }
 0x7dd   : > { %v4028_v11 = vpop.f32.mrf.mxu0 }
 0x7de   : > { %v4042_v16 = vpop.f32.mrf.mxu1 }
 0x7df   : > { %v4269_v48 = vpop.f32.mrf.mxu2  ;;  %v4043_v58 = vadd.f32 %v4042_v16, %v4028_v11 }
 0x7e1   : > { %v4131_v61 = vadd.f32 %v4130_v55, %v4043_v58 }
 0x7e4   : > { %v4132_v50 = vpop.f32.mrf.mxu3 }
 0x7e5   : > { %v4030_v12 = vpop.f32.mrf.mxu0 }
 0x7e6   : > { %v4044_v49 = vpop.f32.mrf.mxu1 }
 0x7e7   : > { %v4271_v2 = vpop.f32.mrf.mxu2  ;;  %v4045_v0 = vadd.f32 %v4044_v49, %v4030_v12 }
 0x7e9   : > { %v4133_v13 = vadd.f32 %v4132_v50, %v4045_v0 }
 0x7ec   : > { %v4433_v54 = vpop.f32.mrf.mxu3 }
 0x7ed   : > { %v4283_v1 = vpop.f32.mrf.mxu0 }
 0x7ee   : > { %v4144_v51 = vpop.f32.mrf.mxu1  ;;  %v4284_v6 = vadd.f32 %v4283_v1, %v4269_v48 }
 0x7ef   : > { %v4571_v56 = vpop.f32.mrf.mxu2  ;;  %v4145_v5 = vadd.f32 %v4144_v51, %v4131_v61 }
 0x7f1   : > { %v4288_v46 = vadd.f32 %v4284_v6, %v4145_v5 }
 0x7f4   : > { %v4435_v59 = vpop.f32.mrf.mxu3 }
 0x7f5   : > { %v4285_v52 = vpop.f32.mrf.mxu0 }
 0x7f6   : > { %v4146_v53 = vpop.f32.mrf.mxu1  ;;  %v4286_v18 = vadd.f32 %v4285_v52, %v4271_v2 }
 0x7f7   : > { %v4573_v60 = vpop.f32.mrf.mxu2  ;;  %v4147_v17 = vadd.f32 %v4146_v53, %v4133_v13 }
 0x7f9   : > { %v4289_v26 = vadd.f32 %v4286_v18, %v4147_v17 }
 0x7fd   : > { %v4557_v10 = vpop.f32.mrf.mxu0  ;;  %v4703_v15 = vpop.f32.mrf.mxu3 }
 0x7fe   : > { %v4419_v57 = vpop.f32.mrf.mxu1  ;;  %v4572_v23 = vadd.f32 %v4571_v56, %v4557_v10 }
 0x7ff   : > { %v4434_v7 = vadd.f32 %v4433_v54, %v4419_v57 }
 0x801   : > { %v4438_v19 = vadd.f32 %v4434_v7, %v4288_v46  ;;  %v4840_v21 = vpop.f32.mrf.mxu2 }
 0x803   : > { %v4576_v27 = vadd.f32 %v4572_v23, %v4438_v19 }
 0x805   : > { %v4559_v62 = vpop.f32.mrf.mxu0  ;;  %v4705_v28 = vpop.f32.mrf.mxu3 }
 0x806   : > { %v4421_v63 = vpop.f32.mrf.mxu1  ;;  %v4574_v29 = vadd.f32 %v4573_v60, %v4559_v62 }
 0x807   : > { %v4436_v24 = vadd.f32 %v4435_v59, %v4421_v63 }
 0x809   : > { %v4439_v14 = vadd.f32 %v4436_v24, %v4289_v26  ;;  %v4842_v4 = vpop.f32.mrf.mxu2 }
 0x80b   : > { %v4577_v32 = vadd.f32 %v4574_v29, %v4439_v14  ;;  %v8302_v29 = vld [vmem:[%s8452_s30] sm:$0xff] }
 0x80d   : > { %v4854_v20 = vpop.f32.mrf.mxu0 }
 0x80e   : > { %v4717_v22 = vpop.f32.mrf.mxu1  ;;  %v4855_v9 = vadd.f32 %v4854_v20, %v4840_v21 }
 0x80f   : > { %v4718_v25 = vadd.f32 %v4717_v22, %v4703_v15 }
 0x811   : > { %v4722_v8 = vadd.f32 %v4718_v25, %v4576_v27 }
 0x813   : > { %v4859_v33 = vadd.f32 %v4855_v9, %v4722_v8  ;;  %v8307_v9 = vld [vmem:[%s8452_s30 + $0x8] sm:$0xff] }
 0x815   : > { %v4856_v31 = vpop.f32.mrf.mxu0  ;;  %v4865_v37 = vadd.f32 %v7259_v34, %v4859_v33 }
 0x816   : > { %v4719_v30 = vpop.f32.mrf.mxu1  ;;  %v4857_v36 = vadd.f32 %v4856_v31, %v4842_v4  ;;  %v4932_v31 = vld [vmem:[%s8453_s24 + $0x8] sm:$0xff] }
 0x817   : > { %v4720_v3 = vadd.f32 %v4719_v30, %v4705_v28  ;;  %v4867_v40 = vmul.f32 10.0, %v4865_v37  ;;  %v4931_v30 = vld [vmem:[%s8453_s24] sm:$0xff] }
 0x819   : > { %v4723_v35 = vadd.f32 %v4720_v3, %v4577_v32 }
 0x81b   : > { %v4860_v38 = vadd.f32 %v4857_v36, %v4723_v35 }
 0x81d   : > { %v4866_v39 = vadd.f32 %v7259_v34, %v4860_v38 }
 0x81f   : > { %v4868_v41 = vmul.f32 10.0, %v4866_v39 }
 0x821   : > { %v4869_v42 = vmax.f32 %v4867_v40, %v4868_v41 }
 0x823   : > { %v4870_v43 = vrot.slane %v4869_v42, 4 }
 0x825   : > { %v4871_v44 = vmax.f32 %v4869_v42, %v4870_v43 }
 0x827   : > { %v4872_v45 = vrot.slane %v4871_v44, 2 }
 0x829   : > { %v4873_v47 = vmax.f32 %v4871_v44, %v4872_v45 }
 0x82b   : > { %v4874_v11 = vrot.slane %v4873_v47, 1 }
 0x82d   : > { %v4875_v16 = vmax.f32 %v4873_v47, %v4874_v11 }
 0x82f   : > { %4876 = vrot.lane.b32.xlu0 %v4875_v16, %s7554_s4 }
 0x8a1   : > { %v4877_v55 = vpop.permute.xlu0 %4876 }
 0x8a2   : > { %v4878_v12 = vmax.f32 %v4875_v16, %v4877_v55 }
 0x8a4   : > { %4879 = vrot.lane.b32.xlu0 %v4878_v12, %s7555_s0 }
 0x916   : > { %v4880_v48 = vpop.permute.xlu0 %4879 }
 0x917   : > { %v4881_v49 = vmax.f32 %v4878_v12, %v4880_v48 }
 0x919   : > { %4882 = vrot.lane.b32.xlu1 %v4881_v49, %s7556_s27 }
 0x98b   : > { %v4883_v50 = vpop.permute.xlu1 %4882 }
 0x98c   : > { %v4884_v1 = vmax.f32 %v4881_v49, %v4883_v50 }
 0x98e   : > { %4885 = vrot.lane.b32.xlu1 %v4884_v1, %s7557_s10 }
 0xa00   : > { %v4886_v51 = vpop.permute.xlu1 %4885 }
 0xa01   : > { %v4887_v2 = vmax.f32 %v4884_v1, %v4886_v51 }
 0xa03   : > { %v4888_v52 = vperm.slane %v4887_v2, 0 }
 0xa05   : > { %v4889_v53 = vsub.f32 %v4867_v40, %v4888_v52  ;;  %v4890_v54 = vsub.f32 %v4868_v41, %v4888_v52 }
 0xa07   : > { %v4891_v56 = vmul.f32 1.442695, %v4889_v53  ;;  %v4893_v10 = vmul.f32 1.442695, %v4890_v54 }
 0xa09   : > { %7260 = vpow2.f32 %v4891_v56 }
 0xa0a   : > { %7262 = vpow2.f32 %v4893_v10 }
 0xa0f   : > { %v7261_v57 = vpop.eup %7260 }
 0xa10   : > { %v7263_v58 = vpop.eup %7262 }
 0xa11   : > { %v4895_v59 = vadd.f32 %v7263_v58, %v7261_v57 }
 0xa13   : > { %v4896_v60 = vrot.slane %v4895_v59, 4 }
 0xa15   : > { %v4897_v61 = vadd.f32 %v4896_v60, %v4895_v59 }
 0xa17   : > { %v4898_v62 = vrot.slane %v4897_v61, 2 }
 0xa19   : > { %v4899_v63 = vadd.f32 %v4898_v62, %v4897_v61 }
 0xa1b   : > { %v4900_v0 = vrot.slane %v4899_v63, 1 }
 0xa1d   : > { %v4901_v5 = vadd.f32 %v4900_v0, %v4899_v63 }
 0xa1f   : > { %4902 = vrot.lane.b32.xlu2 %v4901_v5, %s7554_s4 }
 0xa79   : > { %v4903_v6 = vpop.permute.xlu2 %4902 }
 0xa7a   : > { %v4904_v7 = vadd.f32 %v4903_v6, %v4901_v5 }
 0xa7c   : > { %4905 = vrot.lane.b32.xlu2 %v4904_v7, %s7555_s0 }
 0xad6   : > { %v4906_v46 = vpop.permute.xlu2 %4905 }
 0xad7   : > { %v4907_v13 = vadd.f32 %v4906_v46, %v4904_v7 }
 0xad9   : > { %4908 = vrot.lane.b32.xlu0 %v4907_v13, %s7556_s27 }
 0xb4b   : > { %v4909_v15 = vpop.permute.xlu0 %4908 }
 0xb4c   : > { %v4910_v17 = vadd.f32 %v4909_v15, %v4907_v13 }
 0xb4e   : > { %4911 = vrot.lane.b32.xlu1 %v4910_v17, %s7557_s10 }
 0xbc0   : > { %v4912_v18 = vpop.permute.xlu1 %4911 }
 0xbc1   : > { %v4913_v19 = vadd.f32 %v4912_v18, %v4910_v17 }
 0xbc3   : > { %7264 = vrcp.f32 %v4913_v19  ;;  %v4925_v23 = vand.u32 2147483648, %v4913_v19  ;;  %v4923_v25 = vand.u32 2147483647, %v4913_v19  ;;  %vm4919_vm5 = vweird.f32 %v4913_v19 }
 0xbc5   : > { %v4926_v27 = vor.u32 1.1754944e-38, %v4925_v23  ;;  %vm4924_vm8 = vcmp.eq.f32.partialorder %v4923_v25, 8.507059e+37 }
 0xbc9   : > { %v7265_v20 = vpop.eup %7264 }
 0xbca   : > { %v4915_v21 = vmul.f32 %v7265_v20, %v4913_v19  ;;  %vm4920_vm3 = vweird.f32 %v7265_v20 }
 0xbcb   : > { %vm4921_vm6 = vmor %vm4919_vm5, %vm4920_vm3 }
 0xbcc   : > { %v4916_v22 = vsub.f32 1.0, %v4915_v21 }
 0xbce   : > { %v4917_v24 = vmul.f32 %v7265_v20, %v4916_v22 }
 0xbd0   : > { %v4918_v26 = vadd.f32 %v7265_v20, %v4917_v24 }
 0xbd2   : > { %v4922_v14 = vsel %vm4921_vm6, %v7265_v20, %v4918_v26 }
 0xbd3   : > { %v4927_v8 = vsel %vm4924_vm8, %v4926_v27, %v4922_v14 }
 0xbd4   : > { %v4928_v28 = vperm.slane %v4927_v8, 0 }
 0xbd6   : > { %v8315_v32 = vmul.f32 %v7261_v57, %v4928_v28  ;;  %v8317_v33 = vmul.f32 %v7263_v58, %v4928_v28 }
 0xbd8   : > { %v4956_v34 = vmul.f32 %v8302_v29, %v8315_v32  ;;  %v4957_v3 = vmul.f32 %v8307_v9, %v8317_v33  ;;  %v4935_v4 = vmul.f32 %v4931_v30, %v8315_v32  ;;  %v4936_v35 = vmul.f32 %v4932_v31, %v8317_v33 }
 0xbda   : > { %v4958_v36 = vadd.f32 %v4957_v3, %v4956_v34  ;;  %v4937_v37 = vadd.f32 %v4936_v35, %v4935_v4 }
 0xbdc   : > { %v4959_v38 = vrot.slane %v4958_v36, 4  ;;  %v4938_v39 = vrot.slane %v4937_v37, 4 }
 0xbde   : > { %v4960_v40 = vadd.f32 %v4959_v38, %v4958_v36  ;;  %v4939_v41 = vadd.f32 %v4938_v39, %v4937_v37 }
 0xbe0   : > { %v4961_v42 = vrot.slane %v4960_v40, 2  ;;  %v4940_v43 = vrot.slane %v4939_v41, 2 }
 0xbe2   : > { %v4962_v44 = vadd.f32 %v4961_v42, %v4960_v40  ;;  %v4941_v45 = vadd.f32 %v4940_v43, %v4939_v41 }
 0xbe4   : > { %v4963_v47 = vrot.slane %v4962_v44, 1  ;;  %v4942_v11 = vrot.slane %v4941_v45, 1 }
 0xbe6   : > { %v4964_v16 = vadd.f32 %v4963_v47, %v4962_v44  ;;  %v4943_v55 = vadd.f32 %v4942_v11, %v4941_v45 }
 0xbe8   : > { %4965 = vrot.lane.b32.xlu0 %v4964_v16, %s7554_s4  ;;  %4944 = vrot.lane.b32.xlu2 %v4943_v55, %s7554_s4 }
 0xc42   : > { %v4945_v12 = vpop.permute.xlu2 %4944 }
 0xc43   : > { %v4946_v48 = vadd.f32 %v4945_v12, %v4943_v55 }
 0xc45   : > { %4947 = vrot.lane.b32.xlu1 %v4946_v48, %s7555_s0 }
 0xc5a   : > { %v4966_v49 = vpop.permute.xlu0 %4965 }
 0xc5b   : > { %v4967_v50 = vadd.f32 %v4966_v49, %v4964_v16 }
 0xc5d   : > { %4968 = vrot.lane.b32.xlu2 %v4967_v50, %s7555_s0 }
 0xcb7   : > { %v4948_v1 = vpop.permute.xlu1 %4947  ;;  %v4969_v51 = vpop.permute.xlu2 %4968 }
 0xcb8   : > { %v4949_v2 = vadd.f32 %v4948_v1, %v4946_v48  ;;  %v4970_v52 = vadd.f32 %v4969_v51, %v4967_v50 }
 0xcba   : > { %4950 = vrot.lane.b32.xlu0 %v4949_v2, %s7556_s27  ;;  %4971 = vrot.lane.b32.xlu1 %v4970_v52, %s7556_s27 }
 0xd2c   : > { %v4951_v53 = vpop.permute.xlu0 %4950  ;;  %v4972_v54 = vpop.permute.xlu1 %4971 }
 0xd2d   : > { %v4952_v56 = vadd.f32 %v4951_v53, %v4949_v2  ;;  %v4973_v10 = vadd.f32 %v4972_v54, %v4970_v52 }
 0xd2f   : > { %4953 = vrot.lane.b32.xlu2 %v4952_v56, %s7557_s10  ;;  %4974 = vrot.lane.b32.xlu0 %v4973_v10, %s7557_s10 }
 0xd89   : > { %v4954_v57 = vpop.permute.xlu2 %4953 }
 0xd8a   : > { %v4955_v58 = vadd.f32 %v4954_v57, %v4952_v56 }
 0xd8c   : > { %v4977_v59 = vperm.slane %v4955_v58, 0 }
 0xd8e   : > { %v8333_v60 = vsub.f32 %v4931_v30, %v4977_v59  ;;  %v8335_v61 = vsub.f32 %v4932_v31, %v4977_v59 }
 0xd90   : > { %v4983_v62 = vmul.f32 %v8333_v60, %v8315_v32  ;;  %v4984_v63 = vmul.f32 %v8335_v61, %v8317_v33 }
 0xd92   : > { %v4987_v0 = vmul.f32 %v4983_v62, %v8333_v60  ;;  %v4988_v5 = vmul.f32 %v4984_v63, %v8335_v61 }
 0xd94   : > { %v4989_v6 = vadd.f32 %v4988_v5, %v4987_v0 }
 0xd96   : > { %v4990_v7 = vrot.slane %v4989_v6, 4 }
 0xd98   : > { %v4991_v46 = vadd.f32 %v4990_v7, %v4989_v6 }
 0xd9a   : > { %v4992_v13 = vrot.slane %v4991_v46, 2 }
 0xd9c   : > { %v4993_v15 = vadd.f32 %v4992_v13, %v4991_v46 }
 0xd9e   : > { %v4994_v17 = vrot.slane %v4993_v15, 1 }
 0xda0   : > { %v4995_v18 = vadd.f32 %v4994_v17, %v4993_v15 }
 0xda1   : > { %v4975_v19 = vpop.permute.xlu0 %4974 }
 0xda2   : > { %v4976_v20 = vadd.f32 %v4975_v19, %v4973_v10  ;;  %4996 = vrot.lane.b32.xlu1 %v4995_v18, %s7554_s4 }
 0xda4   : > { %v4980_v21 = vperm.slane %v4976_v20, 0  ;;  %v5099_v22 = vrot.slane %v4976_v20, 7 }
 0xda6   : > { %v8345_v23 = vsub.f32 %v8302_v29, %v4980_v21  ;;  %v8348_v24 = vsub.f32 %v8307_v9, %v4980_v21  ;;  %v5111_v25 = vsel %vm809_vm0, %v4955_v58, %v5099_v22  ;;  %vm5113_vm0 = vcmask 1042432  }
 0xda8   : > { %v5008_v26 = vmul.f32 %v4983_v62, %v8345_v23  ;;  %v5009_v27 = vmul.f32 %v4984_v63, %v8348_v24  ;;  %v4985_v14 = vmul.f32 %v8345_v23, %v8315_v32  ;;  %v4986_v8 = vmul.f32 %v8348_v24, %v8317_v33 }
 0xdaa   : > { %v5010_v28 = vadd.f32 %v5009_v27, %v5008_v26  ;;  %v5029_v30 = vmul.f32 %v4985_v14, %v8345_v23  ;;  %v5030_v29 = vmul.f32 %v4986_v8, %v8348_v24 }
 0xdac   : > { %v5011_v31 = vrot.slane %v5010_v28, 4  ;;  %v5031_v9 = vadd.f32 %v5030_v29, %v5029_v30 }
 0xdae   : > { %v5012_v34 = vadd.f32 %v5011_v31, %v5010_v28  ;;  %v5032_v3 = vrot.slane %v5031_v9, 4 }
 0xdb0   : > { %v5013_v4 = vrot.slane %v5012_v34, 2  ;;  %v5033_v35 = vadd.f32 %v5032_v3, %v5031_v9 }
 0xdb2   : > { %v5014_v36 = vadd.f32 %v5013_v4, %v5012_v34  ;;  %v5034_v37 = vrot.slane %v5033_v35, 2 }
 0xdb4   : > { %v5015_v38 = vrot.slane %v5014_v36, 1  ;;  %v5035_v39 = vadd.f32 %v5034_v37, %v5033_v35 }
 0xdb6   : > { %v5016_v40 = vadd.f32 %v5015_v38, %v5014_v36  ;;  %v5036_v32 = vrot.slane %v5035_v39, 1 }
 0xdb8   : > { %5017 = vrot.lane.b32.xlu2 %v5016_v40, %s7554_s4  ;;  %v5037_v33 = vadd.f32 %v5036_v32, %v5035_v39 }
 0xdba   : > { %5038 = vrot.lane.b32.xlu0 %v5037_v33, %s7554_s4  ;;  %s8375_s4 = scalar_lea.vmem %s8454_s5, %s7159_s18 }
 0xe12   : > { %v5018_v41 = vpop.permute.xlu2 %5017 }
 0xe13   : > { %v5019_v42 = vadd.f32 %v5018_v41, %v5016_v40 }
 0xe14   : > { %v4997_v43 = vpop.permute.xlu1 %4996 }
 0xe15   : > { %v4998_v44 = vadd.f32 %v4997_v43, %v4995_v18  ;;  %5020 = vrot.lane.b32.xlu2 %v5019_v42, %s7555_s0 }
 0xe17   : > { %4999 = vrot.lane.b32.xlu1 %v4998_v44, %s7555_s0 }
 0xe2c   : > { %v5039_v45 = vpop.permute.xlu0 %5038 }
 0xe2d   : > { %v5040_v47 = vadd.f32 %v5039_v45, %v5037_v33 }
 0xe2f   : > { %5041 = vrot.lane.b32.xlu0 %v5040_v47, %s7555_s0 }
 0xe6f   : > { %v5021_v11 = vpop.permute.xlu2 %5020 }
 0xe70   : > { %v5022_v16 = vadd.f32 %v5021_v11, %v5019_v42 }
 0xe72   : > { %5023 = vrot.lane.b32.xlu2 %v5022_v16, %s7556_s27 }
 0xe89   : > { %v5000_v55 = vpop.permute.xlu1 %4999 }
 0xe8a   : > { %v5001_v12 = vadd.f32 %v5000_v55, %v4998_v44 }
 0xe8c   : > { %5002 = vrot.lane.b32.xlu1 %v5001_v12, %s7556_s27 }
 0xea1   : > { %v5042_v48 = vpop.permute.xlu0 %5041 }
 0xea2   : > { %v5043_v49 = vadd.f32 %v5042_v48, %v5040_v47 }
 0xea4   : > { %5044 = vrot.lane.b32.xlu0 %v5043_v49, %s7556_s27 }
 0xecc   : > { %v5024_v50 = vpop.permute.xlu2 %5023 }
 0xecd   : > { %v5025_v1 = vadd.f32 %v5024_v50, %v5022_v16 }
 0xecf   : > { %5026 = vrot.lane.b32.xlu2 %v5025_v1, %s7557_s10 }
 0xefe   : > { %v5003_v51 = vpop.permute.xlu1 %5002 }
 0xeff   : > { %v5004_v2 = vadd.f32 %v5003_v51, %v5001_v12 }
 0xf01   : > { %5005 = vrot.lane.b32.xlu1 %v5004_v2, %s7557_s10 }
 0xf16   : > { %v5045_v52 = vpop.permute.xlu0 %5044 }
 0xf17   : > { %v5046_v53 = vadd.f32 %v5045_v52, %v5043_v49 }
 0xf19   : > { %5047 = vrot.lane.b32.xlu0 %v5046_v53, %s7557_s10 }
 0xf29   : > { %v5027_v10 = vpop.permute.xlu2 %5026 }
 0xf2a   : > { %v5028_v58 = vadd.f32 %v5027_v10, %v5025_v1 }
 0xf2c   : > { %v5105_v0 = vrot.slane %v5028_v58, 5  ;;  %v5051_v5 = vmul.f32 %v5028_v58, %v5028_v58  ;;  %v5069_v8 = vsub.f32 0.0, %v5028_v58 }
 0xf73   : > { %v5006_v54 = vpop.permute.xlu1 %5005 }
 0xf74   : > { %v5007_v56 = vadd.f32 %v5006_v54, %v5004_v2 }
 0xf76   : > { %v5102_v57 = vrot.slane %v5007_v56, 6 }
 0xf78   : > { %v5112_v62 = vsel %vm1889_vm12, %v5111_v25, %v5102_v57 }
 0xf79   : > { %v5114_v46 = vsel %vm5113_vm0, %v5112_v62, %v5105_v0 }
 0xf8b   : > { %v5048_v59 = vpop.permute.xlu0 %5047 }
 0xf8c   : > { %v5049_v63 = vadd.f32 %v5048_v59, %v5046_v53 }
 0xf8e   : > { %v5050_v6 = vmul.f32 %v5049_v63, %v5007_v56  ;;  %v5108_v7 = vrot.slane %v5049_v63, 4 }
 0xf90   : > { %v5052_v13 = vsub.f32 %v5050_v6, %v5051_v5  ;;  %v5115_v15 = vsel %vm1694_vm10, %v5114_v46, %v5108_v7 }
 0xf91   : > { %v5117_v17 = vsel %vm1292_vm7, %v5115_v15, 0.0 }
 0xf92   : > { %v5053_v18 = vadd.f32 1e-08, %v5052_v13  ;;  %5120 = vst [vmem:[%s8375_s4 + $0x10] sm:$0xff] %v5117_v17 }
 0xf94   : > { %7266 = vrcp.f32 %v5053_v18  ;;  %v5065_v22 = vand.u32 2147483648, %v5053_v18  ;;  %v5063_v26 = vand.u32 2147483647, %v5053_v18  ;;  %vm5059_vm11 = vweird.f32 %v5053_v18 }
 0xf96   : > { %v5066_v14 = vor.u32 1.1754944e-38, %v5065_v22  ;;  %vm5064_vm13 = vcmp.eq.f32.partialorder %v5063_v26, 8.507059e+37 }
 0xf9a   : > { %v7267_v19 = vpop.eup %7266 }
 0xf9b   : > { %v5055_v20 = vmul.f32 %v7267_v19, %v5053_v18  ;;  %vm5060_vm9 = vweird.f32 %v7267_v19 }
 0xf9c   : > { %vm5061_vm12 = vmor %vm5059_vm11, %vm5060_vm9 }
 0xf9d   : > { %v5056_v21 = vsub.f32 1.0, %v5055_v20 }
 0xf9f   : > { %v5057_v25 = vmul.f32 %v7267_v19, %v5056_v21 }
 0xfa1   : > { %v5058_v27 = vadd.f32 %v7267_v19, %v5057_v25 }
 0xfa3   : > { %v5062_v28 = vsel %vm5061_vm12, %v7267_v19, %v5058_v27 }
 0xfa4   : > { %v5067_v30 = vsel %vm5064_vm13, %v5066_v14, %v5062_v28 }
 0xfa5   : > { %v5068_v29 = vmul.f32 %v5067_v30, %v5049_v63  ;;  %v5070_v31 = vmul.f32 %v5069_v8, %v5067_v30  ;;  %v5071_v9 = vmul.f32 %v5067_v30, %v5007_v56 }
 0xfa7   : > { %v5072_v34 = vperm.slane %v5068_v29, 0  ;;  %v5077_v3 = vmul.f32 2.0, %v5070_v31  ;;  %v5085_v4 = vperm.slane %v5071_v9, 0 }
 0xfa9   : > { %v5073_v35 = vmul.f32 %v5072_v34, %v8333_v60  ;;  %v5074_v36 = vmul.f32 %v5072_v34, %v8335_v61  ;;  %v5078_v37 = vperm.slane %v5077_v3, 0  ;;  %v5086_v40 = vmul.f32 %v5085_v4, %v8345_v23 }
 0xfaa   : > { %v5087_v32 = vmul.f32 %v5085_v4, %v8348_v24 }
 0xfab   : > { %v5079_v38 = vmul.f32 %v5078_v37, %v8333_v60  ;;  %v5080_v39 = vmul.f32 %v5078_v37, %v8335_v61  ;;  %v5075_v33 = vmul.f32 %v5073_v35, %v8333_v60  ;;  %v5076_v41 = vmul.f32 %v5074_v36, %v8335_v61 }
 0xfac   : > { %v5088_v47 = vmul.f32 %v5086_v40, %v8345_v23  ;;  %v5089_v11 = vmul.f32 %v5087_v32, %v8348_v24 }
 0xfad   : > { %v5081_v42 = vmul.f32 %v5079_v38, %v8345_v23  ;;  %v5082_v43 = vmul.f32 %v5080_v39, %v8348_v24 }
 0xfaf   : > { %v5083_v44 = vadd.f32 %v5081_v42, %v5075_v33  ;;  %v5084_v45 = vadd.f32 %v5082_v43, %v5076_v41 }
 0xfb1   : > { %v5090_v16 = vadd.f32 %v5088_v47, %v5083_v44  ;;  %v5091_v55 = vadd.f32 %v5089_v11, %v5084_v45 }
 0xfb3   : > { %v5092_v12 = vmul.f32 -0.5, %v5090_v16  ;;  %v5093_v48 = vmul.f32 -0.5, %v5091_v55 }
 0xfb5   : > { %v5094_v49 = vmul.f32 1.442695, %v5092_v12  ;;  %v5096_v60 = vmul.f32 1.442695, %v5093_v48 }
 0xfb7   : > { %7268 = vpow2.f32 %v5094_v49 }
 0xfb8   : > { %7270 = vpow2.f32 %v5096_v60 }
 0xfbd   : > { %v7269_v61 = vpop.eup %7268 }
 0xfbe   : > { %v7271_v50 = vpop.eup %7270  ;;  %5118 = vst [vmem:[%s8375_s4] sm:$0xff] %v7269_v61 }
 0xfbf   : > { %5119 = vst [vmem:[%s8375_s4 + $0x8] sm:$0xff] %v7271_v50 }
 0xfc0 PF: > { %s8455_s28 = sld [smem:[#allocation20_spill]] }
 0xfc6   : > { %s36_s2 = sadd.s32 1, %s8455_s28  }
 0xfc7   : > { %p33_p7 = scmp.ge.s32.totalorder %s36_s2, 4  }
 0xfc9   :  { %35 = sbr.rel (!%p33_p7) target bundleno = 17 (0x11), region = 181 }
 0xfce   :  { %5142 = vsyncpa [#allocation3], 1 }
 0xfcf   :  { %5144 = vsyncpa [#allocation3 + $0x1], 1 }
 0xfd0   :  { %5145 = vsyncpa [#allocation5], 1 }
 0xfd1   :  { %5146 = vsyncpa [#allocation8], 1 }
 0xfd2   :  { %5147 = vsyncpa [#allocation11], 1 }
 0xfd3   :  { %5148 = vsyncpa [#allocation14], 1 }

</bundles_post_ra>
